<compile_context>
chip_gen: v6e
topology: v6e:2x2x1
jax: 0.10.0
libtpu: 0.0.40
codegen_flags: <defaults>
</compile_context>

<pallas_src>
import jax
import jax.numpy as jnp
from jax.experimental import pallas as pl
from jax.experimental.pallas import tpu as pltpu


def _recurrent_dueling_kernel(
    x_ref,                                               # (T, B, obs) time-major
    wih0_ref, whhrz0_ref, whhn0_ref, bi0_ref, bhn0_ref,  # GRU layer 0
    wih1_ref, whhrz1_ref, whhn1_ref, bi1_ref, bhn1_ref,  # GRU layer 1
    wih2_ref, whhrz2_ref, whhn2_ref, bi2_ref, bhn2_ref,  # GRU layer 2
    wm_ref, bm_ref,                                      # linear_middle
    wav1_ref, bav1_ref,                                  # fused [advantage|value] hidden layer
    wav2_ref, bav2_ref,                                  # fused block-diag [A|V] output layer
    q_ref,                                               # out: (B, act)
):
  B, act = q_ref.shape
  T = x_ref.shape[0]
  H = whhn0_ref.shape[0]

  def gru_layer(x_steps, wih_ref, whhrz_ref, whhn_ref, bi_ref, bhn_ref):
    """One GRU layer over T statically unrolled steps -> list of (B, H) outputs."""
    wih = wih_ref[...]                                   # (in, 3H)  gate order r|z|n
    whh_rz = whhrz_ref[...]                              # (H, 2H)   fused W_hr | W_hz
    whh_n = whhn_ref[...]                                # (H, H)    W_hn
    bi = jnp.broadcast_to(bi_ref[...], (B, 3 * H))       # hoisted broadcasts
    bhn = jnp.broadcast_to(bhn_ref[...], (B, H))
    h = None
    outs = []
    for t in range(T):
      # Input-gate projection: depends only on the previous layer's step-t
      # output, so it is off this layer's serial recurrence chain.
      g = jnp.dot(x_steps[t], wih, preferred_element_type=jnp.float32) + bi
      if h is None:
        # h_0 == 0: both hidden-gate matmuls vanish exactly.
        rz = jax.nn.sigmoid(g[:, :2 * H])                # fused r|z, one 128-lane EUP op
        r, z = rz[:, :H], rz[:, H:]
        n = jnp.tanh(g[:, 2 * H:] + r * bhn)
        h = (1.0 - z) * n
      else:
        gh_rz = jnp.dot(h, whh_rz, preferred_element_type=jnp.float32)  # issued first
        gh_n = jnp.dot(h, whh_n, preferred_element_type=jnp.float32)
        rz = jax.nn.sigmoid(g[:, :2 * H] + gh_rz)        # fused r|z sigmoid
        r, z = rz[:, :H], rz[:, H:]
        n = jnp.tanh(g[:, 2 * H:] + r * (gh_n + bhn))
        h = (1.0 - z) * n + z * h
      outs.append(h)
    return outs

  # Per-step input blocks straight from the (T, B, obs) input ref.
  x_steps = [x_ref[t] for t in range(T)]
  s0 = gru_layer(x_steps, wih0_ref, whhrz0_ref, whhn0_ref, bi0_ref, bhn0_ref)
  s1 = gru_layer(s0, wih1_ref, whhrz1_ref, whhn1_ref, bi1_ref, bhn1_ref)
  s2 = gru_layer(s1, wih2_ref, whhrz2_ref, whhn2_ref, bi2_ref, bhn2_ref)
  h_last = s2[-1]

  # Dueling head on the final hidden state (A and V fused into single matmuls).
  m = jax.nn.relu(
      jnp.dot(h_last, wm_ref[...], preferred_element_type=jnp.float32)
      + bm_ref[...])
  av_h = jax.nn.relu(
      jnp.dot(m, wav1_ref[...], preferred_element_type=jnp.float32)
      + bav1_ref[...])
  av = (jnp.dot(av_h, wav2_ref[...], preferred_element_type=jnp.float32)
        + bav2_ref[...])                                 # (B, act+1) = [A | V]
  A = av[:, :act]
  V = av[:, act:act + 1]
  q_ref[...] = V + A - jnp.mean(A, axis=1, keepdims=True)


# ----------------------------------------------------------------------------
# Parameter setup (PyTorch layouts) + conversion to fused kernel layout
# ----------------------------------------------------------------------------

def init_params(key, obs_dim, act_dim, hidden_size):
  """Deterministic synthetic parameters, stored in PyTorch layouts."""
  M = hidden_size
  H = 2 * hidden_size
  keys = iter(jax.random.split(key, 22))
  u = lambda k, s: jax.random.uniform(k, s, jnp.float32, -0.1, 0.1)

  gru = []
  for layer in range(3):
    in_dim = obs_dim if layer == 0 else H
    gru.append((u(next(keys), (3 * H, in_dim)),   # weight_ih_l{k}
                u(next(keys), (3 * H, H)),        # weight_hh_l{k}
                u(next(keys), (3 * H,)),          # bias_ih_l{k}
                u(next(keys), (3 * H,))))         # bias_hh_l{k}

  return dict(
      gru=gru,
      wm=u(next(keys), (M, H)),  bm=u(next(keys), (M,)),
      wa1=u(next(keys), (M, M)), ba1=u(next(keys), (M,)),
      wa2=u(next(keys), (act_dim, M)), ba2=u(next(keys), (act_dim,)),
      wv1=u(next(keys), (M, M)), bv1=u(next(keys), (M,)),
      wv2=u(next(keys), (1, M)), bv2=u(next(keys), (1,)),
  )


def _kernel_args(x, params, hidden_size):
  """PyTorch-layout params + (B, T, obs) input -> fused kernel-layout operands."""
  M = hidden_size
  H = 2 * hidden_size
  B, T, obs = x.shape
  x_tm = jnp.transpose(x, (1, 0, 2))                 # (T, B, obs) time-major

  args = [x_tm]
  for (w_ih, w_hh, b_ih, b_hh) in params["gru"]:
    w_ih_t = jnp.transpose(w_ih)                     # (in, 3H), gate order r|z|n
    w_hh_t = jnp.transpose(w_hh)                     # (H, 3H)
    # Fold b_hr / b_hz into the input-projection bias; keep b_hn separate
    # because the n gate uses r * (W_hn h + b_hn).
    bi = b_ih + jnp.concatenate([b_hh[:2 * H], jnp.zeros((H,), b_hh.dtype)])
    args += [
        w_ih_t,
        w_hh_t[:, :2 * H],                           # (H, 2H) fused W_hr | W_hz
        w_hh_t[:, 2 * H:],                           # (H, H)  W_hn
        bi.reshape(1, 3 * H),
        b_hh[2 * H:].reshape(1, H),                  # b_hn
    ]

  act_dim = params["wa2"].shape[0]
  # linear_middle
  args += [jnp.transpose(params["wm"]), params["bm"].reshape(1, M)]
  # Fused hidden layer of the advantage/value heads:  [wa1 | wv1]
  w_av1 = jnp.concatenate(
      [jnp.transpose(params["wa1"]), jnp.transpose(params["wv1"])], axis=1)
  b_av1 = jnp.concatenate([params["ba1"], params["bv1"]]).reshape(1, 2 * M)
  args += [w_av1, b_av1]
  # Fused block-diagonal output layer:  [[wa2, 0], [0, wv2]] -> (2M, act+1)
  w_av2 = jnp.zeros((2 * M, act_dim + 1), jnp.float32)
  w_av2 = w_av2.at[:M, :act_dim].set(jnp.transpose(params["wa2"]))
  w_av2 = w_av2.at[M:, act_dim:].set(jnp.transpose(params["wv2"]))
  b_av2 = jnp.concatenate([params["ba2"], params["bv2"]]).reshape(1, act_dim + 1)
  args += [w_av2, b_av2]
  return args


def recurrent_dueling_forward(x, params, hidden_size):
  B, T, _ = x.shape
  act_dim = params["wa2"].shape[0]
  args = _kernel_args(x, params, hidden_size)

  def full_spec(a):
    # Whole-array block; index_map returns zeros for the trivial grid.
    return pl.BlockSpec(a.shape, lambda i, nd=a.ndim: (0,) * nd)

  return pl.pallas_call(
      _recurrent_dueling_kernel,
      out_shape=jax.ShapeDtypeStruct((B, act_dim), jnp.float32),
      grid=(1,),
      in_specs=[full_spec(a) for a in args],
      out_specs=pl.BlockSpec((B, act_dim), lambda i: (0, 0)),
      compiler_params=pltpu.CompilerParams(dimension_semantics=("arbitrary",)),
  )(*args)


# ----------------------------------------------------------------------------
# Pure-JAX reference (mirrors the PyTorch forward) for a correctness check
# ----------------------------------------------------------------------------

def reference_forward(x, params, hidden_size):
  B, T, _ = x.shape
  H = 2 * hidden_size
  with jax.default_matmul_precision("float32"):
    seq = x
    for (w_ih, w_hh, b_ih, b_hh) in params["gru"]:
      h_t = jnp.zeros((B, H), jnp.float32)
      outs = []
      for t in range(T):
        gi = seq[:, t, :] @ w_ih.T + b_ih
        gh = h_t @ w_hh.T + b_hh
        i_r, i_z, i_n = jnp.split(gi, 3, axis=1)
        h_r, h_z, h_n = jnp.split(gh, 3, axis=1)
        r = jax.nn.sigmoid(i_r + h_r)
        z = jax.nn.sigmoid(i_z + h_z)
        n = jnp.tanh(i_n + r * h_n)
        h_t = (1.0 - z) * n + z * h_t
        outs.append(h_t)
      seq = jnp.stack(outs, axis=1)
    last = seq[:, -1, :]
    m = jax.nn.relu(last @ params["wm"].T + params["bm"])
    A = jax.nn.relu(m @ params["wa1"].T + params["ba1"]) @ params["wa2"].T + params["ba2"]
    V = jax.nn.relu(m @ params["wv1"].T + params["bv1"]) @ params["wv2"].T + params["bv2"]
    return V + A - A.mean(axis=1, keepdims=True)


if __name__ == "__main__":
  B, T, OBS, ACT, HID = 2, 8, 16, 8, 32   # observation_space=16, action_space=8, hidden_size=32

  key = jax.random.PRNGKey(0)
  kx, kp = jax.random.split(key)
  x = jax.random.normal(kx, (B, T, OBS), jnp.float32)
  params = init_params(kp, OBS, ACT, HID)

  q = recurrent_dueling_forward(x, params, HID)
  q = jax.block_until_ready(q)

  q_ref = reference_forward(x, params, HID)
  assert q.shape == (B, ACT), q.shape
  assert jnp.allclose(q, q_ref, atol=1e-2, rtol=1e-2), (q, q_ref)

  print("KERNEL_OK")
</pallas_src>

<mosaic_0001>
module attributes {stable_mosaic.version = 11 : i64} {
  func.func @_recurrent_dueling_kernel(%arg0: i32, %arg1: memref<8x2x16xf32, #tpu.memory_space<vmem>>, %arg2: memref<16x192xf32, #tpu.memory_space<vmem>>, %arg3: memref<64x128xf32, #tpu.memory_space<vmem>>, %arg4: memref<64x64xf32, #tpu.memory_space<vmem>>, %arg5: memref<1x192xf32, #tpu.memory_space<vmem>>, %arg6: memref<1x64xf32, #tpu.memory_space<vmem>>, %arg7: memref<64x192xf32, #tpu.memory_space<vmem>>, %arg8: memref<64x128xf32, #tpu.memory_space<vmem>>, %arg9: memref<64x64xf32, #tpu.memory_space<vmem>>, %arg10: memref<1x192xf32, #tpu.memory_space<vmem>>, %arg11: memref<1x64xf32, #tpu.memory_space<vmem>>, %arg12: memref<64x192xf32, #tpu.memory_space<vmem>>, %arg13: memref<64x128xf32, #tpu.memory_space<vmem>>, %arg14: memref<64x64xf32, #tpu.memory_space<vmem>>, %arg15: memref<1x192xf32, #tpu.memory_space<vmem>>, %arg16: memref<1x64xf32, #tpu.memory_space<vmem>>, %arg17: memref<64x32xf32, #tpu.memory_space<vmem>>, %arg18: memref<1x32xf32, #tpu.memory_space<vmem>>, %arg19: memref<32x64xf32, #tpu.memory_space<vmem>>, %arg20: memref<1x64xf32, #tpu.memory_space<vmem>>, %arg21: memref<64x9xf32, #tpu.memory_space<vmem>>, %arg22: memref<1x9xf32, #tpu.memory_space<vmem>>, %arg23: memref<2x8xf32, #tpu.memory_space<vmem>>) attributes {dimension_semantics = [#tpu.dimension_semantics<arbitrary>], iteration_bounds = array<i64: 1>, scalar_prefetch = 0 : i64, scratch_operands = 0 : i64, tpu.core_type = #tpu.core_type<tc>, window_params = [{pipeline_mode = #tpu.pipeline_mode<synchronous>, transform_indices = @transform_0, window_bounds = array<i64: 8, 2, 16>}, {pipeline_mode = #tpu.pipeline_mode<synchronous>, transform_indices = @transform_1, window_bounds = array<i64: 16, 192>}, {pipeline_mode = #tpu.pipeline_mode<synchronous>, transform_indices = @transform_2, window_bounds = array<i64: 64, 128>}, {pipeline_mode = #tpu.pipeline_mode<synchronous>, transform_indices = @transform_3, window_bounds = array<i64: 64, 64>}, {pipeline_mode = #tpu.pipeline_mode<synchronous>, transform_indices = @transform_4, window_bounds = array<i64: 1, 192>}, {pipeline_mode = #tpu.pipeline_mode<synchronous>, transform_indices = @transform_5, window_bounds = array<i64: 1, 64>}, {pipeline_mode = #tpu.pipeline_mode<synchronous>, transform_indices = @transform_6, window_bounds = array<i64: 64, 192>}, {pipeline_mode = #tpu.pipeline_mode<synchronous>, transform_indices = @transform_7, window_bounds = array<i64: 64, 128>}, {pipeline_mode = #tpu.pipeline_mode<synchronous>, transform_indices = @transform_8, window_bounds = array<i64: 64, 64>}, {pipeline_mode = #tpu.pipeline_mode<synchronous>, transform_indices = @transform_9, window_bounds = array<i64: 1, 192>}, {pipeline_mode = #tpu.pipeline_mode<synchronous>, transform_indices = @transform_10, window_bounds = array<i64: 1, 64>}, {pipeline_mode = #tpu.pipeline_mode<synchronous>, transform_indices = @transform_11, window_bounds = array<i64: 64, 192>}, {pipeline_mode = #tpu.pipeline_mode<synchronous>, transform_indices = @transform_12, window_bounds = array<i64: 64, 128>}, {pipeline_mode = #tpu.pipeline_mode<synchronous>, transform_indices = @transform_13, window_bounds = array<i64: 64, 64>}, {pipeline_mode = #tpu.pipeline_mode<synchronous>, transform_indices = @transform_14, window_bounds = array<i64: 1, 192>}, {pipeline_mode = #tpu.pipeline_mode<synchronous>, transform_indices = @transform_15, window_bounds = array<i64: 1, 64>}, {pipeline_mode = #tpu.pipeline_mode<synchronous>, transform_indices = @transform_16, window_bounds = array<i64: 64, 32>}, {pipeline_mode = #tpu.pipeline_mode<synchronous>, transform_indices = @transform_17, window_bounds = array<i64: 1, 32>}, {pipeline_mode = #tpu.pipeline_mode<synchronous>, transform_indices = @transform_18, window_bounds = array<i64: 32, 64>}, {pipeline_mode = #tpu.pipeline_mode<synchronous>, transform_indices = @transform_19, window_bounds = array<i64: 1, 64>}, {pipeline_mode = #tpu.pipeline_mode<synchronous>, transform_indices = @transform_20, window_bounds = array<i64: 64, 9>}, {pipeline_mode = #tpu.pipeline_mode<synchronous>, transform_indices = @transform_21, window_bounds = array<i64: 1, 9>}, {pipeline_mode = #tpu.pipeline_mode<synchronous>, transform_indices = @transform_22, window_bounds = array<i64: 2, 8>}]} {
    %c0 = arith.constant 0 : index
    %c0_0 = arith.constant 0 : index
    %c0_1 = arith.constant 0 : index
    %0 = vector.load %arg1[%c0, %c0_0, %c0_1] : memref<8x2x16xf32, #tpu.memory_space<vmem>>, vector<1x2x16xf32>
    %1 = vector.shape_cast %0 : vector<1x2x16xf32> to vector<2x16xf32>
    %c1 = arith.constant 1 : index
    %c0_2 = arith.constant 0 : index
    %c0_3 = arith.constant 0 : index
    %2 = vector.load %arg1[%c1, %c0_2, %c0_3] : memref<8x2x16xf32, #tpu.memory_space<vmem>>, vector<1x2x16xf32>
    %3 = vector.shape_cast %2 : vector<1x2x16xf32> to vector<2x16xf32>
    %c2 = arith.constant 2 : index
    %c0_4 = arith.constant 0 : index
    %c0_5 = arith.constant 0 : index
    %4 = vector.load %arg1[%c2, %c0_4, %c0_5] : memref<8x2x16xf32, #tpu.memory_space<vmem>>, vector<1x2x16xf32>
    %5 = vector.shape_cast %4 : vector<1x2x16xf32> to vector<2x16xf32>
    %c3 = arith.constant 3 : index
    %c0_6 = arith.constant 0 : index
    %c0_7 = arith.constant 0 : index
    %6 = vector.load %arg1[%c3, %c0_6, %c0_7] : memref<8x2x16xf32, #tpu.memory_space<vmem>>, vector<1x2x16xf32>
    %7 = vector.shape_cast %6 : vector<1x2x16xf32> to vector<2x16xf32>
    %c4 = arith.constant 4 : index
    %c0_8 = arith.constant 0 : index
    %c0_9 = arith.constant 0 : index
    %8 = vector.load %arg1[%c4, %c0_8, %c0_9] : memref<8x2x16xf32, #tpu.memory_space<vmem>>, vector<1x2x16xf32>
    %9 = vector.shape_cast %8 : vector<1x2x16xf32> to vector<2x16xf32>
    %c5 = arith.constant 5 : index
    %c0_10 = arith.constant 0 : index
    %c0_11 = arith.constant 0 : index
    %10 = vector.load %arg1[%c5, %c0_10, %c0_11] : memref<8x2x16xf32, #tpu.memory_space<vmem>>, vector<1x2x16xf32>
    %11 = vector.shape_cast %10 : vector<1x2x16xf32> to vector<2x16xf32>
    %c6 = arith.constant 6 : index
    %c0_12 = arith.constant 0 : index
    %c0_13 = arith.constant 0 : index
    %12 = vector.load %arg1[%c6, %c0_12, %c0_13] : memref<8x2x16xf32, #tpu.memory_space<vmem>>, vector<1x2x16xf32>
    %13 = vector.shape_cast %12 : vector<1x2x16xf32> to vector<2x16xf32>
    %c7 = arith.constant 7 : index
    %c0_14 = arith.constant 0 : index
    %c0_15 = arith.constant 0 : index
    %14 = vector.load %arg1[%c7, %c0_14, %c0_15] : memref<8x2x16xf32, #tpu.memory_space<vmem>>, vector<1x2x16xf32>
    %15 = vector.shape_cast %14 : vector<1x2x16xf32> to vector<2x16xf32>
    %c0_16 = arith.constant 0 : index
    %c0_17 = arith.constant 0 : index
    %16 = vector.load %arg2[%c0_16, %c0_17] : memref<16x192xf32, #tpu.memory_space<vmem>>, vector<16x192xf32>
    %c0_18 = arith.constant 0 : index
    %c0_19 = arith.constant 0 : index
    %17 = vector.load %arg3[%c0_18, %c0_19] : memref<64x128xf32, #tpu.memory_space<vmem>>, vector<64x128xf32>
    %c0_20 = arith.constant 0 : index
    %c0_21 = arith.constant 0 : index
    %18 = vector.load %arg4[%c0_20, %c0_21] : memref<64x64xf32, #tpu.memory_space<vmem>>, vector<64x64xf32>
    %c0_22 = arith.constant 0 : index
    %c0_23 = arith.constant 0 : index
    %19 = vector.load %arg5[%c0_22, %c0_23] : memref<1x192xf32, #tpu.memory_space<vmem>>, vector<1x192xf32>
    %20 = vector.shape_cast %19 : vector<1x192xf32> to vector<1x192xf32>
    %21 = vector.broadcast %20 : vector<1x192xf32> to vector<2x192xf32>
    %c0_24 = arith.constant 0 : index
    %c0_25 = arith.constant 0 : index
    %22 = vector.load %arg6[%c0_24, %c0_25] : memref<1x64xf32, #tpu.memory_space<vmem>>, vector<1x64xf32>
    %23 = vector.shape_cast %22 : vector<1x64xf32> to vector<1x64xf32>
    %24 = vector.broadcast %23 : vector<1x64xf32> to vector<2x64xf32>
    %cst = arith.constant dense<0.000000e+00> : vector<2x192xf32>
    %25 = tpu.matmul %1, %16, %cst {dimension_numbers = #tpu.dot_dimension_numbers<[1], [0], [0], [1], [0, 0, 1, 1], [], []>} : vector<2x16xf32>, vector<16x192xf32>, vector<2x192xf32> -> vector<2x192xf32>
    %26 = arith.addf %25, %21 : vector<2x192xf32>
    %27 = vector.extract_strided_slice %26 {offsets = [0, 0], sizes = [2, 128], strides = [1, 1]} : vector<2x192xf32> to vector<2x128xf32>
    %28 = arith.negf %27 : vector<2x128xf32>
    %29 = math.exp %28 : vector<2x128xf32>
    %cst_26 = arith.constant 1.000000e+00 : f32
    %30 = vector.broadcast %cst_26 : f32 to vector<2x128xf32>
    %31 = arith.addf %30, %29 : vector<2x128xf32>
    %32 = arith.divf %30, %31 : vector<2x128xf32>
    %33 = vector.extract_strided_slice %32 {offsets = [0, 0], sizes = [2, 64], strides = [1, 1]} : vector<2x128xf32> to vector<2x64xf32>
    %34 = vector.extract_strided_slice %32 {offsets = [0, 64], sizes = [2, 64], strides = [1, 1]} : vector<2x128xf32> to vector<2x64xf32>
    %35 = vector.extract_strided_slice %26 {offsets = [0, 128], sizes = [2, 64], strides = [1, 1]} : vector<2x192xf32> to vector<2x64xf32>
    %36 = arith.mulf %33, %24 : vector<2x64xf32>
    %37 = arith.addf %35, %36 : vector<2x64xf32>
    %38 = math.tanh %37 : vector<2x64xf32>
    %cst_27 = arith.constant 1.000000e+00 : f32
    %39 = vector.broadcast %cst_27 : f32 to vector<2x64xf32>
    %40 = arith.subf %39, %34 : vector<2x64xf32>
    %41 = arith.mulf %40, %38 : vector<2x64xf32>
    %cst_28 = arith.constant dense<0.000000e+00> : vector<2x192xf32>
    %42 = tpu.matmul %3, %16, %cst_28 {dimension_numbers = #tpu.dot_dimension_numbers<[1], [0], [0], [1], [0, 0, 1, 1], [], []>} : vector<2x16xf32>, vector<16x192xf32>, vector<2x192xf32> -> vector<2x192xf32>
    %43 = arith.addf %42, %21 : vector<2x192xf32>
    %cst_29 = arith.constant dense<0.000000e+00> : vector<2x128xf32>
    %44 = tpu.matmul %41, %17, %cst_29 {dimension_numbers = #tpu.dot_dimension_numbers<[1], [0], [0], [1], [0, 0, 1, 1], [], []>} : vector<2x64xf32>, vector<64x128xf32>, vector<2x128xf32> -> vector<2x128xf32>
    %cst_30 = arith.constant dense<0.000000e+00> : vector<2x64xf32>
    %45 = tpu.matmul %41, %18, %cst_30 {dimension_numbers = #tpu.dot_dimension_numbers<[1], [0], [0], [1], [0, 0, 1, 1], [], []>} : vector<2x64xf32>, vector<64x64xf32>, vector<2x64xf32> -> vector<2x64xf32>
    %46 = vector.extract_strided_slice %43 {offsets = [0, 0], sizes = [2, 128], strides = [1, 1]} : vector<2x192xf32> to vector<2x128xf32>
    %47 = arith.addf %46, %44 : vector<2x128xf32>
    %48 = arith.negf %47 : vector<2x128xf32>
    %49 = math.exp %48 : vector<2x128xf32>
    %cst_31 = arith.constant 1.000000e+00 : f32
    %50 = vector.broadcast %cst_31 : f32 to vector<2x128xf32>
    %51 = arith.addf %50, %49 : vector<2x128xf32>
    %52 = arith.divf %50, %51 : vector<2x128xf32>
    %53 = vector.extract_strided_slice %52 {offsets = [0, 0], sizes = [2, 64], strides = [1, 1]} : vector<2x128xf32> to vector<2x64xf32>
    %54 = vector.extract_strided_slice %52 {offsets = [0, 64], sizes = [2, 64], strides = [1, 1]} : vector<2x128xf32> to vector<2x64xf32>
    %55 = vector.extract_strided_slice %43 {offsets = [0, 128], sizes = [2, 64], strides = [1, 1]} : vector<2x192xf32> to vector<2x64xf32>
    %56 = arith.addf %45, %24 : vector<2x64xf32>
    %57 = arith.mulf %53, %56 : vector<2x64xf32>
    %58 = arith.addf %55, %57 : vector<2x64xf32>
    %59 = math.tanh %58 : vector<2x64xf32>
    %cst_32 = arith.constant 1.000000e+00 : f32
    %60 = vector.broadcast %cst_32 : f32 to vector<2x64xf32>
    %61 = arith.subf %60, %54 : vector<2x64xf32>
    %62 = arith.mulf %61, %59 : vector<2x64xf32>
    %63 = arith.mulf %54, %41 : vector<2x64xf32>
    %64 = arith.addf %62, %63 : vector<2x64xf32>
    %cst_33 = arith.constant dense<0.000000e+00> : vector<2x192xf32>
    %65 = tpu.matmul %5, %16, %cst_33 {dimension_numbers = #tpu.dot_dimension_numbers<[1], [0], [0], [1], [0, 0, 1, 1], [], []>} : vector<2x16xf32>, vector<16x192xf32>, vector<2x192xf32> -> vector<2x192xf32>
    %66 = arith.addf %65, %21 : vector<2x192xf32>
    %cst_34 = arith.constant dense<0.000000e+00> : vector<2x128xf32>
    %67 = tpu.matmul %64, %17, %cst_34 {dimension_numbers = #tpu.dot_dimension_numbers<[1], [0], [0], [1], [0, 0, 1, 1], [], []>} : vector<2x64xf32>, vector<64x128xf32>, vector<2x128xf32> -> vector<2x128xf32>
    %cst_35 = arith.constant dense<0.000000e+00> : vector<2x64xf32>
    %68 = tpu.matmul %64, %18, %cst_35 {dimension_numbers = #tpu.dot_dimension_numbers<[1], [0], [0], [1], [0, 0, 1, 1], [], []>} : vector<2x64xf32>, vector<64x64xf32>, vector<2x64xf32> -> vector<2x64xf32>
    %69 = vector.extract_strided_slice %66 {offsets = [0, 0], sizes = [2, 128], strides = [1, 1]} : vector<2x192xf32> to vector<2x128xf32>
    %70 = arith.addf %69, %67 : vector<2x128xf32>
    %71 = arith.negf %70 : vector<2x128xf32>
    %72 = math.exp %71 : vector<2x128xf32>
    %cst_36 = arith.constant 1.000000e+00 : f32
    %73 = vector.broadcast %cst_36 : f32 to vector<2x128xf32>
    %74 = arith.addf %73, %72 : vector<2x128xf32>
    %75 = arith.divf %73, %74 : vector<2x128xf32>
    %76 = vector.extract_strided_slice %75 {offsets = [0, 0], sizes = [2, 64], strides = [1, 1]} : vector<2x128xf32> to vector<2x64xf32>
    %77 = vector.extract_strided_slice %75 {offsets = [0, 64], sizes = [2, 64], strides = [1, 1]} : vector<2x128xf32> to vector<2x64xf32>
    %78 = vector.extract_strided_slice %66 {offsets = [0, 128], sizes = [2, 64], strides = [1, 1]} : vector<2x192xf32> to vector<2x64xf32>
    %79 = arith.addf %68, %24 : vector<2x64xf32>
    %80 = arith.mulf %76, %79 : vector<2x64xf32>
    %81 = arith.addf %78, %80 : vector<2x64xf32>
    %82 = math.tanh %81 : vector<2x64xf32>
    %cst_37 = arith.constant 1.000000e+00 : f32
    %83 = vector.broadcast %cst_37 : f32 to vector<2x64xf32>
    %84 = arith.subf %83, %77 : vector<2x64xf32>
    %85 = arith.mulf %84, %82 : vector<2x64xf32>
    %86 = arith.mulf %77, %64 : vector<2x64xf32>
    %87 = arith.addf %85, %86 : vector<2x64xf32>
    %cst_38 = arith.constant dense<0.000000e+00> : vector<2x192xf32>
    %88 = tpu.matmul %7, %16, %cst_38 {dimension_numbers = #tpu.dot_dimension_numbers<[1], [0], [0], [1], [0, 0, 1, 1], [], []>} : vector<2x16xf32>, vector<16x192xf32>, vector<2x192xf32> -> vector<2x192xf32>
    %89 = arith.addf %88, %21 : vector<2x192xf32>
    %cst_39 = arith.constant dense<0.000000e+00> : vector<2x128xf32>
    %90 = tpu.matmul %87, %17, %cst_39 {dimension_numbers = #tpu.dot_dimension_numbers<[1], [0], [0], [1], [0, 0, 1, 1], [], []>} : vector<2x64xf32>, vector<64x128xf32>, vector<2x128xf32> -> vector<2x128xf32>
    %cst_40 = arith.constant dense<0.000000e+00> : vector<2x64xf32>
    %91 = tpu.matmul %87, %18, %cst_40 {dimension_numbers = #tpu.dot_dimension_numbers<[1], [0], [0], [1], [0, 0, 1, 1], [], []>} : vector<2x64xf32>, vector<64x64xf32>, vector<2x64xf32> -> vector<2x64xf32>
    %92 = vector.extract_strided_slice %89 {offsets = [0, 0], sizes = [2, 128], strides = [1, 1]} : vector<2x192xf32> to vector<2x128xf32>
    %93 = arith.addf %92, %90 : vector<2x128xf32>
    %94 = arith.negf %93 : vector<2x128xf32>
    %95 = math.exp %94 : vector<2x128xf32>
    %cst_41 = arith.constant 1.000000e+00 : f32
    %96 = vector.broadcast %cst_41 : f32 to vector<2x128xf32>
    %97 = arith.addf %96, %95 : vector<2x128xf32>
    %98 = arith.divf %96, %97 : vector<2x128xf32>
    %99 = vector.extract_strided_slice %98 {offsets = [0, 0], sizes = [2, 64], strides = [1, 1]} : vector<2x128xf32> to vector<2x64xf32>
    %100 = vector.extract_strided_slice %98 {offsets = [0, 64], sizes = [2, 64], strides = [1, 1]} : vector<2x128xf32> to vector<2x64xf32>
    %101 = vector.extract_strided_slice %89 {offsets = [0, 128], sizes = [2, 64], strides = [1, 1]} : vector<2x192xf32> to vector<2x64xf32>
    %102 = arith.addf %91, %24 : vector<2x64xf32>
    %103 = arith.mulf %99, %102 : vector<2x64xf32>
    %104 = arith.addf %101, %103 : vector<2x64xf32>
    %105 = math.tanh %104 : vector<2x64xf32>
    %cst_42 = arith.constant 1.000000e+00 : f32
    %106 = vector.broadcast %cst_42 : f32 to vector<2x64xf32>
    %107 = arith.subf %106, %100 : vector<2x64xf32>
    %108 = arith.mulf %107, %105 : vector<2x64xf32>
    %109 = arith.mulf %100, %87 : vector<2x64xf32>
    %110 = arith.addf %108, %109 : vector<2x64xf32>
    %cst_43 = arith.constant dense<0.000000e+00> : vector<2x192xf32>
    %111 = tpu.matmul %9, %16, %cst_43 {dimension_numbers = #tpu.dot_dimension_numbers<[1], [0], [0], [1], [0, 0, 1, 1], [], []>} : vector<2x16xf32>, vector<16x192xf32>, vector<2x192xf32> -> vector<2x192xf32>
    %112 = arith.addf %111, %21 : vector<2x192xf32>
    %cst_44 = arith.constant dense<0.000000e+00> : vector<2x128xf32>
    %113 = tpu.matmul %110, %17, %cst_44 {dimension_numbers = #tpu.dot_dimension_numbers<[1], [0], [0], [1], [0, 0, 1, 1], [], []>} : vector<2x64xf32>, vector<64x128xf32>, vector<2x128xf32> -> vector<2x128xf32>
    %cst_45 = arith.constant dense<0.000000e+00> : vector<2x64xf32>
    %114 = tpu.matmul %110, %18, %cst_45 {dimension_numbers = #tpu.dot_dimension_numbers<[1], [0], [0], [1], [0, 0, 1, 1], [], []>} : vector<2x64xf32>, vector<64x64xf32>, vector<2x64xf32> -> vector<2x64xf32>
    %115 = vector.extract_strided_slice %112 {offsets = [0, 0], sizes = [2, 128], strides = [1, 1]} : vector<2x192xf32> to vector<2x128xf32>
    %116 = arith.addf %115, %113 : vector<2x128xf32>
    %117 = arith.negf %116 : vector<2x128xf32>
    %118 = math.exp %117 : vector<2x128xf32>
    %cst_46 = arith.constant 1.000000e+00 : f32
    %119 = vector.broadcast %cst_46 : f32 to vector<2x128xf32>
    %120 = arith.addf %119, %118 : vector<2x128xf32>
    %121 = arith.divf %119, %120 : vector<2x128xf32>
    %122 = vector.extract_strided_slice %121 {offsets = [0, 0], sizes = [2, 64], strides = [1, 1]} : vector<2x128xf32> to vector<2x64xf32>
    %123 = vector.extract_strided_slice %121 {offsets = [0, 64], sizes = [2, 64], strides = [1, 1]} : vector<2x128xf32> to vector<2x64xf32>
    %124 = vector.extract_strided_slice %112 {offsets = [0, 128], sizes = [2, 64], strides = [1, 1]} : vector<2x192xf32> to vector<2x64xf32>
    %125 = arith.addf %114, %24 : vector<2x64xf32>
    %126 = arith.mulf %122, %125 : vector<2x64xf32>
    %127 = arith.addf %124, %126 : vector<2x64xf32>
    %128 = math.tanh %127 : vector<2x64xf32>
    %cst_47 = arith.constant 1.000000e+00 : f32
    %129 = vector.broadcast %cst_47 : f32 to vector<2x64xf32>
    %130 = arith.subf %129, %123 : vector<2x64xf32>
    %131 = arith.mulf %130, %128 : vector<2x64xf32>
    %132 = arith.mulf %123, %110 : vector<2x64xf32>
    %133 = arith.addf %131, %132 : vector<2x64xf32>
    %cst_48 = arith.constant dense<0.000000e+00> : vector<2x192xf32>
    %134 = tpu.matmul %11, %16, %cst_48 {dimension_numbers = #tpu.dot_dimension_numbers<[1], [0], [0], [1], [0, 0, 1, 1], [], []>} : vector<2x16xf32>, vector<16x192xf32>, vector<2x192xf32> -> vector<2x192xf32>
    %135 = arith.addf %134, %21 : vector<2x192xf32>
    %cst_49 = arith.constant dense<0.000000e+00> : vector<2x128xf32>
    %136 = tpu.matmul %133, %17, %cst_49 {dimension_numbers = #tpu.dot_dimension_numbers<[1], [0], [0], [1], [0, 0, 1, 1], [], []>} : vector<2x64xf32>, vector<64x128xf32>, vector<2x128xf32> -> vector<2x128xf32>
    %cst_50 = arith.constant dense<0.000000e+00> : vector<2x64xf32>
    %137 = tpu.matmul %133, %18, %cst_50 {dimension_numbers = #tpu.dot_dimension_numbers<[1], [0], [0], [1], [0, 0, 1, 1], [], []>} : vector<2x64xf32>, vector<64x64xf32>, vector<2x64xf32> -> vector<2x64xf32>
    %138 = vector.extract_strided_slice %135 {offsets = [0, 0], sizes = [2, 128], strides = [1, 1]} : vector<2x192xf32> to vector<2x128xf32>
    %139 = arith.addf %138, %136 : vector<2x128xf32>
    %140 = arith.negf %139 : vector<2x128xf32>
    %141 = math.exp %140 : vector<2x128xf32>
    %cst_51 = arith.constant 1.000000e+00 : f32
    %142 = vector.broadcast %cst_51 : f32 to vector<2x128xf32>
    %143 = arith.addf %142, %141 : vector<2x128xf32>
    %144 = arith.divf %142, %143 : vector<2x128xf32>
    %145 = vector.extract_strided_slice %144 {offsets = [0, 0], sizes = [2, 64], strides = [1, 1]} : vector<2x128xf32> to vector<2x64xf32>
    %146 = vector.extract_strided_slice %144 {offsets = [0, 64], sizes = [2, 64], strides = [1, 1]} : vector<2x128xf32> to vector<2x64xf32>
    %147 = vector.extract_strided_slice %135 {offsets = [0, 128], sizes = [2, 64], strides = [1, 1]} : vector<2x192xf32> to vector<2x64xf32>
    %148 = arith.addf %137, %24 : vector<2x64xf32>
    %149 = arith.mulf %145, %148 : vector<2x64xf32>
    %150 = arith.addf %147, %149 : vector<2x64xf32>
    %151 = math.tanh %150 : vector<2x64xf32>
    %cst_52 = arith.constant 1.000000e+00 : f32
    %152 = vector.broadcast %cst_52 : f32 to vector<2x64xf32>
    %153 = arith.subf %152, %146 : vector<2x64xf32>
    %154 = arith.mulf %153, %151 : vector<2x64xf32>
    %155 = arith.mulf %146, %133 : vector<2x64xf32>
    %156 = arith.addf %154, %155 : vector<2x64xf32>
    %cst_53 = arith.constant dense<0.000000e+00> : vector<2x192xf32>
    %157 = tpu.matmul %13, %16, %cst_53 {dimension_numbers = #tpu.dot_dimension_numbers<[1], [0], [0], [1], [0, 0, 1, 1], [], []>} : vector<2x16xf32>, vector<16x192xf32>, vector<2x192xf32> -> vector<2x192xf32>
    %158 = arith.addf %157, %21 : vector<2x192xf32>
    %cst_54 = arith.constant dense<0.000000e+00> : vector<2x128xf32>
    %159 = tpu.matmul %156, %17, %cst_54 {dimension_numbers = #tpu.dot_dimension_numbers<[1], [0], [0], [1], [0, 0, 1, 1], [], []>} : vector<2x64xf32>, vector<64x128xf32>, vector<2x128xf32> -> vector<2x128xf32>
    %cst_55 = arith.constant dense<0.000000e+00> : vector<2x64xf32>
    %160 = tpu.matmul %156, %18, %cst_55 {dimension_numbers = #tpu.dot_dimension_numbers<[1], [0], [0], [1], [0, 0, 1, 1], [], []>} : vector<2x64xf32>, vector<64x64xf32>, vector<2x64xf32> -> vector<2x64xf32>
    %161 = vector.extract_strided_slice %158 {offsets = [0, 0], sizes = [2, 128], strides = [1, 1]} : vector<2x192xf32> to vector<2x128xf32>
    %162 = arith.addf %161, %159 : vector<2x128xf32>
    %163 = arith.negf %162 : vector<2x128xf32>
    %164 = math.exp %163 : vector<2x128xf32>
    %cst_56 = arith.constant 1.000000e+00 : f32
    %165 = vector.broadcast %cst_56 : f32 to vector<2x128xf32>
    %166 = arith.addf %165, %164 : vector<2x128xf32>
    %167 = arith.divf %165, %166 : vector<2x128xf32>
    %168 = vector.extract_strided_slice %167 {offsets = [0, 0], sizes = [2, 64], strides = [1, 1]} : vector<2x128xf32> to vector<2x64xf32>
    %169 = vector.extract_strided_slice %167 {offsets = [0, 64], sizes = [2, 64], strides = [1, 1]} : vector<2x128xf32> to vector<2x64xf32>
    %170 = vector.extract_strided_slice %158 {offsets = [0, 128], sizes = [2, 64], strides = [1, 1]} : vector<2x192xf32> to vector<2x64xf32>
    %171 = arith.addf %160, %24 : vector<2x64xf32>
    %172 = arith.mulf %168, %171 : vector<2x64xf32>
    %173 = arith.addf %170, %172 : vector<2x64xf32>
    %174 = math.tanh %173 : vector<2x64xf32>
    %cst_57 = arith.constant 1.000000e+00 : f32
    %175 = vector.broadcast %cst_57 : f32 to vector<2x64xf32>
    %176 = arith.subf %175, %169 : vector<2x64xf32>
    %177 = arith.mulf %176, %174 : vector<2x64xf32>
    %178 = arith.mulf %169, %156 : vector<2x64xf32>
    %179 = arith.addf %177, %178 : vector<2x64xf32>
    %cst_58 = arith.constant dense<0.000000e+00> : vector<2x192xf32>
    %180 = tpu.matmul %15, %16, %cst_58 {dimension_numbers = #tpu.dot_dimension_numbers<[1], [0], [0], [1], [0, 0, 1, 1], [], []>} : vector<2x16xf32>, vector<16x192xf32>, vector<2x192xf32> -> vector<2x192xf32>
    %181 = arith.addf %180, %21 : vector<2x192xf32>
    %cst_59 = arith.constant dense<0.000000e+00> : vector<2x128xf32>
    %182 = tpu.matmul %179, %17, %cst_59 {dimension_numbers = #tpu.dot_dimension_numbers<[1], [0], [0], [1], [0, 0, 1, 1], [], []>} : vector<2x64xf32>, vector<64x128xf32>, vector<2x128xf32> -> vector<2x128xf32>
    %cst_60 = arith.constant dense<0.000000e+00> : vector<2x64xf32>
    %183 = tpu.matmul %179, %18, %cst_60 {dimension_numbers = #tpu.dot_dimension_numbers<[1], [0], [0], [1], [0, 0, 1, 1], [], []>} : vector<2x64xf32>, vector<64x64xf32>, vector<2x64xf32> -> vector<2x64xf32>
    %184 = vector.extract_strided_slice %181 {offsets = [0, 0], sizes = [2, 128], strides = [1, 1]} : vector<2x192xf32> to vector<2x128xf32>
    %185 = arith.addf %184, %182 : vector<2x128xf32>
    %186 = arith.negf %185 : vector<2x128xf32>
    %187 = math.exp %186 : vector<2x128xf32>
    %cst_61 = arith.constant 1.000000e+00 : f32
    %188 = vector.broadcast %cst_61 : f32 to vector<2x128xf32>
    %189 = arith.addf %188, %187 : vector<2x128xf32>
    %190 = arith.divf %188, %189 : vector<2x128xf32>
    %191 = vector.extract_strided_slice %190 {offsets = [0, 0], sizes = [2, 64], strides = [1, 1]} : vector<2x128xf32> to vector<2x64xf32>
    %192 = vector.extract_strided_slice %190 {offsets = [0, 64], sizes = [2, 64], strides = [1, 1]} : vector<2x128xf32> to vector<2x64xf32>
    %193 = vector.extract_strided_slice %181 {offsets = [0, 128], sizes = [2, 64], strides = [1, 1]} : vector<2x192xf32> to vector<2x64xf32>
    %194 = arith.addf %183, %24 : vector<2x64xf32>
    %195 = arith.mulf %191, %194 : vector<2x64xf32>
    %196 = arith.addf %193, %195 : vector<2x64xf32>
    %197 = math.tanh %196 : vector<2x64xf32>
    %cst_62 = arith.constant 1.000000e+00 : f32
    %198 = vector.broadcast %cst_62 : f32 to vector<2x64xf32>
    %199 = arith.subf %198, %192 : vector<2x64xf32>
    %200 = arith.mulf %199, %197 : vector<2x64xf32>
    %201 = arith.mulf %192, %179 : vector<2x64xf32>
    %202 = arith.addf %200, %201 : vector<2x64xf32>
    %c0_63 = arith.constant 0 : index
    %c0_64 = arith.constant 0 : index
    %203 = vector.load %arg7[%c0_63, %c0_64] : memref<64x192xf32, #tpu.memory_space<vmem>>, vector<64x192xf32>
    %c0_65 = arith.constant 0 : index
    %c0_66 = arith.constant 0 : index
    %204 = vector.load %arg8[%c0_65, %c0_66] : memref<64x128xf32, #tpu.memory_space<vmem>>, vector<64x128xf32>
    %c0_67 = arith.constant 0 : index
    %c0_68 = arith.constant 0 : index
    %205 = vector.load %arg9[%c0_67, %c0_68] : memref<64x64xf32, #tpu.memory_space<vmem>>, vector<64x64xf32>
    %c0_69 = arith.constant 0 : index
    %c0_70 = arith.constant 0 : index
    %206 = vector.load %arg10[%c0_69, %c0_70] : memref<1x192xf32, #tpu.memory_space<vmem>>, vector<1x192xf32>
    %207 = vector.shape_cast %206 : vector<1x192xf32> to vector<1x192xf32>
    %208 = vector.broadcast %207 : vector<1x192xf32> to vector<2x192xf32>
    %c0_71 = arith.constant 0 : index
    %c0_72 = arith.constant 0 : index
    %209 = vector.load %arg11[%c0_71, %c0_72] : memref<1x64xf32, #tpu.memory_space<vmem>>, vector<1x64xf32>
    %210 = vector.shape_cast %209 : vector<1x64xf32> to vector<1x64xf32>
    %211 = vector.broadcast %210 : vector<1x64xf32> to vector<2x64xf32>
    %cst_73 = arith.constant dense<0.000000e+00> : vector<2x192xf32>
    %212 = tpu.matmul %41, %203, %cst_73 {dimension_numbers = #tpu.dot_dimension_numbers<[1], [0], [0], [1], [0, 0, 1, 1], [], []>} : vector<2x64xf32>, vector<64x192xf32>, vector<2x192xf32> -> vector<2x192xf32>
    %213 = arith.addf %212, %208 : vector<2x192xf32>
    %214 = vector.extract_strided_slice %213 {offsets = [0, 0], sizes = [2, 128], strides = [1, 1]} : vector<2x192xf32> to vector<2x128xf32>
    %215 = arith.negf %214 : vector<2x128xf32>
    %216 = math.exp %215 : vector<2x128xf32>
    %cst_74 = arith.constant 1.000000e+00 : f32
    %217 = vector.broadcast %cst_74 : f32 to vector<2x128xf32>
    %218 = arith.addf %217, %216 : vector<2x128xf32>
    %219 = arith.divf %217, %218 : vector<2x128xf32>
    %220 = vector.extract_strided_slice %219 {offsets = [0, 0], sizes = [2, 64], strides = [1, 1]} : vector<2x128xf32> to vector<2x64xf32>
    %221 = vector.extract_strided_slice %219 {offsets = [0, 64], sizes = [2, 64], strides = [1, 1]} : vector<2x128xf32> to vector<2x64xf32>
    %222 = vector.extract_strided_slice %213 {offsets = [0, 128], sizes = [2, 64], strides = [1, 1]} : vector<2x192xf32> to vector<2x64xf32>
    %223 = arith.mulf %220, %211 : vector<2x64xf32>
    %224 = arith.addf %222, %223 : vector<2x64xf32>
    %225 = math.tanh %224 : vector<2x64xf32>
    %cst_75 = arith.constant 1.000000e+00 : f32
    %226 = vector.broadcast %cst_75 : f32 to vector<2x64xf32>
    %227 = arith.subf %226, %221 : vector<2x64xf32>
    %228 = arith.mulf %227, %225 : vector<2x64xf32>
    %cst_76 = arith.constant dense<0.000000e+00> : vector<2x192xf32>
    %229 = tpu.matmul %64, %203, %cst_76 {dimension_numbers = #tpu.dot_dimension_numbers<[1], [0], [0], [1], [0, 0, 1, 1], [], []>} : vector<2x64xf32>, vector<64x192xf32>, vector<2x192xf32> -> vector<2x192xf32>
    %230 = arith.addf %229, %208 : vector<2x192xf32>
    %cst_77 = arith.constant dense<0.000000e+00> : vector<2x128xf32>
    %231 = tpu.matmul %228, %204, %cst_77 {dimension_numbers = #tpu.dot_dimension_numbers<[1], [0], [0], [1], [0, 0, 1, 1], [], []>} : vector<2x64xf32>, vector<64x128xf32>, vector<2x128xf32> -> vector<2x128xf32>
    %cst_78 = arith.constant dense<0.000000e+00> : vector<2x64xf32>
    %232 = tpu.matmul %228, %205, %cst_78 {dimension_numbers = #tpu.dot_dimension_numbers<[1], [0], [0], [1], [0, 0, 1, 1], [], []>} : vector<2x64xf32>, vector<64x64xf32>, vector<2x64xf32> -> vector<2x64xf32>
    %233 = vector.extract_strided_slice %230 {offsets = [0, 0], sizes = [2, 128], strides = [1, 1]} : vector<2x192xf32> to vector<2x128xf32>
    %234 = arith.addf %233, %231 : vector<2x128xf32>
    %235 = arith.negf %234 : vector<2x128xf32>
    %236 = math.exp %235 : vector<2x128xf32>
    %cst_79 = arith.constant 1.000000e+00 : f32
    %237 = vector.broadcast %cst_79 : f32 to vector<2x128xf32>
    %238 = arith.addf %237, %236 : vector<2x128xf32>
    %239 = arith.divf %237, %238 : vector<2x128xf32>
    %240 = vector.extract_strided_slice %239 {offsets = [0, 0], sizes = [2, 64], strides = [1, 1]} : vector<2x128xf32> to vector<2x64xf32>
    %241 = vector.extract_strided_slice %239 {offsets = [0, 64], sizes = [2, 64], strides = [1, 1]} : vector<2x128xf32> to vector<2x64xf32>
    %242 = vector.extract_strided_slice %230 {offsets = [0, 128], sizes = [2, 64], strides = [1, 1]} : vector<2x192xf32> to vector<2x64xf32>
    %243 = arith.addf %232, %211 : vector<2x64xf32>
    %244 = arith.mulf %240, %243 : vector<2x64xf32>
    %245 = arith.addf %242, %244 : vector<2x64xf32>
    %246 = math.tanh %245 : vector<2x64xf32>
    %cst_80 = arith.constant 1.000000e+00 : f32
    %247 = vector.broadcast %cst_80 : f32 to vector<2x64xf32>
    %248 = arith.subf %247, %241 : vector<2x64xf32>
    %249 = arith.mulf %248, %246 : vector<2x64xf32>
    %250 = arith.mulf %241, %228 : vector<2x64xf32>
    %251 = arith.addf %249, %250 : vector<2x64xf32>
    %cst_81 = arith.constant dense<0.000000e+00> : vector<2x192xf32>
    %252 = tpu.matmul %87, %203, %cst_81 {dimension_numbers = #tpu.dot_dimension_numbers<[1], [0], [0], [1], [0, 0, 1, 1], [], []>} : vector<2x64xf32>, vector<64x192xf32>, vector<2x192xf32> -> vector<2x192xf32>
    %253 = arith.addf %252, %208 : vector<2x192xf32>
    %cst_82 = arith.constant dense<0.000000e+00> : vector<2x128xf32>
    %254 = tpu.matmul %251, %204, %cst_82 {dimension_numbers = #tpu.dot_dimension_numbers<[1], [0], [0], [1], [0, 0, 1, 1], [], []>} : vector<2x64xf32>, vector<64x128xf32>, vector<2x128xf32> -> vector<2x128xf32>
    %cst_83 = arith.constant dense<0.000000e+00> : vector<2x64xf32>
    %255 = tpu.matmul %251, %205, %cst_83 {dimension_numbers = #tpu.dot_dimension_numbers<[1], [0], [0], [1], [0, 0, 1, 1], [], []>} : vector<2x64xf32>, vector<64x64xf32>, vector<2x64xf32> -> vector<2x64xf32>
    %256 = vector.extract_strided_slice %253 {offsets = [0, 0], sizes = [2, 128], strides = [1, 1]} : vector<2x192xf32> to vector<2x128xf32>
    %257 = arith.addf %256, %254 : vector<2x128xf32>
    %258 = arith.negf %257 : vector<2x128xf32>
    %259 = math.exp %258 : vector<2x128xf32>
    %cst_84 = arith.constant 1.000000e+00 : f32
    %260 = vector.broadcast %cst_84 : f32 to vector<2x128xf32>
    %261 = arith.addf %260, %259 : vector<2x128xf32>
    %262 = arith.divf %260, %261 : vector<2x128xf32>
    %263 = vector.extract_strided_slice %262 {offsets = [0, 0], sizes = [2, 64], strides = [1, 1]} : vector<2x128xf32> to vector<2x64xf32>
    %264 = vector.extract_strided_slice %262 {offsets = [0, 64], sizes = [2, 64], strides = [1, 1]} : vector<2x128xf32> to vector<2x64xf32>
    %265 = vector.extract_strided_slice %253 {offsets = [0, 128], sizes = [2, 64], strides = [1, 1]} : vector<2x192xf32> to vector<2x64xf32>
    %266 = arith.addf %255, %211 : vector<2x64xf32>
    %267 = arith.mulf %263, %266 : vector<2x64xf32>
    %268 = arith.addf %265, %267 : vector<2x64xf32>
    %269 = math.tanh %268 : vector<2x64xf32>
    %cst_85 = arith.constant 1.000000e+00 : f32
    %270 = vector.broadcast %cst_85 : f32 to vector<2x64xf32>
    %271 = arith.subf %270, %264 : vector<2x64xf32>
    %272 = arith.mulf %271, %269 : vector<2x64xf32>
    %273 = arith.mulf %264, %251 : vector<2x64xf32>
    %274 = arith.addf %272, %273 : vector<2x64xf32>
    %cst_86 = arith.constant dense<0.000000e+00> : vector<2x192xf32>
    %275 = tpu.matmul %110, %203, %cst_86 {dimension_numbers = #tpu.dot_dimension_numbers<[1], [0], [0], [1], [0, 0, 1, 1], [], []>} : vector<2x64xf32>, vector<64x192xf32>, vector<2x192xf32> -> vector<2x192xf32>
    %276 = arith.addf %275, %208 : vector<2x192xf32>
    %cst_87 = arith.constant dense<0.000000e+00> : vector<2x128xf32>
    %277 = tpu.matmul %274, %204, %cst_87 {dimension_numbers = #tpu.dot_dimension_numbers<[1], [0], [0], [1], [0, 0, 1, 1], [], []>} : vector<2x64xf32>, vector<64x128xf32>, vector<2x128xf32> -> vector<2x128xf32>
    %cst_88 = arith.constant dense<0.000000e+00> : vector<2x64xf32>
    %278 = tpu.matmul %274, %205, %cst_88 {dimension_numbers = #tpu.dot_dimension_numbers<[1], [0], [0], [1], [0, 0, 1, 1], [], []>} : vector<2x64xf32>, vector<64x64xf32>, vector<2x64xf32> -> vector<2x64xf32>
    %279 = vector.extract_strided_slice %276 {offsets = [0, 0], sizes = [2, 128], strides = [1, 1]} : vector<2x192xf32> to vector<2x128xf32>
    %280 = arith.addf %279, %277 : vector<2x128xf32>
    %281 = arith.negf %280 : vector<2x128xf32>
    %282 = math.exp %281 : vector<2x128xf32>
    %cst_89 = arith.constant 1.000000e+00 : f32
    %283 = vector.broadcast %cst_89 : f32 to vector<2x128xf32>
    %284 = arith.addf %283, %282 : vector<2x128xf32>
    %285 = arith.divf %283, %284 : vector<2x128xf32>
    %286 = vector.extract_strided_slice %285 {offsets = [0, 0], sizes = [2, 64], strides = [1, 1]} : vector<2x128xf32> to vector<2x64xf32>
    %287 = vector.extract_strided_slice %285 {offsets = [0, 64], sizes = [2, 64], strides = [1, 1]} : vector<2x128xf32> to vector<2x64xf32>
    %288 = vector.extract_strided_slice %276 {offsets = [0, 128], sizes = [2, 64], strides = [1, 1]} : vector<2x192xf32> to vector<2x64xf32>
    %289 = arith.addf %278, %211 : vector<2x64xf32>
    %290 = arith.mulf %286, %289 : vector<2x64xf32>
    %291 = arith.addf %288, %290 : vector<2x64xf32>
    %292 = math.tanh %291 : vector<2x64xf32>
    %cst_90 = arith.constant 1.000000e+00 : f32
    %293 = vector.broadcast %cst_90 : f32 to vector<2x64xf32>
    %294 = arith.subf %293, %287 : vector<2x64xf32>
    %295 = arith.mulf %294, %292 : vector<2x64xf32>
    %296 = arith.mulf %287, %274 : vector<2x64xf32>
    %297 = arith.addf %295, %296 : vector<2x64xf32>
    %cst_91 = arith.constant dense<0.000000e+00> : vector<2x192xf32>
    %298 = tpu.matmul %133, %203, %cst_91 {dimension_numbers = #tpu.dot_dimension_numbers<[1], [0], [0], [1], [0, 0, 1, 1], [], []>} : vector<2x64xf32>, vector<64x192xf32>, vector<2x192xf32> -> vector<2x192xf32>
    %299 = arith.addf %298, %208 : vector<2x192xf32>
    %cst_92 = arith.constant dense<0.000000e+00> : vector<2x128xf32>
    %300 = tpu.matmul %297, %204, %cst_92 {dimension_numbers = #tpu.dot_dimension_numbers<[1], [0], [0], [1], [0, 0, 1, 1], [], []>} : vector<2x64xf32>, vector<64x128xf32>, vector<2x128xf32> -> vector<2x128xf32>
    %cst_93 = arith.constant dense<0.000000e+00> : vector<2x64xf32>
    %301 = tpu.matmul %297, %205, %cst_93 {dimension_numbers = #tpu.dot_dimension_numbers<[1], [0], [0], [1], [0, 0, 1, 1], [], []>} : vector<2x64xf32>, vector<64x64xf32>, vector<2x64xf32> -> vector<2x64xf32>
    %302 = vector.extract_strided_slice %299 {offsets = [0, 0], sizes = [2, 128], strides = [1, 1]} : vector<2x192xf32> to vector<2x128xf32>
    %303 = arith.addf %302, %300 : vector<2x128xf32>
    %304 = arith.negf %303 : vector<2x128xf32>
    %305 = math.exp %304 : vector<2x128xf32>
    %cst_94 = arith.constant 1.000000e+00 : f32
    %306 = vector.broadcast %cst_94 : f32 to vector<2x128xf32>
    %307 = arith.addf %306, %305 : vector<2x128xf32>
    %308 = arith.divf %306, %307 : vector<2x128xf32>
    %309 = vector.extract_strided_slice %308 {offsets = [0, 0], sizes = [2, 64], strides = [1, 1]} : vector<2x128xf32> to vector<2x64xf32>
    %310 = vector.extract_strided_slice %308 {offsets = [0, 64], sizes = [2, 64], strides = [1, 1]} : vector<2x128xf32> to vector<2x64xf32>
    %311 = vector.extract_strided_slice %299 {offsets = [0, 128], sizes = [2, 64], strides = [1, 1]} : vector<2x192xf32> to vector<2x64xf32>
    %312 = arith.addf %301, %211 : vector<2x64xf32>
    %313 = arith.mulf %309, %312 : vector<2x64xf32>
    %314 = arith.addf %311, %313 : vector<2x64xf32>
    %315 = math.tanh %314 : vector<2x64xf32>
    %cst_95 = arith.constant 1.000000e+00 : f32
    %316 = vector.broadcast %cst_95 : f32 to vector<2x64xf32>
    %317 = arith.subf %316, %310 : vector<2x64xf32>
    %318 = arith.mulf %317, %315 : vector<2x64xf32>
    %319 = arith.mulf %310, %297 : vector<2x64xf32>
    %320 = arith.addf %318, %319 : vector<2x64xf32>
    %cst_96 = arith.constant dense<0.000000e+00> : vector<2x192xf32>
    %321 = tpu.matmul %156, %203, %cst_96 {dimension_numbers = #tpu.dot_dimension_numbers<[1], [0], [0], [1], [0, 0, 1, 1], [], []>} : vector<2x64xf32>, vector<64x192xf32>, vector<2x192xf32> -> vector<2x192xf32>
    %322 = arith.addf %321, %208 : vector<2x192xf32>
    %cst_97 = arith.constant dense<0.000000e+00> : vector<2x128xf32>
    %323 = tpu.matmul %320, %204, %cst_97 {dimension_numbers = #tpu.dot_dimension_numbers<[1], [0], [0], [1], [0, 0, 1, 1], [], []>} : vector<2x64xf32>, vector<64x128xf32>, vector<2x128xf32> -> vector<2x128xf32>
    %cst_98 = arith.constant dense<0.000000e+00> : vector<2x64xf32>
    %324 = tpu.matmul %320, %205, %cst_98 {dimension_numbers = #tpu.dot_dimension_numbers<[1], [0], [0], [1], [0, 0, 1, 1], [], []>} : vector<2x64xf32>, vector<64x64xf32>, vector<2x64xf32> -> vector<2x64xf32>
    %325 = vector.extract_strided_slice %322 {offsets = [0, 0], sizes = [2, 128], strides = [1, 1]} : vector<2x192xf32> to vector<2x128xf32>
    %326 = arith.addf %325, %323 : vector<2x128xf32>
    %327 = arith.negf %326 : vector<2x128xf32>
    %328 = math.exp %327 : vector<2x128xf32>
    %cst_99 = arith.constant 1.000000e+00 : f32
    %329 = vector.broadcast %cst_99 : f32 to vector<2x128xf32>
    %330 = arith.addf %329, %328 : vector<2x128xf32>
    %331 = arith.divf %329, %330 : vector<2x128xf32>
    %332 = vector.extract_strided_slice %331 {offsets = [0, 0], sizes = [2, 64], strides = [1, 1]} : vector<2x128xf32> to vector<2x64xf32>
    %333 = vector.extract_strided_slice %331 {offsets = [0, 64], sizes = [2, 64], strides = [1, 1]} : vector<2x128xf32> to vector<2x64xf32>
    %334 = vector.extract_strided_slice %322 {offsets = [0, 128], sizes = [2, 64], strides = [1, 1]} : vector<2x192xf32> to vector<2x64xf32>
    %335 = arith.addf %324, %211 : vector<2x64xf32>
    %336 = arith.mulf %332, %335 : vector<2x64xf32>
    %337 = arith.addf %334, %336 : vector<2x64xf32>
    %338 = math.tanh %337 : vector<2x64xf32>
    %cst_100 = arith.constant 1.000000e+00 : f32
    %339 = vector.broadcast %cst_100 : f32 to vector<2x64xf32>
    %340 = arith.subf %339, %333 : vector<2x64xf32>
    %341 = arith.mulf %340, %338 : vector<2x64xf32>
    %342 = arith.mulf %333, %320 : vector<2x64xf32>
    %343 = arith.addf %341, %342 : vector<2x64xf32>
    %cst_101 = arith.constant dense<0.000000e+00> : vector<2x192xf32>
    %344 = tpu.matmul %179, %203, %cst_101 {dimension_numbers = #tpu.dot_dimension_numbers<[1], [0], [0], [1], [0, 0, 1, 1], [], []>} : vector<2x64xf32>, vector<64x192xf32>, vector<2x192xf32> -> vector<2x192xf32>
    %345 = arith.addf %344, %208 : vector<2x192xf32>
    %cst_102 = arith.constant dense<0.000000e+00> : vector<2x128xf32>
    %346 = tpu.matmul %343, %204, %cst_102 {dimension_numbers = #tpu.dot_dimension_numbers<[1], [0], [0], [1], [0, 0, 1, 1], [], []>} : vector<2x64xf32>, vector<64x128xf32>, vector<2x128xf32> -> vector<2x128xf32>
    %cst_103 = arith.constant dense<0.000000e+00> : vector<2x64xf32>
    %347 = tpu.matmul %343, %205, %cst_103 {dimension_numbers = #tpu.dot_dimension_numbers<[1], [0], [0], [1], [0, 0, 1, 1], [], []>} : vector<2x64xf32>, vector<64x64xf32>, vector<2x64xf32> -> vector<2x64xf32>
    %348 = vector.extract_strided_slice %345 {offsets = [0, 0], sizes = [2, 128], strides = [1, 1]} : vector<2x192xf32> to vector<2x128xf32>
    %349 = arith.addf %348, %346 : vector<2x128xf32>
    %350 = arith.negf %349 : vector<2x128xf32>
    %351 = math.exp %350 : vector<2x128xf32>
    %cst_104 = arith.constant 1.000000e+00 : f32
    %352 = vector.broadcast %cst_104 : f32 to vector<2x128xf32>
    %353 = arith.addf %352, %351 : vector<2x128xf32>
    %354 = arith.divf %352, %353 : vector<2x128xf32>
    %355 = vector.extract_strided_slice %354 {offsets = [0, 0], sizes = [2, 64], strides = [1, 1]} : vector<2x128xf32> to vector<2x64xf32>
    %356 = vector.extract_strided_slice %354 {offsets = [0, 64], sizes = [2, 64], strides = [1, 1]} : vector<2x128xf32> to vector<2x64xf32>
    %357 = vector.extract_strided_slice %345 {offsets = [0, 128], sizes = [2, 64], strides = [1, 1]} : vector<2x192xf32> to vector<2x64xf32>
    %358 = arith.addf %347, %211 : vector<2x64xf32>
    %359 = arith.mulf %355, %358 : vector<2x64xf32>
    %360 = arith.addf %357, %359 : vector<2x64xf32>
    %361 = math.tanh %360 : vector<2x64xf32>
    %cst_105 = arith.constant 1.000000e+00 : f32
    %362 = vector.broadcast %cst_105 : f32 to vector<2x64xf32>
    %363 = arith.subf %362, %356 : vector<2x64xf32>
    %364 = arith.mulf %363, %361 : vector<2x64xf32>
    %365 = arith.mulf %356, %343 : vector<2x64xf32>
    %366 = arith.addf %364, %365 : vector<2x64xf32>
    %cst_106 = arith.constant dense<0.000000e+00> : vector<2x192xf32>
    %367 = tpu.matmul %202, %203, %cst_106 {dimension_numbers = #tpu.dot_dimension_numbers<[1], [0], [0], [1], [0, 0, 1, 1], [], []>} : vector<2x64xf32>, vector<64x192xf32>, vector<2x192xf32> -> vector<2x192xf32>
    %368 = arith.addf %367, %208 : vector<2x192xf32>
    %cst_107 = arith.constant dense<0.000000e+00> : vector<2x128xf32>
    %369 = tpu.matmul %366, %204, %cst_107 {dimension_numbers = #tpu.dot_dimension_numbers<[1], [0], [0], [1], [0, 0, 1, 1], [], []>} : vector<2x64xf32>, vector<64x128xf32>, vector<2x128xf32> -> vector<2x128xf32>
    %cst_108 = arith.constant dense<0.000000e+00> : vector<2x64xf32>
    %370 = tpu.matmul %366, %205, %cst_108 {dimension_numbers = #tpu.dot_dimension_numbers<[1], [0], [0], [1], [0, 0, 1, 1], [], []>} : vector<2x64xf32>, vector<64x64xf32>, vector<2x64xf32> -> vector<2x64xf32>
    %371 = vector.extract_strided_slice %368 {offsets = [0, 0], sizes = [2, 128], strides = [1, 1]} : vector<2x192xf32> to vector<2x128xf32>
    %372 = arith.addf %371, %369 : vector<2x128xf32>
    %373 = arith.negf %372 : vector<2x128xf32>
    %374 = math.exp %373 : vector<2x128xf32>
    %cst_109 = arith.constant 1.000000e+00 : f32
    %375 = vector.broadcast %cst_109 : f32 to vector<2x128xf32>
    %376 = arith.addf %375, %374 : vector<2x128xf32>
    %377 = arith.divf %375, %376 : vector<2x128xf32>
    %378 = vector.extract_strided_slice %377 {offsets = [0, 0], sizes = [2, 64], strides = [1, 1]} : vector<2x128xf32> to vector<2x64xf32>
    %379 = vector.extract_strided_slice %377 {offsets = [0, 64], sizes = [2, 64], strides = [1, 1]} : vector<2x128xf32> to vector<2x64xf32>
    %380 = vector.extract_strided_slice %368 {offsets = [0, 128], sizes = [2, 64], strides = [1, 1]} : vector<2x192xf32> to vector<2x64xf32>
    %381 = arith.addf %370, %211 : vector<2x64xf32>
    %382 = arith.mulf %378, %381 : vector<2x64xf32>
    %383 = arith.addf %380, %382 : vector<2x64xf32>
    %384 = math.tanh %383 : vector<2x64xf32>
    %cst_110 = arith.constant 1.000000e+00 : f32
    %385 = vector.broadcast %cst_110 : f32 to vector<2x64xf32>
    %386 = arith.subf %385, %379 : vector<2x64xf32>
    %387 = arith.mulf %386, %384 : vector<2x64xf32>
    %388 = arith.mulf %379, %366 : vector<2x64xf32>
    %389 = arith.addf %387, %388 : vector<2x64xf32>
    %c0_111 = arith.constant 0 : index
    %c0_112 = arith.constant 0 : index
    %390 = vector.load %arg12[%c0_111, %c0_112] : memref<64x192xf32, #tpu.memory_space<vmem>>, vector<64x192xf32>
    %c0_113 = arith.constant 0 : index
    %c0_114 = arith.constant 0 : index
    %391 = vector.load %arg13[%c0_113, %c0_114] : memref<64x128xf32, #tpu.memory_space<vmem>>, vector<64x128xf32>
    %c0_115 = arith.constant 0 : index
    %c0_116 = arith.constant 0 : index
    %392 = vector.load %arg14[%c0_115, %c0_116] : memref<64x64xf32, #tpu.memory_space<vmem>>, vector<64x64xf32>
    %c0_117 = arith.constant 0 : index
    %c0_118 = arith.constant 0 : index
    %393 = vector.load %arg15[%c0_117, %c0_118] : memref<1x192xf32, #tpu.memory_space<vmem>>, vector<1x192xf32>
    %394 = vector.shape_cast %393 : vector<1x192xf32> to vector<1x192xf32>
    %395 = vector.broadcast %394 : vector<1x192xf32> to vector<2x192xf32>
    %c0_119 = arith.constant 0 : index
    %c0_120 = arith.constant 0 : index
    %396 = vector.load %arg16[%c0_119, %c0_120] : memref<1x64xf32, #tpu.memory_space<vmem>>, vector<1x64xf32>
    %397 = vector.shape_cast %396 : vector<1x64xf32> to vector<1x64xf32>
    %398 = vector.broadcast %397 : vector<1x64xf32> to vector<2x64xf32>
    %cst_121 = arith.constant dense<0.000000e+00> : vector<2x192xf32>
    %399 = tpu.matmul %228, %390, %cst_121 {dimension_numbers = #tpu.dot_dimension_numbers<[1], [0], [0], [1], [0, 0, 1, 1], [], []>} : vector<2x64xf32>, vector<64x192xf32>, vector<2x192xf32> -> vector<2x192xf32>
    %400 = arith.addf %399, %395 : vector<2x192xf32>
    %401 = vector.extract_strided_slice %400 {offsets = [0, 0], sizes = [2, 128], strides = [1, 1]} : vector<2x192xf32> to vector<2x128xf32>
    %402 = arith.negf %401 : vector<2x128xf32>
    %403 = math.exp %402 : vector<2x128xf32>
    %cst_122 = arith.constant 1.000000e+00 : f32
    %404 = vector.broadcast %cst_122 : f32 to vector<2x128xf32>
    %405 = arith.addf %404, %403 : vector<2x128xf32>
    %406 = arith.divf %404, %405 : vector<2x128xf32>
    %407 = vector.extract_strided_slice %406 {offsets = [0, 0], sizes = [2, 64], strides = [1, 1]} : vector<2x128xf32> to vector<2x64xf32>
    %408 = vector.extract_strided_slice %406 {offsets = [0, 64], sizes = [2, 64], strides = [1, 1]} : vector<2x128xf32> to vector<2x64xf32>
    %409 = vector.extract_strided_slice %400 {offsets = [0, 128], sizes = [2, 64], strides = [1, 1]} : vector<2x192xf32> to vector<2x64xf32>
    %410 = arith.mulf %407, %398 : vector<2x64xf32>
    %411 = arith.addf %409, %410 : vector<2x64xf32>
    %412 = math.tanh %411 : vector<2x64xf32>
    %cst_123 = arith.constant 1.000000e+00 : f32
    %413 = vector.broadcast %cst_123 : f32 to vector<2x64xf32>
    %414 = arith.subf %413, %408 : vector<2x64xf32>
    %415 = arith.mulf %414, %412 : vector<2x64xf32>
    %cst_124 = arith.constant dense<0.000000e+00> : vector<2x192xf32>
    %416 = tpu.matmul %251, %390, %cst_124 {dimension_numbers = #tpu.dot_dimension_numbers<[1], [0], [0], [1], [0, 0, 1, 1], [], []>} : vector<2x64xf32>, vector<64x192xf32>, vector<2x192xf32> -> vector<2x192xf32>
    %417 = arith.addf %416, %395 : vector<2x192xf32>
    %cst_125 = arith.constant dense<0.000000e+00> : vector<2x128xf32>
    %418 = tpu.matmul %415, %391, %cst_125 {dimension_numbers = #tpu.dot_dimension_numbers<[1], [0], [0], [1], [0, 0, 1, 1], [], []>} : vector<2x64xf32>, vector<64x128xf32>, vector<2x128xf32> -> vector<2x128xf32>
    %cst_126 = arith.constant dense<0.000000e+00> : vector<2x64xf32>
    %419 = tpu.matmul %415, %392, %cst_126 {dimension_numbers = #tpu.dot_dimension_numbers<[1], [0], [0], [1], [0, 0, 1, 1], [], []>} : vector<2x64xf32>, vector<64x64xf32>, vector<2x64xf32> -> vector<2x64xf32>
    %420 = vector.extract_strided_slice %417 {offsets = [0, 0], sizes = [2, 128], strides = [1, 1]} : vector<2x192xf32> to vector<2x128xf32>
    %421 = arith.addf %420, %418 : vector<2x128xf32>
    %422 = arith.negf %421 : vector<2x128xf32>
    %423 = math.exp %422 : vector<2x128xf32>
    %cst_127 = arith.constant 1.000000e+00 : f32
    %424 = vector.broadcast %cst_127 : f32 to vector<2x128xf32>
    %425 = arith.addf %424, %423 : vector<2x128xf32>
    %426 = arith.divf %424, %425 : vector<2x128xf32>
    %427 = vector.extract_strided_slice %426 {offsets = [0, 0], sizes = [2, 64], strides = [1, 1]} : vector<2x128xf32> to vector<2x64xf32>
    %428 = vector.extract_strided_slice %426 {offsets = [0, 64], sizes = [2, 64], strides = [1, 1]} : vector<2x128xf32> to vector<2x64xf32>
    %429 = vector.extract_strided_slice %417 {offsets = [0, 128], sizes = [2, 64], strides = [1, 1]} : vector<2x192xf32> to vector<2x64xf32>
    %430 = arith.addf %419, %398 : vector<2x64xf32>
    %431 = arith.mulf %427, %430 : vector<2x64xf32>
    %432 = arith.addf %429, %431 : vector<2x64xf32>
    %433 = math.tanh %432 : vector<2x64xf32>
    %cst_128 = arith.constant 1.000000e+00 : f32
    %434 = vector.broadcast %cst_128 : f32 to vector<2x64xf32>
    %435 = arith.subf %434, %428 : vector<2x64xf32>
    %436 = arith.mulf %435, %433 : vector<2x64xf32>
    %437 = arith.mulf %428, %415 : vector<2x64xf32>
    %438 = arith.addf %436, %437 : vector<2x64xf32>
    %cst_129 = arith.constant dense<0.000000e+00> : vector<2x192xf32>
    %439 = tpu.matmul %274, %390, %cst_129 {dimension_numbers = #tpu.dot_dimension_numbers<[1], [0], [0], [1], [0, 0, 1, 1], [], []>} : vector<2x64xf32>, vector<64x192xf32>, vector<2x192xf32> -> vector<2x192xf32>
    %440 = arith.addf %439, %395 : vector<2x192xf32>
    %cst_130 = arith.constant dense<0.000000e+00> : vector<2x128xf32>
    %441 = tpu.matmul %438, %391, %cst_130 {dimension_numbers = #tpu.dot_dimension_numbers<[1], [0], [0], [1], [0, 0, 1, 1], [], []>} : vector<2x64xf32>, vector<64x128xf32>, vector<2x128xf32> -> vector<2x128xf32>
    %cst_131 = arith.constant dense<0.000000e+00> : vector<2x64xf32>
    %442 = tpu.matmul %438, %392, %cst_131 {dimension_numbers = #tpu.dot_dimension_numbers<[1], [0], [0], [1], [0, 0, 1, 1], [], []>} : vector<2x64xf32>, vector<64x64xf32>, vector<2x64xf32> -> vector<2x64xf32>
    %443 = vector.extract_strided_slice %440 {offsets = [0, 0], sizes = [2, 128], strides = [1, 1]} : vector<2x192xf32> to vector<2x128xf32>
    %444 = arith.addf %443, %441 : vector<2x128xf32>
    %445 = arith.negf %444 : vector<2x128xf32>
    %446 = math.exp %445 : vector<2x128xf32>
    %cst_132 = arith.constant 1.000000e+00 : f32
    %447 = vector.broadcast %cst_132 : f32 to vector<2x128xf32>
    %448 = arith.addf %447, %446 : vector<2x128xf32>
    %449 = arith.divf %447, %448 : vector<2x128xf32>
    %450 = vector.extract_strided_slice %449 {offsets = [0, 0], sizes = [2, 64], strides = [1, 1]} : vector<2x128xf32> to vector<2x64xf32>
    %451 = vector.extract_strided_slice %449 {offsets = [0, 64], sizes = [2, 64], strides = [1, 1]} : vector<2x128xf32> to vector<2x64xf32>
    %452 = vector.extract_strided_slice %440 {offsets = [0, 128], sizes = [2, 64], strides = [1, 1]} : vector<2x192xf32> to vector<2x64xf32>
    %453 = arith.addf %442, %398 : vector<2x64xf32>
    %454 = arith.mulf %450, %453 : vector<2x64xf32>
    %455 = arith.addf %452, %454 : vector<2x64xf32>
    %456 = math.tanh %455 : vector<2x64xf32>
    %cst_133 = arith.constant 1.000000e+00 : f32
    %457 = vector.broadcast %cst_133 : f32 to vector<2x64xf32>
    %458 = arith.subf %457, %451 : vector<2x64xf32>
    %459 = arith.mulf %458, %456 : vector<2x64xf32>
    %460 = arith.mulf %451, %438 : vector<2x64xf32>
    %461 = arith.addf %459, %460 : vector<2x64xf32>
    %cst_134 = arith.constant dense<0.000000e+00> : vector<2x192xf32>
    %462 = tpu.matmul %297, %390, %cst_134 {dimension_numbers = #tpu.dot_dimension_numbers<[1], [0], [0], [1], [0, 0, 1, 1], [], []>} : vector<2x64xf32>, vector<64x192xf32>, vector<2x192xf32> -> vector<2x192xf32>
    %463 = arith.addf %462, %395 : vector<2x192xf32>
    %cst_135 = arith.constant dense<0.000000e+00> : vector<2x128xf32>
    %464 = tpu.matmul %461, %391, %cst_135 {dimension_numbers = #tpu.dot_dimension_numbers<[1], [0], [0], [1], [0, 0, 1, 1], [], []>} : vector<2x64xf32>, vector<64x128xf32>, vector<2x128xf32> -> vector<2x128xf32>
    %cst_136 = arith.constant dense<0.000000e+00> : vector<2x64xf32>
    %465 = tpu.matmul %461, %392, %cst_136 {dimension_numbers = #tpu.dot_dimension_numbers<[1], [0], [0], [1], [0, 0, 1, 1], [], []>} : vector<2x64xf32>, vector<64x64xf32>, vector<2x64xf32> -> vector<2x64xf32>
    %466 = vector.extract_strided_slice %463 {offsets = [0, 0], sizes = [2, 128], strides = [1, 1]} : vector<2x192xf32> to vector<2x128xf32>
    %467 = arith.addf %466, %464 : vector<2x128xf32>
    %468 = arith.negf %467 : vector<2x128xf32>
    %469 = math.exp %468 : vector<2x128xf32>
    %cst_137 = arith.constant 1.000000e+00 : f32
    %470 = vector.broadcast %cst_137 : f32 to vector<2x128xf32>
    %471 = arith.addf %470, %469 : vector<2x128xf32>
    %472 = arith.divf %470, %471 : vector<2x128xf32>
    %473 = vector.extract_strided_slice %472 {offsets = [0, 0], sizes = [2, 64], strides = [1, 1]} : vector<2x128xf32> to vector<2x64xf32>
    %474 = vector.extract_strided_slice %472 {offsets = [0, 64], sizes = [2, 64], strides = [1, 1]} : vector<2x128xf32> to vector<2x64xf32>
    %475 = vector.extract_strided_slice %463 {offsets = [0, 128], sizes = [2, 64], strides = [1, 1]} : vector<2x192xf32> to vector<2x64xf32>
    %476 = arith.addf %465, %398 : vector<2x64xf32>
    %477 = arith.mulf %473, %476 : vector<2x64xf32>
    %478 = arith.addf %475, %477 : vector<2x64xf32>
    %479 = math.tanh %478 : vector<2x64xf32>
    %cst_138 = arith.constant 1.000000e+00 : f32
    %480 = vector.broadcast %cst_138 : f32 to vector<2x64xf32>
    %481 = arith.subf %480, %474 : vector<2x64xf32>
    %482 = arith.mulf %481, %479 : vector<2x64xf32>
    %483 = arith.mulf %474, %461 : vector<2x64xf32>
    %484 = arith.addf %482, %483 : vector<2x64xf32>
    %cst_139 = arith.constant dense<0.000000e+00> : vector<2x192xf32>
    %485 = tpu.matmul %320, %390, %cst_139 {dimension_numbers = #tpu.dot_dimension_numbers<[1], [0], [0], [1], [0, 0, 1, 1], [], []>} : vector<2x64xf32>, vector<64x192xf32>, vector<2x192xf32> -> vector<2x192xf32>
    %486 = arith.addf %485, %395 : vector<2x192xf32>
    %cst_140 = arith.constant dense<0.000000e+00> : vector<2x128xf32>
    %487 = tpu.matmul %484, %391, %cst_140 {dimension_numbers = #tpu.dot_dimension_numbers<[1], [0], [0], [1], [0, 0, 1, 1], [], []>} : vector<2x64xf32>, vector<64x128xf32>, vector<2x128xf32> -> vector<2x128xf32>
    %cst_141 = arith.constant dense<0.000000e+00> : vector<2x64xf32>
    %488 = tpu.matmul %484, %392, %cst_141 {dimension_numbers = #tpu.dot_dimension_numbers<[1], [0], [0], [1], [0, 0, 1, 1], [], []>} : vector<2x64xf32>, vector<64x64xf32>, vector<2x64xf32> -> vector<2x64xf32>
    %489 = vector.extract_strided_slice %486 {offsets = [0, 0], sizes = [2, 128], strides = [1, 1]} : vector<2x192xf32> to vector<2x128xf32>
    %490 = arith.addf %489, %487 : vector<2x128xf32>
    %491 = arith.negf %490 : vector<2x128xf32>
    %492 = math.exp %491 : vector<2x128xf32>
    %cst_142 = arith.constant 1.000000e+00 : f32
    %493 = vector.broadcast %cst_142 : f32 to vector<2x128xf32>
    %494 = arith.addf %493, %492 : vector<2x128xf32>
    %495 = arith.divf %493, %494 : vector<2x128xf32>
    %496 = vector.extract_strided_slice %495 {offsets = [0, 0], sizes = [2, 64], strides = [1, 1]} : vector<2x128xf32> to vector<2x64xf32>
    %497 = vector.extract_strided_slice %495 {offsets = [0, 64], sizes = [2, 64], strides = [1, 1]} : vector<2x128xf32> to vector<2x64xf32>
    %498 = vector.extract_strided_slice %486 {offsets = [0, 128], sizes = [2, 64], strides = [1, 1]} : vector<2x192xf32> to vector<2x64xf32>
    %499 = arith.addf %488, %398 : vector<2x64xf32>
    %500 = arith.mulf %496, %499 : vector<2x64xf32>
    %501 = arith.addf %498, %500 : vector<2x64xf32>
    %502 = math.tanh %501 : vector<2x64xf32>
    %cst_143 = arith.constant 1.000000e+00 : f32
    %503 = vector.broadcast %cst_143 : f32 to vector<2x64xf32>
    %504 = arith.subf %503, %497 : vector<2x64xf32>
    %505 = arith.mulf %504, %502 : vector<2x64xf32>
    %506 = arith.mulf %497, %484 : vector<2x64xf32>
    %507 = arith.addf %505, %506 : vector<2x64xf32>
    %cst_144 = arith.constant dense<0.000000e+00> : vector<2x192xf32>
    %508 = tpu.matmul %343, %390, %cst_144 {dimension_numbers = #tpu.dot_dimension_numbers<[1], [0], [0], [1], [0, 0, 1, 1], [], []>} : vector<2x64xf32>, vector<64x192xf32>, vector<2x192xf32> -> vector<2x192xf32>
    %509 = arith.addf %508, %395 : vector<2x192xf32>
    %cst_145 = arith.constant dense<0.000000e+00> : vector<2x128xf32>
    %510 = tpu.matmul %507, %391, %cst_145 {dimension_numbers = #tpu.dot_dimension_numbers<[1], [0], [0], [1], [0, 0, 1, 1], [], []>} : vector<2x64xf32>, vector<64x128xf32>, vector<2x128xf32> -> vector<2x128xf32>
    %cst_146 = arith.constant dense<0.000000e+00> : vector<2x64xf32>
    %511 = tpu.matmul %507, %392, %cst_146 {dimension_numbers = #tpu.dot_dimension_numbers<[1], [0], [0], [1], [0, 0, 1, 1], [], []>} : vector<2x64xf32>, vector<64x64xf32>, vector<2x64xf32> -> vector<2x64xf32>
    %512 = vector.extract_strided_slice %509 {offsets = [0, 0], sizes = [2, 128], strides = [1, 1]} : vector<2x192xf32> to vector<2x128xf32>
    %513 = arith.addf %512, %510 : vector<2x128xf32>
    %514 = arith.negf %513 : vector<2x128xf32>
    %515 = math.exp %514 : vector<2x128xf32>
    %cst_147 = arith.constant 1.000000e+00 : f32
    %516 = vector.broadcast %cst_147 : f32 to vector<2x128xf32>
    %517 = arith.addf %516, %515 : vector<2x128xf32>
    %518 = arith.divf %516, %517 : vector<2x128xf32>
    %519 = vector.extract_strided_slice %518 {offsets = [0, 0], sizes = [2, 64], strides = [1, 1]} : vector<2x128xf32> to vector<2x64xf32>
    %520 = vector.extract_strided_slice %518 {offsets = [0, 64], sizes = [2, 64], strides = [1, 1]} : vector<2x128xf32> to vector<2x64xf32>
    %521 = vector.extract_strided_slice %509 {offsets = [0, 128], sizes = [2, 64], strides = [1, 1]} : vector<2x192xf32> to vector<2x64xf32>
    %522 = arith.addf %511, %398 : vector<2x64xf32>
    %523 = arith.mulf %519, %522 : vector<2x64xf32>
    %524 = arith.addf %521, %523 : vector<2x64xf32>
    %525 = math.tanh %524 : vector<2x64xf32>
    %cst_148 = arith.constant 1.000000e+00 : f32
    %526 = vector.broadcast %cst_148 : f32 to vector<2x64xf32>
    %527 = arith.subf %526, %520 : vector<2x64xf32>
    %528 = arith.mulf %527, %525 : vector<2x64xf32>
    %529 = arith.mulf %520, %507 : vector<2x64xf32>
    %530 = arith.addf %528, %529 : vector<2x64xf32>
    %cst_149 = arith.constant dense<0.000000e+00> : vector<2x192xf32>
    %531 = tpu.matmul %366, %390, %cst_149 {dimension_numbers = #tpu.dot_dimension_numbers<[1], [0], [0], [1], [0, 0, 1, 1], [], []>} : vector<2x64xf32>, vector<64x192xf32>, vector<2x192xf32> -> vector<2x192xf32>
    %532 = arith.addf %531, %395 : vector<2x192xf32>
    %cst_150 = arith.constant dense<0.000000e+00> : vector<2x128xf32>
    %533 = tpu.matmul %530, %391, %cst_150 {dimension_numbers = #tpu.dot_dimension_numbers<[1], [0], [0], [1], [0, 0, 1, 1], [], []>} : vector<2x64xf32>, vector<64x128xf32>, vector<2x128xf32> -> vector<2x128xf32>
    %cst_151 = arith.constant dense<0.000000e+00> : vector<2x64xf32>
    %534 = tpu.matmul %530, %392, %cst_151 {dimension_numbers = #tpu.dot_dimension_numbers<[1], [0], [0], [1], [0, 0, 1, 1], [], []>} : vector<2x64xf32>, vector<64x64xf32>, vector<2x64xf32> -> vector<2x64xf32>
    %535 = vector.extract_strided_slice %532 {offsets = [0, 0], sizes = [2, 128], strides = [1, 1]} : vector<2x192xf32> to vector<2x128xf32>
    %536 = arith.addf %535, %533 : vector<2x128xf32>
    %537 = arith.negf %536 : vector<2x128xf32>
    %538 = math.exp %537 : vector<2x128xf32>
    %cst_152 = arith.constant 1.000000e+00 : f32
    %539 = vector.broadcast %cst_152 : f32 to vector<2x128xf32>
    %540 = arith.addf %539, %538 : vector<2x128xf32>
    %541 = arith.divf %539, %540 : vector<2x128xf32>
    %542 = vector.extract_strided_slice %541 {offsets = [0, 0], sizes = [2, 64], strides = [1, 1]} : vector<2x128xf32> to vector<2x64xf32>
    %543 = vector.extract_strided_slice %541 {offsets = [0, 64], sizes = [2, 64], strides = [1, 1]} : vector<2x128xf32> to vector<2x64xf32>
    %544 = vector.extract_strided_slice %532 {offsets = [0, 128], sizes = [2, 64], strides = [1, 1]} : vector<2x192xf32> to vector<2x64xf32>
    %545 = arith.addf %534, %398 : vector<2x64xf32>
    %546 = arith.mulf %542, %545 : vector<2x64xf32>
    %547 = arith.addf %544, %546 : vector<2x64xf32>
    %548 = math.tanh %547 : vector<2x64xf32>
    %cst_153 = arith.constant 1.000000e+00 : f32
    %549 = vector.broadcast %cst_153 : f32 to vector<2x64xf32>
    %550 = arith.subf %549, %543 : vector<2x64xf32>
    %551 = arith.mulf %550, %548 : vector<2x64xf32>
    %552 = arith.mulf %543, %530 : vector<2x64xf32>
    %553 = arith.addf %551, %552 : vector<2x64xf32>
    %cst_154 = arith.constant dense<0.000000e+00> : vector<2x192xf32>
    %554 = tpu.matmul %389, %390, %cst_154 {dimension_numbers = #tpu.dot_dimension_numbers<[1], [0], [0], [1], [0, 0, 1, 1], [], []>} : vector<2x64xf32>, vector<64x192xf32>, vector<2x192xf32> -> vector<2x192xf32>
    %555 = arith.addf %554, %395 : vector<2x192xf32>
    %cst_155 = arith.constant dense<0.000000e+00> : vector<2x128xf32>
    %556 = tpu.matmul %553, %391, %cst_155 {dimension_numbers = #tpu.dot_dimension_numbers<[1], [0], [0], [1], [0, 0, 1, 1], [], []>} : vector<2x64xf32>, vector<64x128xf32>, vector<2x128xf32> -> vector<2x128xf32>
    %cst_156 = arith.constant dense<0.000000e+00> : vector<2x64xf32>
    %557 = tpu.matmul %553, %392, %cst_156 {dimension_numbers = #tpu.dot_dimension_numbers<[1], [0], [0], [1], [0, 0, 1, 1], [], []>} : vector<2x64xf32>, vector<64x64xf32>, vector<2x64xf32> -> vector<2x64xf32>
    %558 = vector.extract_strided_slice %555 {offsets = [0, 0], sizes = [2, 128], strides = [1, 1]} : vector<2x192xf32> to vector<2x128xf32>
    %559 = arith.addf %558, %556 : vector<2x128xf32>
    %560 = arith.negf %559 : vector<2x128xf32>
    %561 = math.exp %560 : vector<2x128xf32>
    %cst_157 = arith.constant 1.000000e+00 : f32
    %562 = vector.broadcast %cst_157 : f32 to vector<2x128xf32>
    %563 = arith.addf %562, %561 : vector<2x128xf32>
    %564 = arith.divf %562, %563 : vector<2x128xf32>
    %565 = vector.extract_strided_slice %564 {offsets = [0, 0], sizes = [2, 64], strides = [1, 1]} : vector<2x128xf32> to vector<2x64xf32>
    %566 = vector.extract_strided_slice %564 {offsets = [0, 64], sizes = [2, 64], strides = [1, 1]} : vector<2x128xf32> to vector<2x64xf32>
    %567 = vector.extract_strided_slice %555 {offsets = [0, 128], sizes = [2, 64], strides = [1, 1]} : vector<2x192xf32> to vector<2x64xf32>
    %568 = arith.addf %557, %398 : vector<2x64xf32>
    %569 = arith.mulf %565, %568 : vector<2x64xf32>
    %570 = arith.addf %567, %569 : vector<2x64xf32>
    %571 = math.tanh %570 : vector<2x64xf32>
    %cst_158 = arith.constant 1.000000e+00 : f32
    %572 = vector.broadcast %cst_158 : f32 to vector<2x64xf32>
    %573 = arith.subf %572, %566 : vector<2x64xf32>
    %574 = arith.mulf %573, %571 : vector<2x64xf32>
    %575 = arith.mulf %566, %553 : vector<2x64xf32>
    %576 = arith.addf %574, %575 : vector<2x64xf32>
    %c0_159 = arith.constant 0 : index
    %c0_160 = arith.constant 0 : index
    %577 = vector.load %arg17[%c0_159, %c0_160] : memref<64x32xf32, #tpu.memory_space<vmem>>, vector<64x32xf32>
    %cst_161 = arith.constant dense<0.000000e+00> : vector<2x32xf32>
    %578 = tpu.matmul %576, %577, %cst_161 {dimension_numbers = #tpu.dot_dimension_numbers<[1], [0], [0], [1], [0, 0, 1, 1], [], []>} : vector<2x64xf32>, vector<64x32xf32>, vector<2x32xf32> -> vector<2x32xf32>
    %c0_162 = arith.constant 0 : index
    %c0_163 = arith.constant 0 : index
    %579 = vector.load %arg18[%c0_162, %c0_163] : memref<1x32xf32, #tpu.memory_space<vmem>>, vector<1x32xf32>
    %580 = vector.broadcast %579 : vector<1x32xf32> to vector<2x32xf32>
    %581 = arith.addf %578, %580 : vector<2x32xf32>
    %cst_164 = arith.constant 0.000000e+00 : f32
    %582 = vector.broadcast %cst_164 : f32 to vector<2x32xf32>
    %583 = arith.maximumf %581, %582 : vector<2x32xf32>
    %c0_165 = arith.constant 0 : index
    %c0_166 = arith.constant 0 : index
    %584 = vector.load %arg19[%c0_165, %c0_166] : memref<32x64xf32, #tpu.memory_space<vmem>>, vector<32x64xf32>
    %cst_167 = arith.constant dense<0.000000e+00> : vector<2x64xf32>
    %585 = tpu.matmul %583, %584, %cst_167 {dimension_numbers = #tpu.dot_dimension_numbers<[1], [0], [0], [1], [0, 0, 1, 1], [], []>} : vector<2x32xf32>, vector<32x64xf32>, vector<2x64xf32> -> vector<2x64xf32>
    %c0_168 = arith.constant 0 : index
    %c0_169 = arith.constant 0 : index
    %586 = vector.load %arg20[%c0_168, %c0_169] : memref<1x64xf32, #tpu.memory_space<vmem>>, vector<1x64xf32>
    %587 = vector.broadcast %586 : vector<1x64xf32> to vector<2x64xf32>
    %588 = arith.addf %585, %587 : vector<2x64xf32>
    %cst_170 = arith.constant 0.000000e+00 : f32
    %589 = vector.broadcast %cst_170 : f32 to vector<2x64xf32>
    %590 = arith.maximumf %588, %589 : vector<2x64xf32>
    %c0_171 = arith.constant 0 : index
    %c0_172 = arith.constant 0 : index
    %591 = vector.load %arg21[%c0_171, %c0_172] : memref<64x9xf32, #tpu.memory_space<vmem>>, vector<64x9xf32>
    %cst_173 = arith.constant dense<0.000000e+00> : vector<2x9xf32>
    %592 = tpu.matmul %590, %591, %cst_173 {dimension_numbers = #tpu.dot_dimension_numbers<[1], [0], [0], [1], [0, 0, 1, 1], [], []>} : vector<2x64xf32>, vector<64x9xf32>, vector<2x9xf32> -> vector<2x9xf32>
    %c0_174 = arith.constant 0 : index
    %c0_175 = arith.constant 0 : index
    %593 = vector.load %arg22[%c0_174, %c0_175] : memref<1x9xf32, #tpu.memory_space<vmem>>, vector<1x9xf32>
    %594 = vector.broadcast %593 : vector<1x9xf32> to vector<2x9xf32>
    %595 = arith.addf %592, %594 : vector<2x9xf32>
    %596 = vector.extract_strided_slice %595 {offsets = [0, 0], sizes = [2, 8], strides = [1, 1]} : vector<2x9xf32> to vector<2x8xf32>
    %597 = vector.extract_strided_slice %595 {offsets = [0, 8], sizes = [2, 1], strides = [1, 1]} : vector<2x9xf32> to vector<2x1xf32>
    %598 = vector.broadcast %597 : vector<2x1xf32> to vector<2x8xf32>
    %599 = arith.addf %598, %596 : vector<2x8xf32>
    %cst_176 = arith.constant dense<0.000000e+00> : vector<2xf32>
    %600 = vector.multi_reduction <add>, %596, %cst_176 [1] : vector<2x8xf32> to vector<2xf32>
    %601 = vector.shape_cast %600 : vector<2xf32> to vector<2x1xf32>
    %cst_177 = arith.constant 8.000000e+00 : f32
    %602 = vector.broadcast %cst_177 : f32 to vector<2x1xf32>
    %603 = arith.divf %601, %602 : vector<2x1xf32>
    %604 = vector.broadcast %603 : vector<2x1xf32> to vector<2x8xf32>
    %605 = arith.subf %599, %604 : vector<2x8xf32>
    %c0_178 = arith.constant 0 : index
    %c0_179 = arith.constant 0 : index
    %606 = vector.load %arg23[%c0_178, %c0_179] : memref<2x8xf32, #tpu.memory_space<vmem>>, vector<2x8xf32>
    tpu.vector_store %arg23[%c0_178, %c0_179], %605 {strides = array<i32>} : memref<2x8xf32, #tpu.memory_space<vmem>>, vector<2x8xf32>,
    return
  }
  func.func @transform_0(%arg0: i32) -> (i32, i32, i32) {
    %c0_i32 = arith.constant 0 : i32
    %c0_i32_0 = arith.constant 0 : i32
    %c0_i32_1 = arith.constant 0 : i32
    %c0_i32_2 = arith.constant 0 : i32
    return %c0_i32, %c0_i32_0, %c0_i32_1 : i32, i32, i32
  }
  func.func @transform_1(%arg0: i32) -> (i32, i32) {
    %c0_i32 = arith.constant 0 : i32
    %c0_i32_0 = arith.constant 0 : i32
    %c0_i32_1 = arith.constant 0 : i32
    return %c0_i32, %c0_i32_0 : i32, i32
  }
  func.func @transform_2(%arg0: i32) -> (i32, i32) {
    %c0_i32 = arith.constant 0 : i32
    %c0_i32_0 = arith.constant 0 : i32
    %c0_i32_1 = arith.constant 0 : i32
    return %c0_i32, %c0_i32_0 : i32, i32
  }
  func.func @transform_3(%arg0: i32) -> (i32, i32) {
    %c0_i32 = arith.constant 0 : i32
    %c0_i32_0 = arith.constant 0 : i32
    %c0_i32_1 = arith.constant 0 : i32
    return %c0_i32, %c0_i32_0 : i32, i32
  }
  func.func @transform_4(%arg0: i32) -> (i32, i32) {
    %c0_i32 = arith.constant 0 : i32
    %c0_i32_0 = arith.constant 0 : i32
    %c0_i32_1 = arith.constant 0 : i32
    return %c0_i32, %c0_i32_0 : i32, i32
  }
  func.func @transform_5(%arg0: i32) -> (i32, i32) {
    %c0_i32 = arith.constant 0 : i32
    %c0_i32_0 = arith.constant 0 : i32
    %c0_i32_1 = arith.constant 0 : i32
    return %c0_i32, %c0_i32_0 : i32, i32
  }
  func.func @transform_6(%arg0: i32) -> (i32, i32) {
    %c0_i32 = arith.constant 0 : i32
    %c0_i32_0 = arith.constant 0 : i32
    %c0_i32_1 = arith.constant 0 : i32
    return %c0_i32, %c0_i32_0 : i32, i32
  }
  func.func @transform_7(%arg0: i32) -> (i32, i32) {
    %c0_i32 = arith.constant 0 : i32
    %c0_i32_0 = arith.constant 0 : i32
    %c0_i32_1 = arith.constant 0 : i32
    return %c0_i32, %c0_i32_0 : i32, i32
  }
  func.func @transform_8(%arg0: i32) -> (i32, i32) {
    %c0_i32 = arith.constant 0 : i32
    %c0_i32_0 = arith.constant 0 : i32
    %c0_i32_1 = arith.constant 0 : i32
    return %c0_i32, %c0_i32_0 : i32, i32
  }
  func.func @transform_9(%arg0: i32) -> (i32, i32) {
    %c0_i32 = arith.constant 0 : i32
    %c0_i32_0 = arith.constant 0 : i32
    %c0_i32_1 = arith.constant 0 : i32
    return %c0_i32, %c0_i32_0 : i32, i32
  }
  func.func @transform_10(%arg0: i32) -> (i32, i32) {
    %c0_i32 = arith.constant 0 : i32
    %c0_i32_0 = arith.constant 0 : i32
    %c0_i32_1 = arith.constant 0 : i32
    return %c0_i32, %c0_i32_0 : i32, i32
  }
  func.func @transform_11(%arg0: i32) -> (i32, i32) {
    %c0_i32 = arith.constant 0 : i32
    %c0_i32_0 = arith.constant 0 : i32
    %c0_i32_1 = arith.constant 0 : i32
    return %c0_i32, %c0_i32_0 : i32, i32
  }
  func.func @transform_12(%arg0: i32) -> (i32, i32) {
    %c0_i32 = arith.constant 0 : i32
    %c0_i32_0 = arith.constant 0 : i32
    %c0_i32_1 = arith.constant 0 : i32
    return %c0_i32, %c0_i32_0 : i32, i32
  }
  func.func @transform_13(%arg0: i32) -> (i32, i32) {
    %c0_i32 = arith.constant 0 : i32
    %c0_i32_0 = arith.constant 0 : i32
    %c0_i32_1 = arith.constant 0 : i32
    return %c0_i32, %c0_i32_0 : i32, i32
  }
  func.func @transform_14(%arg0: i32) -> (i32, i32) {
    %c0_i32 = arith.constant 0 : i32
    %c0_i32_0 = arith.constant 0 : i32
    %c0_i32_1 = arith.constant 0 : i32
    return %c0_i32, %c0_i32_0 : i32, i32
  }
  func.func @transform_15(%arg0: i32) -> (i32, i32) {
    %c0_i32 = arith.constant 0 : i32
    %c0_i32_0 = arith.constant 0 : i32
    %c0_i32_1 = arith.constant 0 : i32
    return %c0_i32, %c0_i32_0 : i32, i32
  }
  func.func @transform_16(%arg0: i32) -> (i32, i32) {
    %c0_i32 = arith.constant 0 : i32
    %c0_i32_0 = arith.constant 0 : i32
    %c0_i32_1 = arith.constant 0 : i32
    return %c0_i32, %c0_i32_0 : i32, i32
  }
  func.func @transform_17(%arg0: i32) -> (i32, i32) {
    %c0_i32 = arith.constant 0 : i32
    %c0_i32_0 = arith.constant 0 : i32
    %c0_i32_1 = arith.constant 0 : i32
    return %c0_i32, %c0_i32_0 : i32, i32
  }
  func.func @transform_18(%arg0: i32) -> (i32, i32) {
    %c0_i32 = arith.constant 0 : i32
    %c0_i32_0 = arith.constant 0 : i32
    %c0_i32_1 = arith.constant 0 : i32
    return %c0_i32, %c0_i32_0 : i32, i32
  }
  func.func @transform_19(%arg0: i32) -> (i32, i32) {
    %c0_i32 = arith.constant 0 : i32
    %c0_i32_0 = arith.constant 0 : i32
    %c0_i32_1 = arith.constant 0 : i32
    return %c0_i32, %c0_i32_0 : i32, i32
  }
  func.func @transform_20(%arg0: i32) -> (i32, i32) {
    %c0_i32 = arith.constant 0 : i32
    %c0_i32_0 = arith.constant 0 : i32
    %c0_i32_1 = arith.constant 0 : i32
    return %c0_i32, %c0_i32_0 : i32, i32
  }
  func.func @transform_21(%arg0: i32) -> (i32, i32) {
    %c0_i32 = arith.constant 0 : i32
    %c0_i32_0 = arith.constant 0 : i32
    %c0_i32_1 = arith.constant 0 : i32
    return %c0_i32, %c0_i32_0 : i32, i32
  }
  func.func @transform_22(%arg0: i32) -> (i32, i32) {
    %c0_i32 = arith.constant 0 : i32
    %c0_i32_0 = arith.constant 0 : i32
    %c0_i32_1 = arith.constant 0 : i32
    return %c0_i32, %c0_i32_0 : i32, i32
  }
}

</mosaic_0001>

<bundles_post_ra>
// kernel: tpu_custom_call.1
= control target key start
LH: loop header
LB: loop body
LE: loop exit
PB: predicated region body
PF: predicated region fallthrough
CT: control target
= control target key end

     0   :  { %s9898_s0 = inlined_call_operand.hbm [shape: f32[8,2,16], index: 0, kind: input, shape index: {}]   ;;  %s9899_s1 = inlined_call_operand.hbm [shape: f32[16,192], index: 1, kind: input, shape index: {}]   ;;  %s9900_s2 = inlined_call_operand.hbm [shape: f32[64,128], index: 2, kind: input, shape index: {}]   ;;  %s9901_s3 = inlined_call_operand.hbm [shape: f32[64,64], index: 3, kind: input, shape index: {}]   ;;  %s9902_s4 = inlined_call_operand.hbm [shape: f32[1,192], index: 4, kind: input, shape index: {}]   ;;  %s9903_s5 = inlined_call_operand.hbm [shape: f32[1,64], index: 5, kind: input, shape index: {}]   ;;  %s9904_s6 = inlined_call_operand.vmem [shape: f32[64,192], index: 6, kind: input, shape index: {}]   ;;  %s9905_s7 = inlined_call_operand.hbm [shape: f32[64,128], index: 7, kind: input, shape index: {}]   ;;  %s9906_s8 = inlined_call_operand.hbm [shape: f32[64,64], index: 8, kind: input, shape index: {}]   ;;  %s9907_s9 = inlined_call_operand.hbm [shape: f32[1,192], index: 9, kind: input, shape index: {}]   ;;  %s9908_s10 = inlined_call_operand.hbm [shape: f32[1,64], index: 10, kind: input, shape index: {}]   ;;  %s9909_s11 = inlined_call_operand.hbm [shape: f32[64,192], index: 11, kind: input, shape index: {}]   ;;  %s9910_s12 = inlined_call_operand.vmem [shape: f32[64,128], index: 12, kind: input, shape index: {}]   ;;  %s9911_s13 = inlined_call_operand.hbm [shape: f32[64,64], index: 13, kind: input, shape index: {}]   ;;  %s9912_s14 = inlined_call_operand.hbm [shape: f32[1,192], index: 14, kind: input, shape index: {}]   ;;  %s9913_s15 = inlined_call_operand.hbm [shape: f32[1,64], index: 15, kind: input, shape index: {}]   ;;  %s9914_s16 = inlined_call_operand.vmem [shape: f32[64,32], index: 16, kind: input, shape index: {}]   ;;  %s9915_s17 = inlined_call_operand.hbm [shape: f32[1,32], index: 17, kind: input, shape index: {}]   ;;  %s9916_s18 = inlined_call_operand.hbm [shape: f32[32,64], index: 18, kind: input, shape index: {}]   ;;  %s9917_s19 = inlined_call_operand.hbm [shape: f32[1,64], index: 19, kind: input, shape index: {}]   ;;  %s9918_s20 = inlined_call_operand.vmem [shape: f32[64,9], index: 20, kind: input, shape index: {}]   ;;  %s9919_s21 = inlined_call_operand.vmem [shape: f32[1,9], index: 21, kind: input, shape index: {}]   ;;  %s9920_s22 = inlined_call_operand.hbm [shape: f32[2,8], index: 22, kind: output, shape index: {}]  }
   0x1   :  { %9928 = sst [smem:[#allocation42_spill]] %s9898_s0 }
   0x2   :  { %9929 = sst [smem:[#allocation43_spill]] %s9899_s1 }
   0x3   :  { %9930 = sst [smem:[#allocation44_spill]] %s9900_s2 }
   0x4   :  { %9931 = sst [smem:[#allocation45_spill]] %s9901_s3 }
   0x5   :  { %9932 = sst [smem:[#allocation46_spill]] %s9902_s4 }
   0x6   :  { %9933 = sst [smem:[#allocation47_spill]] %s9903_s5 }
   0x7   :  { %9934 = sst [smem:[#allocation48_spill]] %s9904_s6 }
   0x8   :  { %9935 = sst [smem:[#allocation49_spill]] %s9920_s22 }
   0x9   :  { %27 = vsyncpa [#allocation3], 0 }
   0xa   :  { %28 = vsyncpa [#allocation6], 0 }
   0xb   :  { %29 = vsyncpa [#allocation9], 0 }
   0xc   :  { %30 = vsyncpa [#allocation12], 0 }
   0xd   :  { %31 = vsyncpa [#allocation15], 0 }
   0xe   :  { %32 = vsyncpa [#allocation18], 0 }
   0xf   :  { %33 = vsyncpa [#allocation21], 0 }
  0x10   :  { %34 = vsyncpa [#allocation24], 0 }
  0x11   :  { %35 = vsyncpa [#allocation27], 0 }
  0x12   :  { %36 = vsyncpa [#allocation4], 0  ;;  %s7896_s3 = smov [#allocation5]  }
  0x13   :  { %s54_s28 = sshll.u32 %s7896_s3, 4  ;;  %s55_s28 = int_to_ptr.vmem [resolvable:$true] %s54_s28 }
  0x14   :  { %s7524_s29 = scalar_lea.vmem %s55_s28, 512  ;;  %p7529_p1 = scmp.lt.s32.totalorder %s55_s28, %s55_s28 }
  0x15   :  { %p7525_p0 = scmp.ne.s32.totalorder %s55_s28, %s7524_s29  ;;  %p7530_p2 = scmp.lt.s32.totalorder %s7524_s29, %s7524_s29 }
  0x17   :  { %p7531_p3 = por %p7530_p2, %p7529_p1 }
  0x19   :  { %p7532_p4 = pnand %p7531_p3, %p7525_p0 }
  0x1b   :  { %7535 = shalt.err (!%p7532_p4)
}
  0x1c   :  { %s9922_s30 = smov 256   ;;  %s9923_s4 = smov 16  }
  0x1d   :  { %s9936_s1 = sld [smem:[#allocation43_spill]]  ;;  %s7899_s5 = smov [#allocation8]  }
  0x1e   :  { %s78_s24 = sshll.u32 %s7899_s5, 4  ;;  %s7900_s6 = smov [#allocation11]   ;;  %s79_s24 = int_to_ptr.vmem [resolvable:$true] %s78_s24 }
  0x1f   :  { %s101_s25 = sshll.u32 %s7900_s6, 4  ;;  %s7544_s26 = scalar_lea.vmem %s79_s24, 1024  ;;  %s102_s25 = int_to_ptr.vmem [resolvable:$true] %s101_s25 }
  0x20   :  { %p7545_p5 = scmp.ne.s32.totalorder %s79_s24, %s7544_s26  ;;  %p7549_p6 = scmp.lt.s32.totalorder %s79_s24, %s79_s24 }
  0x21   :  { %p7550_p7 = scmp.lt.s32.totalorder %s7544_s26, %s7544_s26 }
  0x23   :  { %60 = dma.hbm_to_vmem [thread:$0]  %s9936_s1, 512, %s55_s28, [#allocation6], %s9922_s30, %s9922_s30, %s9923_s4  }
  0x24   :  { %p7551_p8 = por %p7550_p7, %p7549_p6 }
  0x26   :  { %p7552_p9 = pnand %p7551_p8, %p7545_p5 }
  0x28   :  { %7555 = shalt.err (!%p7552_p9)
}
  0x29   :  { %s7901_s2 = smov 128   ;;  %s7902_s27 = smov 8  }
  0x2a   :  { %s9937_s28 = sld [smem:[#allocation45_spill]]  ;;  %s7564_s0 = scalar_lea.vmem %s102_s25, 16 }
  0x2b   :  { %p7565_p10 = scmp.ne.s32.totalorder %s102_s25, %s7564_s0  ;;  %s7568_s23 = scalar_lea.vmem %s102_s25, 32 }
  0x2c   :  { %p7569_p11 = scmp.lt.s32.totalorder %s102_s25, %s102_s25  ;;  %p7570_p12 = scmp.lt.s32.totalorder %s7568_s23, %s7564_s0 }
  0x2e   :  { %p7571_p13 = por %p7570_p12, %p7569_p11 }
  0x30   :  { %84 = dma.hbm_to_vmem [thread:$0]  %s9937_s28, 1024, %s79_s24, [#allocation9], %s7901_s2, %s7901_s2, %s7902_s27  }
  0x31   :  { %p7572_p0 = pnand %p7571_p13, %p7565_p10 }
  0x33   :  { %7575 = shalt.err (!%p7572_p0)
}
  0x34   :  { %s9938_s6 = sld [smem:[#allocation47_spill]]  ;;  %s7903_s26 = smov [#allocation14]  }
  0x35   :  { %s124_s30 = sshll.u32 %s7903_s26, 4  ;;  %s7904_s4 = smov [#allocation17]   ;;  %s125_s30 = int_to_ptr.vmem [resolvable:$true] %s124_s30 }
  0x36   :  { %s147_s22 = sshll.u32 %s7904_s4, 4  ;;  %s7584_s3 = scalar_lea.vmem %s125_s30, 1024  ;;  %s148_s22 = int_to_ptr.vmem [resolvable:$true] %s147_s22 }
  0x37   :  { %p7585_p1 = scmp.ne.s32.totalorder %s125_s30, %s7584_s3  ;;  %p7589_p2 = scmp.lt.s32.totalorder %s125_s30, %s125_s30 }
  0x38   :  { %p7590_p3 = scmp.lt.s32.totalorder %s7584_s3, %s7584_s3 }
  0x3a   :  { %104 = dma.hbm_to_vmem [thread:$0]  %s9938_s6, 16, %s102_s25, [#allocation12]  }
  0x3b   :  { %p7591_p4 = por %p7590_p3, %p7589_p2 }
  0x3d   :  { %p7592_p5 = pnand %p7591_p4, %p7585_p1 }
  0x3f   :  { %7595 = shalt.err (!%p7592_p5)
}
  0x40   :  { %130 = dma.hbm_to_vmem [thread:$0]  %s9906_s8, 1024, %s125_s30, [#allocation15], %s7901_s2, %s7901_s2, %s7902_s27  }
  0x41   :  { %s7604_s25 = scalar_lea.vmem %s148_s22, 16  ;;  %s7608_s28 = scalar_lea.vmem %s148_s22, 32 }
  0x42   :  { %p7605_p6 = scmp.ne.s32.totalorder %s148_s22, %s7604_s25  ;;  %p7609_p7 = scmp.lt.s32.totalorder %s148_s22, %s148_s22 }
  0x43   :  { %p7610_p8 = scmp.lt.s32.totalorder %s7608_s28, %s7604_s25 }
  0x45   :  { %p7611_p9 = por %p7610_p8, %p7609_p7 }
  0x47   :  { %p7612_p10 = pnand %p7611_p9, %p7605_p6 }
  0x49   :  { %7615 = shalt.err (!%p7612_p10)
}
  0x4a   :  { %150 = dma.hbm_to_vmem [thread:$0]  %s9908_s10, 16, %s148_s22, [#allocation18]  }
  0x4b   :  { %s7905_s23 = smov [#allocation20]   ;;  %s7906_s5 = smov [#allocation23]  }
  0x4c   :  { %s170_s1 = sshll.u32 %s7905_s23, 4  ;;  %s193_s6 = sshll.u32 %s7906_s5, 4  ;;  %s171_s1 = int_to_ptr.vmem [resolvable:$true] %s170_s1  ;;  %s194_s6 = int_to_ptr.vmem [resolvable:$true] %s193_s6 }
  0x4d   :  { %s7624_s26 = scalar_lea.vmem %s171_s1, 1024  ;;  %p7629_p12 = scmp.lt.s32.totalorder %s171_s1, %s171_s1 }
  0x4e   :  { %p7625_p11 = scmp.ne.s32.totalorder %s171_s1, %s7624_s26  ;;  %p7630_p13 = scmp.lt.s32.totalorder %s7624_s26, %s7624_s26 }
  0x50   :  { %p7631_p0 = por %p7630_p13, %p7629_p12 }
  0x52   :  { %p7632_p1 = pnand %p7631_p0, %p7625_p11 }
  0x54   :  { %7635 = shalt.err (!%p7632_p1)
}
  0x55   :  { %176 = dma.hbm_to_vmem [thread:$0]  %s9911_s13, 1024, %s171_s1, [#allocation21], %s7901_s2, %s7901_s2, %s7902_s27  }
  0x56   :  { %s7644_s10 = scalar_lea.vmem %s194_s6, 16  ;;  %s7648_s22 = scalar_lea.vmem %s194_s6, 32 }
  0x57   :  { %p7645_p2 = scmp.ne.s32.totalorder %s194_s6, %s7644_s10  ;;  %p7649_p3 = scmp.lt.s32.totalorder %s194_s6, %s194_s6 }
  0x58   :  { %p7650_p4 = scmp.lt.s32.totalorder %s7648_s22, %s7644_s10 }
  0x5a   :  { %p7651_p5 = por %p7650_p4, %p7649_p3 }
  0x5c   :  { %p7652_p6 = pnand %p7651_p5, %p7645_p2 }
  0x5e   :  { %7655 = shalt.err (!%p7652_p6)
}
  0x5f   :  { %196 = dma.hbm_to_vmem [thread:$0]  %s9913_s15, 16, %s194_s6, [#allocation24]  }
  0x60   :  { %s7907_s29 = smov [#allocation26]   ;;  %s7908_s28 = smov [#allocation2]  }
  0x61   :  { %s214_s25 = sshll.u32 %s7907_s29, 4  ;;  %s42_s4 = sshll.u32 %s7908_s28, 4  ;;  %s215_s25 = int_to_ptr.vmem [resolvable:$true] %s214_s25  ;;  %s43_s4 = int_to_ptr.vmem [resolvable:$true] %s42_s4 }
  0x62   :  { %s7664_s0 = scalar_lea.vmem %s215_s25, 512  ;;  %p7669_p8 = scmp.lt.s32.totalorder %s215_s25, %s215_s25 }
  0x63   :  { %p7665_p7 = scmp.ne.s32.totalorder %s215_s25, %s7664_s0  ;;  %p7670_p9 = scmp.lt.s32.totalorder %s7664_s0, %s7664_s0 }
  0x65   :  { %p7671_p10 = por %p7670_p9, %p7669_p8 }
  0x67   :  { %p7672_p11 = pnand %p7671_p10, %p7665_p7 }
  0x69   :  { %7675 = shalt.err (!%p7672_p11)
}
  0x6a   :  { %220 = dma.hbm_to_vmem [thread:$0]  %s9916_s18, 512, %s215_s25, [#allocation27], %s7901_s2, %s7901_s2, %s7902_s27  }
  0x6b   :  { %s7684_s15 = scalar_lea.vmem %s43_s4, 256  ;;  %p7689_p13 = scmp.lt.s32.totalorder %s43_s4, %s43_s4 }
  0x6c   :  { %p7685_p12 = scmp.ne.s32.totalorder %s43_s4, %s7684_s15  ;;  %p7690_p0 = scmp.lt.s32.totalorder %s7684_s15, %s7684_s15 }
  0x6e   :  { %p7691_p1 = por %p7690_p0, %p7689_p13 }
  0x70   :  { %p7692_p2 = pnand %p7691_p1, %p7685_p12 }
  0x72   :  { %7695 = shalt.err (!%p7692_p2)
}
  0x73   :  { %s7909_s1 = smov 32   ;;  %s7910_s5 = smov 2  }
  0x74   :  { %s9939_s8 = sld [smem:[#allocation42_spill]]  ;;  %s7911_s30 = smov [#allocation7]  }
  0x75   :  { %s66_s10 = sshll.u32 %s7911_s30, 4  ;;  %s7912_s22 = smov [#allocation10]   ;;  %s67_s10 = int_to_ptr.vmem [resolvable:$true] %s66_s10 }
  0x76   :  { %s91_s3 = sshll.u32 %s7912_s22, 4  ;;  %s7704_s18 = scalar_lea.vmem %s67_s10, 1024  ;;  %s92_s3 = int_to_ptr.vmem [resolvable:$true] %s91_s3 }
  0x77   :  { %p7705_p3 = scmp.ne.s32.totalorder %s67_s10, %s7704_s18  ;;  %p7709_p4 = scmp.lt.s32.totalorder %s67_s10, %s67_s10 }
  0x78   :  { %p7710_p5 = scmp.lt.s32.totalorder %s7704_s18, %s7704_s18 }
  0x7a   :  { %48 = dma.hbm_to_vmem [thread:$0]  %s9939_s8, 256, %s43_s4, [#allocation3], %s7909_s1, %s7909_s1, %s7910_s5  }
  0x7b   :  { %p7711_p6 = por %p7710_p5, %p7709_p4 }
  0x7d   :  { %p7712_p7 = pnand %p7711_p6, %p7705_p3 }
  0x7f   :  { %7715 = shalt.err (!%p7712_p7)
}
  0x80   :  { %s9940_s25 = sld [smem:[#allocation44_spill]]  ;;  %s7724_s28 = scalar_lea.vmem %s92_s3, 32 }
  0x81   :  { %p7725_p8 = scmp.ne.s32.totalorder %s92_s3, %s7724_s28  ;;  %p7729_p9 = scmp.lt.s32.totalorder %s92_s3, %s92_s3 }
  0x82   :  { %p7730_p10 = scmp.lt.s32.totalorder %s7724_s28, %s7724_s28 }
  0x84   :  { %p7731_p11 = por %p7730_p10, %p7729_p9 }
  0x86   :  { %72 = dma.hbm_to_vmem [thread:$0]  %s9940_s25, 1024, %s67_s10, [#allocation6], %s7901_s2, %s7901_s2, %s7902_s27  }
  0x87   :  { %p7732_p12 = pnand %p7731_p11, %p7725_p8 }
  0x89   :  { %7735 = shalt.err (!%p7732_p12)
}
  0x8a   :  { %s9941_s13 = sld [smem:[#allocation46_spill]]  ;;  %s7913_s23 = smov [#allocation13]  }
  0x8b   :  { %s112_s15 = sshll.u32 %s7913_s23, 4  ;;  %s7914_s1 = smov [#allocation16]   ;;  %s113_s15 = int_to_ptr.vmem [resolvable:$true] %s112_s15 }
  0x8c   :  { %s137_s5 = sshll.u32 %s7914_s1, 4  ;;  %s7744_s6 = scalar_lea.vmem %s113_s15, 1024  ;;  %s138_s5 = int_to_ptr.vmem [resolvable:$true] %s137_s5 }
  0x8d   :  { %p7745_p13 = scmp.ne.s32.totalorder %s113_s15, %s7744_s6  ;;  %p7749_p0 = scmp.lt.s32.totalorder %s113_s15, %s113_s15 }
  0x8e   :  { %p7750_p1 = scmp.lt.s32.totalorder %s7744_s6, %s7744_s6 }
  0x90   :  { %94 = dma.hbm_to_vmem [thread:$0]  %s9941_s13, 32, %s92_s3, [#allocation9]  }
  0x91   :  { %p7751_p2 = por %p7750_p1, %p7749_p0 }
  0x93   :  { %p7752_p3 = pnand %p7751_p2, %p7745_p13 }
  0x95   :  { %7755 = shalt.err (!%p7752_p3)
}
  0x96   :  { %118 = dma.hbm_to_vmem [thread:$0]  %s9905_s7, 1024, %s113_s15, [#allocation12], %s7901_s2, %s7901_s2, %s7902_s27  }
  0x97   :  { %s7764_s30 = scalar_lea.vmem %s138_s5, 32  ;;  %p7769_p5 = scmp.lt.s32.totalorder %s138_s5, %s138_s5 }
  0x98   :  { %p7765_p4 = scmp.ne.s32.totalorder %s138_s5, %s7764_s30  ;;  %p7770_p6 = scmp.lt.s32.totalorder %s7764_s30, %s7764_s30 }
  0x9a   :  { %p7771_p7 = por %p7770_p6, %p7769_p5 }
  0x9c   :  { %p7772_p8 = pnand %p7771_p7, %p7765_p4 }
  0x9e   :  { %7775 = shalt.err (!%p7772_p8)
}
  0x9f   :  { %140 = dma.hbm_to_vmem [thread:$0]  %s9907_s9, 32, %s138_s5, [#allocation15]  }
  0xa0   :  { %s7915_s3 = smov [#allocation19]   ;;  %s7916_s24 = smov [#allocation22]  }
  0xa1   :  { %s156_s18 = sshll.u32 %s7915_s3, 4  ;;  %s183_s29 = sshll.u32 %s7916_s24, 4  ;;  %s157_s18 = int_to_ptr.vmem [resolvable:$true] %s156_s18  ;;  %s184_s29 = int_to_ptr.vmem [resolvable:$true] %s183_s29 }
  0xa2   :  { %s7784_s25 = scalar_lea.vmem %s157_s18, 2048  ;;  %p7789_p10 = scmp.lt.s32.totalorder %s157_s18, %s157_s18 }
  0xa3   :  { %p7785_p9 = scmp.ne.s32.totalorder %s157_s18, %s7784_s25  ;;  %p7790_p11 = scmp.lt.s32.totalorder %s7784_s25, %s7784_s25 }
  0xa5   :  { %p7791_p12 = por %p7790_p11, %p7789_p10 }
  0xa7   :  { %p7792_p13 = pnand %p7791_p12, %p7785_p9 }
  0xa9   :  { %7795 = shalt.err (!%p7792_p13)
}
  0xaa   :  { %s9942_s7 = smov 16   ;;  %s9943_s2 = smov 256  }
  0xab   :  { %162 = dma.hbm_to_vmem [thread:$0]  %s9909_s11, 2048, %s157_s18, [#allocation18], %s9943_s2, %s9943_s2, %s9942_s7  }
  0xac   :  { %s7804_s9 = scalar_lea.vmem %s184_s29, 32  ;;  %p7809_p1 = scmp.lt.s32.totalorder %s184_s29, %s184_s29 }
  0xad   :  { %p7805_p0 = scmp.ne.s32.totalorder %s184_s29, %s7804_s9  ;;  %p7810_p2 = scmp.lt.s32.totalorder %s7804_s9, %s7804_s9 }
  0xaf   :  { %p7811_p3 = por %p7810_p2, %p7809_p1 }
  0xb1   :  { %p7812_p4 = pnand %p7811_p3, %p7805_p0 }
  0xb3   :  { %7815 = shalt.err (!%p7812_p4)
}
  0xb4   :  { %186 = dma.hbm_to_vmem [thread:$0]  %s9912_s14, 32, %s184_s29, [#allocation21]  }
  0xb5   :  { %s7917_s13 = smov [#allocation25]   ;;  %s7918_s15 = smov [#allocation28]  }
  0xb6   :  { %s205_s23 = sshll.u32 %s7917_s13, 4  ;;  %s227_s1 = sshll.u32 %s7918_s15, 4  ;;  %s206_s23 = int_to_ptr.vmem [resolvable:$true] %s205_s23  ;;  %s228_s1 = int_to_ptr.vmem [resolvable:$true] %s227_s1 }
  0xb7   :  { %s7824_s5 = scalar_lea.vmem %s206_s23, 16  ;;  %s7828_s11 = scalar_lea.vmem %s206_s23, 32 }
  0xb8   :  { %p7825_p5 = scmp.ne.s32.totalorder %s206_s23, %s7824_s5  ;;  %p7829_p6 = scmp.lt.s32.totalorder %s206_s23, %s206_s23 }
  0xb9   :  { %p7830_p7 = scmp.lt.s32.totalorder %s7828_s11, %s7824_s5 }
  0xbb   :  { %p7831_p8 = por %p7830_p7, %p7829_p6 }
  0xbd   :  { %p7832_p9 = pnand %p7831_p8, %p7825_p5 }
  0xbf   :  { %7835 = shalt.err (!%p7832_p9)
}
  0xc0   :  { %208 = dma.hbm_to_vmem [thread:$0]  %s9915_s17, 16, %s206_s23, [#allocation24]  }
  0xc1   :  { %s7844_s8 = scalar_lea.vmem %s228_s1, 16  ;;  %s7848_s14 = scalar_lea.vmem %s228_s1, 32 }
  0xc2   :  { %p7845_p10 = scmp.ne.s32.totalorder %s228_s1, %s7844_s8  ;;  %p7849_p11 = scmp.lt.s32.totalorder %s228_s1, %s228_s1 }
  0xc3   :  { %p7850_p12 = scmp.lt.s32.totalorder %s7848_s14, %s7844_s8 }
  0xc5   :  { %p7851_p13 = por %p7850_p12, %p7849_p11 }
  0xc7   :  { %p7852_p0 = pnand %p7851_p13, %p7845_p10 }
  0xc9   :  { %7855 = shalt.err (!%p7852_p0)
}
  0xca   :  { %230 = dma.hbm_to_vmem [thread:$0]  %s9917_s19, 16, %s228_s1, [#allocation27]  }
  0xcb   :  { %7876 = dma.done.wait [#allocation3], 256  }
  0xcc   :  { %7877 = vsyncadd [#allocation3], 4294967040 }
  0xcd   :  { %7878 = dma.done.wait [#allocation6], 1536  }
  0xce   :  { %7879 = vsyncadd [#allocation6], 4294965760 }
  0xcf   :  { %7880 = dma.done.wait [#allocation9], 1056  }
  0xd0   :  { %7881 = vsyncadd [#allocation9], 4294966240 }
  0xd1   :  { %7882 = dma.done.wait [#allocation12], 1040  }
  0xd2   :  { %7883 = vsyncadd [#allocation12], 4294966256 }
  0xd3   :  { %7884 = dma.done.wait [#allocation15], 1056  }
  0xd4   :  { %7885 = vsyncadd [#allocation15], 4294966240 }
  0xd5   :  { %7886 = dma.done.wait [#allocation18], 2064  }
  0xd6   :  { %7887 = vsyncadd [#allocation18], 4294965232 }
  0xd7   :  { %7888 = dma.done.wait [#allocation21], 1056  }
  0xd8   :  { %7889 = vsyncadd [#allocation21], 4294966240 }
  0xd9   :  { %7890 = dma.done.wait [#allocation24], 32  }
  0xda   :  { %7891 = vsyncadd [#allocation24], 4294967264 }
  0xdb   :  { %7892 = dma.done.wait [#allocation27], 528  }
  0xdc   :  { %7893 = vsyncadd [#allocation27], 4294966768  ;;  %v9924_v0 = vmov 0.0   ;;  %v8116_v1 = vld [vmem:[#allocation5 + $0x18] sm:$0xff]  ;;  %v8118_v2 = vld [vmem:[#allocation5 + $0x10] sm:$0xff]  ;;  %vm340_vm0 = vcmask 130048   ;;  %v323_v6 = vlaneseq }
  0xdd   :  { %408 = vmatprep.mubr.f32.mxu0 %v9924_v0  ;;  %6471 = vmatprep.subr.mxu1 %v9924_v0  ;;  %v8120_v3 = vld [vmem:[#allocation5 + $0x8] sm:$0xff]  ;;  %v8123_v4 = vld [vmem:[#allocation5] sm:$0xff]  ;;  %v286_v5 = vld [vmem:[#allocation2] sm:$0x3]  ;;  %s7920_s17 = smov 64   ;;  %vm7921_vm1 = vmmov 0  }
  0xde   :  { %372 = vmatprep.subr.mxu0 %v8116_v1  ;;  %v324_v7 = vshrl.u32 %v323_v6, 7  ;;  %v321_v9 = vld [vmem:[#allocation10] sm:$0x3]  ;;  %v8146_v18 = vld [vmem:[#allocation11] ss:$0 sm:$0xff]  ;;  %v8153_v25 = vld [vmem:[#allocation7 + $0x38] sm:$0xff]  ;;  %6487 = vmatprep.mubr.msk.f32.mxu1 %vm7921_vm1, %v9924_v0 }
  0xdf   :  { %373 = vmatpush1.msra.mxu0 %v8118_v2  ;;  %v288_v24 = vld [vmem:[#allocation2 + $0x2] sm:$0x3]  ;;  %v8155_v26 = vld [vmem:[#allocation8 + $0x38] sm:$0xff]  ;;  %v8165_v29 = vld [vmem:[#allocation8 + $0x28] sm:$0xff]  ;;  %vm507_vm2 = vcmask 523264   ;;  %s9946_s3 = sld [smem:[#allocation48_spill]] }
  0xe0   :  { %374 = vmatprep.subr.mxu0 %v8120_v3  ;;  %v8135_v8 = vsub.s32 0, %v324_v7  ;;  %v8141_v16 = vsub.s32 1, %v324_v7  ;;  %6472 = vmatpush3.msra.mxu1 %v8155_v26  ;;  %v8159_v27 = vld [vmem:[#allocation7 + $0x30] sm:$0xff]  ;;  %v8169_v30 = vld [vmem:[#allocation7 + $0x28] sm:$0xff]  ;;  %v8173_v31 = vld [vmem:[#allocation8 + $0x20] sm:$0xff]  ;;  %vm5752_vm3 = vcmask 261120  }
  0xe1   :  { %375 = vmatpush1.msra.mxu0 %v8123_v4  ;;  %v8161_v28 = vld [vmem:[#allocation8 + $0x30] sm:$0xff]  ;;  %6473 = vmatprep.subr.mxu1 %v9924_v0  ;;  %v8177_v32 = vld [vmem:[#allocation7 + $0x20] sm:$0xff]  ;;  %v8181_v33 = vld [vmem:[#allocation8 + $0x18] sm:$0xff]  ;;  %vm5921_vm4 = vcmask 58368  }
  0xe2   :  { %5953 = vmatmul.mubr.msk.f32.vlgmr.msra.gmra.mxu0 %vm340_vm0, %v286_v5  ;;  %461 = vmatprep.subr.mxu0 %v8116_v1  ;;  %9944 = vst [vmem:[#allocation40_spill] sm:$0xff] %v8135_v8  ;;  %v8138_v10 = vrot.slane %v321_v9, %v8135_v8  ;;  %9945 = vst [vmem:[#allocation41_spill] sm:$0xff] %v8141_v16  ;;  %v8144_v17 = vrot.slane %v321_v9, %v8141_v16  ;;  %v8185_v34 = vld [vmem:[#allocation7 + $0x18] sm:$0xff]  ;;  %v8191_v35 = vld [vmem:[#allocation7 + $0x10] sm:$0xff] }
  0xe3   :  { %462 = vmatpush1.msra.mxu0 %v8118_v2  ;;  %497 = vmatprep.mubr.f32.mxu0 %v9924_v0  ;;  %v8193_v36 = vld [vmem:[#allocation8 + $0x10] sm:$0xff]  ;;  %v8199_v38 = vld [vmem:[#allocation7 + $0x8] sm:$0xff]  ;;  %v8207_v40 = vld [vmem:[#allocation7] sm:$0xff] }
  0xe4   :  { %463 = vmatprep.subr.mxu0 %v8120_v3  ;;  %6474 = vmatpush3.msra.mxu1 %v8161_v28  ;;  %v8201_v39 = vld [vmem:[#allocation8 + $0x8] sm:$0xff]  ;;  %v8211_v41 = vld [vmem:[#allocation8] sm:$0xff]  ;;  %v290_v62 = vld [vmem:[#allocation2 + $0x4] sm:$0x3] }
  0xe5   :  { %464 = vmatpush1.msra.mxu0 %v8123_v4  ;;  %6475 = vmatprep.subr.mxu1 %v9924_v0 }
  0xe6   :  { %6452 = vmatprep.subr.mxu0 %v9924_v0  ;;  %5955 = vmatmul.mubr.msk.f32.vlgmr.msra.gmra.mxu0 %vm340_vm0, %v288_v24 }
  0xe7   :  { %6453 = vmatpush3.msra.mxu0 %v8153_v25  ;;  %6476 = vmatpush3.msra.mxu1 %v8165_v29 }
  0xe8   :  { %6454 = vmatprep.subr.mxu0 %v9924_v0  ;;  %6477 = vmatprep.subr.mxu1 %v9924_v0 }
  0xe9   :  { %6455 = vmatpush3.msra.mxu0 %v8159_v27  ;;  %6478 = vmatpush3.msra.mxu1 %v8173_v31 }
  0xea   :  { %6456 = vmatprep.subr.mxu0 %v9924_v0  ;;  %6479 = vmatprep.subr.mxu1 %v9924_v0 }
  0xeb   :  { %6457 = vmatpush3.msra.mxu0 %v8169_v30  ;;  %6480 = vmatpush3.msra.mxu1 %v8181_v33 }
  0xec   :  { %6458 = vmatprep.subr.mxu0 %v9924_v0  ;;  %6481 = vmatprep.subr.mxu1 %v9924_v0 }
  0xed   :  { %6459 = vmatpush3.msra.mxu0 %v8177_v32  ;;  %6482 = vmatpush3.msra.mxu1 %v8193_v36 }
  0xee   :  { %6460 = vmatprep.subr.mxu0 %v9924_v0  ;;  %6483 = vmatprep.subr.mxu1 %v9924_v0 }
  0xef   :  { %6461 = vmatpush3.msra.mxu0 %v8185_v34  ;;  %6484 = vmatpush3.msra.mxu1 %v8201_v39 }
  0xf0   :  { %6462 = vmatprep.subr.mxu0 %v9924_v0  ;;  %6485 = vmatprep.subr.mxu1 %v9924_v0 }
  0xf1   :  { %6463 = vmatpush3.msra.mxu0 %v8191_v35  ;;  %6468 = vmatprep.mubr.msk.f32.mxu0 %vm7921_vm1, %v9924_v0 }
  0xf2   :  { %6464 = vmatprep.subr.mxu0 %v9924_v0  ;;  %6486 = vmatpush3.msra.mxu1 %v8211_v41 }
  0xf3   :  { %6465 = vmatpush3.msra.mxu0 %v8199_v38  ;;  %6490 = vmatprep.subr.mxu1 %v9924_v0 }
  0xf4   :  { %6466 = vmatprep.subr.mxu0 %v9924_v0 }
  0xf5   :  { %6467 = vmatpush3.msra.mxu0 %v8207_v40 }
  0xf6   :  { %699 = vmatprep.subr.mxu0 %v8116_v1 }
 0x1a2   :  { %v410_v11 = vpop.f32.mrf.mxu0 }
 0x1a3   :  { %v411_v12 = vadd.f32 %v410_v11, %v8138_v10 }
 0x1a4   :  { %v412_v19 = vpop.f32.mrf.mxu0 }
 0x1a5   :  { %v5954_v13 = vmul.f32 -1.442695, %v411_v12  ;;  %v413_v21 = vadd.f32 %v412_v19, %v8144_v17 }
 0x1a6   :  { %v499_v46 = vpop.f32.mrf.mxu0 }
 0x1a7   :  { %7329 = vpow2.f32 %v5954_v13  ;;  %v500_v48 = vadd.f32 %v499_v46, %v8138_v10 }
 0x1a8   :  { %v501_v47 = vpop.f32.mrf.mxu0 }
 0x1a9   :  { %v502_v59 = vadd.f32 %v501_v47, %v8144_v17 }
 0x1b4   :  { %v7330_v14 = vpop.eup %7329 }
 0x1b5   :  { %v418_v15 = vadd.f32 1.0, %v7330_v14 }
 0x1b7   :  { %7331 = vrcp.f32 %v418_v15 }
 0x1c4   :  { %v8148_v20 = vpop.eup %7331 }
 0x1c5   :  { %v421_v22 = vmul.f32 %v8148_v20, %v8146_v18  ;;  %v424_v42 = vsub.f32 1.0, %v8148_v20 }
 0x1c7   :  { %v422_v23 = vadd.f32 %v421_v22, %v413_v21 }
 0x1c9   :  { %7333 = vtanh.f32 %v422_v23 }
 0x1d6   :  { %v7334_v37 = vpop.eup %7333 }
 0x1d7   :  { %426 = vrot.lane.b32.xlu0 %v7334_v37, %s7920_s17 }
 0x249   :  { %v427_v43 = vpop.permute.xlu0 %426 }
 0x24a   :  { %v8224_v44 = vmul.f32 %v427_v43, %v424_v42 }
 0x24c   :  { %505 = vrot.lane.b32.xlu0 %v8224_v44, %s7920_s17 }
 0x2be   :  { %v8228_v45 = vpop.permute.xlu0 %505 }
 0x2bf   :  { %6469 = vmatmul.mubr.msk.f32.vlgmr.msra.gmra.mxu0 %vm507_vm2, %v8228_v45  ;;  %6488 = vmatmul.mubr.msk.f32.vlgmr.msra.gmra.mxu1 %vm507_vm2, %v8228_v45 }
 0x2c0   :  { %700 = vmatpush1.msra.mxu0 %v8118_v2  ;;  %735 = vmatprep.mubr.f32.mxu0 %v9924_v0 }
 0x2c1   :  { %701 = vmatprep.subr.mxu0 %v8120_v3  ;;  %6491 = vmatpush3.msra.mxu1 %v8153_v25 }
 0x2c2   :  { %702 = vmatpush1.msra.mxu0 %v8123_v4  ;;  %6492 = vmatprep.subr.mxu1 %v9924_v0 }
 0x2c3   :  { %6509 = vmatprep.subr.mxu0 %v9924_v0  ;;  %6493 = vmatpush3.msra.mxu1 %v8159_v27 }
 0x2c4   :  { %6494 = vmatprep.subr.mxu1 %v9924_v0  ;;  %6506 = vmatprep.mubr.msk.f32.mxu1 %vm7921_vm1, %v9924_v0 }
 0x2c5   :  { %6495 = vmatpush3.msra.mxu1 %v8169_v30  ;;  %5959 = vmatmul.mubr.msk.f32.vlgmr.msra.gmra.mxu0 %vm340_vm0, %v290_v62 }
 0x2c6   :  { %6496 = vmatprep.subr.mxu1 %v9924_v0  ;;  %6510 = vmatpush3.msra.mxu0 %v8155_v26 }
 0x2c7   :  { %6497 = vmatpush3.msra.mxu1 %v8177_v32  ;;  %6525 = vmatprep.mubr.msk.f32.mxu0 %vm7921_vm1, %v9924_v0 }
 0x2c8   :  { %6498 = vmatprep.subr.mxu1 %v9924_v0  ;;  %6511 = vmatprep.subr.mxu0 %v9924_v0 }
 0x2c9   :  { %6499 = vmatpush3.msra.mxu1 %v8185_v34  ;;  %6512 = vmatpush3.msra.mxu0 %v8161_v28 }
 0x2ca   :  { %6500 = vmatprep.subr.mxu1 %v9924_v0  ;;  %6513 = vmatprep.subr.mxu0 %v9924_v0 }
 0x2cb   :  { %6501 = vmatpush3.msra.mxu1 %v8191_v35  ;;  %6514 = vmatpush3.msra.mxu0 %v8165_v29 }
 0x2cc   :  { %6502 = vmatprep.subr.mxu1 %v9924_v0  ;;  %6515 = vmatprep.subr.mxu0 %v9924_v0 }
 0x2cd   :  { %6503 = vmatpush3.msra.mxu1 %v8199_v38  ;;  %6516 = vmatpush3.msra.mxu0 %v8173_v31 }
 0x2ce   :  { %6504 = vmatprep.subr.mxu1 %v9924_v0  ;;  %6517 = vmatprep.subr.mxu0 %v9924_v0 }
 0x2cf   :  { %6505 = vmatpush3.msra.mxu1 %v8207_v40  ;;  %6518 = vmatpush3.msra.mxu0 %v8181_v33 }
 0x2d0   :  { %936 = vmatprep.subr.mxu1 %v8116_v1  ;;  %6519 = vmatprep.subr.mxu0 %v9924_v0 }
 0x2d1   :  { %6520 = vmatpush3.msra.mxu0 %v8193_v36 }
 0x2d2   :  { %6521 = vmatprep.subr.mxu0 %v9924_v0 }
 0x2d3   :  { %6522 = vmatpush3.msra.mxu0 %v8201_v39 }
 0x2d4   :  { %6523 = vmatprep.subr.mxu0 %v9924_v0 }
 0x2d5   :  { %6524 = vmatpush3.msra.mxu0 %v8211_v41 }
 0x2d6   :  { %6528 = vmatprep.subr.mxu0 %v9924_v0 }
 0x37f   :  { %v576_v49 = vpop.f32.mrf.mxu0  ;;  %v653_v50 = vpop.f32.mrf.mxu1 }
 0x380   :  { %v580_v51 = vadd.f32 %v576_v49, %v500_v48  ;;  %v654_v57 = vadd.f32 %v8146_v18, %v653_v50  ;;  %v292_v49 = vld [vmem:[#allocation2 + $0x6] sm:$0x3] }
 0x381   :  { %v6470_v52 = vpop.f32.mrf.mxu0  ;;  %v6489_v53 = vpop.f32.mrf.mxu1 }
 0x382   :  { %v5957_v54 = vmul.f32 -1.442695, %v580_v51 }
 0x384   :  { %7335 = vpow2.f32 %v5957_v54 }
 0x385   :  { %v737_v13 = vpop.f32.mrf.mxu0 }
 0x386   :  { %v738_v15 = vadd.f32 %v737_v13, %v8138_v10 }
 0x387   :  { %v739_v14 = vpop.f32.mrf.mxu0 }
 0x388   :  { %v740_v46 = vadd.f32 %v739_v14, %v8144_v17 }
 0x391   :  { %v7336_v55 = vpop.eup %7335 }
 0x392   :  { %v584_v56 = vadd.f32 1.0, %v7336_v55 }
 0x394   :  { %7337 = vrcp.f32 %v584_v56 }
 0x3a1   :  { %v7338_v58 = vpop.eup %7337 }
 0x3a2   :  { %v657_v60 = vmul.f32 %v7338_v58, %v654_v57  ;;  %v660_v5 = vsub.f32 1.0, %v7338_v58  ;;  %v666_v7 = vmul.f32 %v7338_v58, %v8224_v44 }
 0x3a4   :  { %v658_v61 = vadd.f32 %v657_v60, %v502_v59 }
 0x3a6   :  { %7339 = vtanh.f32 %v658_v61 }
 0x3b3   :  { %v7340_v63 = vpop.eup %7339 }
 0x3b4   :  { %662 = vrot.lane.b32.xlu1 %v7340_v63, %s7920_s17 }
 0x426   :  { %v663_v6 = vpop.permute.xlu1 %662 }
 0x427   :  { %v665_v9 = vmul.f32 %v663_v6, %v660_v5 }
 0x429   :  { %v8281_v11 = vadd.f32 %v666_v7, %v665_v9 }
 0x42b   :  { %743 = vrot.lane.b32.xlu1 %v8281_v11, %s7920_s17 }
 0x49d   :  { %v8285_v12 = vpop.permute.xlu1 %743 }
 0x49e   :  { %6507 = vmatmul.mubr.msk.f32.vlgmr.msra.gmra.mxu1 %vm507_vm2, %v8285_v12  ;;  %6526 = vmatmul.mubr.msk.f32.vlgmr.msra.gmra.mxu0 %vm507_vm2, %v8285_v12 }
 0x49f   :  { %937 = vmatpush1.msra.mxu1 %v8118_v2  ;;  %972 = vmatprep.mubr.f32.mxu1 %v9924_v0 }
 0x4a0   :  { %938 = vmatprep.subr.mxu1 %v8120_v3  ;;  %6529 = vmatpush3.msra.mxu0 %v8153_v25 }
 0x4a1   :  { %939 = vmatpush1.msra.mxu1 %v8123_v4  ;;  %6530 = vmatprep.subr.mxu0 %v9924_v0 }
 0x4a2   :  { %6547 = vmatprep.subr.mxu1 %v9924_v0  ;;  %6531 = vmatpush3.msra.mxu0 %v8159_v27 }
 0x4a3   :  { %6532 = vmatprep.subr.mxu0 %v9924_v0  ;;  %6544 = vmatprep.mubr.msk.f32.mxu0 %vm7921_vm1, %v9924_v0 }
 0x4a4   :  { %6533 = vmatpush3.msra.mxu0 %v8169_v30  ;;  %5963 = vmatmul.mubr.msk.f32.vlgmr.msra.gmra.mxu1 %vm340_vm0, %v292_v49 }
 0x4a5   :  { %6534 = vmatprep.subr.mxu0 %v9924_v0  ;;  %6548 = vmatpush3.msra.mxu1 %v8155_v26 }
 0x4a6   :  { %6535 = vmatpush3.msra.mxu0 %v8177_v32  ;;  %6563 = vmatprep.mubr.msk.f32.mxu1 %vm7921_vm1, %v9924_v0 }
 0x4a7   :  { %6536 = vmatprep.subr.mxu0 %v9924_v0  ;;  %6549 = vmatprep.subr.mxu1 %v9924_v0 }
 0x4a8   :  { %6537 = vmatpush3.msra.mxu0 %v8185_v34  ;;  %6550 = vmatpush3.msra.mxu1 %v8161_v28 }
 0x4a9   :  { %6538 = vmatprep.subr.mxu0 %v9924_v0  ;;  %6551 = vmatprep.subr.mxu1 %v9924_v0 }
 0x4aa   :  { %6539 = vmatpush3.msra.mxu0 %v8191_v35  ;;  %6552 = vmatpush3.msra.mxu1 %v8165_v29 }
 0x4ab   :  { %6540 = vmatprep.subr.mxu0 %v9924_v0  ;;  %6553 = vmatprep.subr.mxu1 %v9924_v0 }
 0x4ac   :  { %6541 = vmatpush3.msra.mxu0 %v8199_v38  ;;  %6554 = vmatpush3.msra.mxu1 %v8173_v31 }
 0x4ad   :  { %6542 = vmatprep.subr.mxu0 %v9924_v0  ;;  %6555 = vmatprep.subr.mxu1 %v9924_v0 }
 0x4ae   :  { %6543 = vmatpush3.msra.mxu0 %v8207_v40  ;;  %6556 = vmatpush3.msra.mxu1 %v8181_v33 }
 0x4af   :  { %1173 = vmatprep.subr.mxu0 %v8116_v1  ;;  %6557 = vmatprep.subr.mxu1 %v9924_v0 }
 0x4b0   :  { %6558 = vmatpush3.msra.mxu1 %v8193_v36 }
 0x4b1   :  { %6559 = vmatprep.subr.mxu1 %v9924_v0 }
 0x4b2   :  { %6560 = vmatpush3.msra.mxu1 %v8201_v39 }
 0x4b3   :  { %6561 = vmatprep.subr.mxu1 %v9924_v0 }
 0x4b4   :  { %6562 = vmatpush3.msra.mxu1 %v8211_v41 }
 0x4b5   :  { %6566 = vmatprep.subr.mxu1 %v9924_v0 }
 0x55e   :  { %v813_v19 = vpop.f32.mrf.mxu1  ;;  %v890_v20 = vpop.f32.mrf.mxu0 }
 0x55f   :  { %v817_v21 = vadd.f32 %v813_v19, %v738_v15  ;;  %v891_v43 = vadd.f32 %v8146_v18, %v890_v20  ;;  %v294_v20 = vld [vmem:[#allocation2 + $0x8] sm:$0x3] }
 0x560   :  { %v6508_v22 = vpop.f32.mrf.mxu1  ;;  %v6527_v23 = vpop.f32.mrf.mxu0 }
 0x561   :  { %v5961_v24 = vmul.f32 -1.442695, %v817_v21 }
 0x563   :  { %7341 = vpow2.f32 %v5961_v24 }
 0x564   :  { %v974_v57 = vpop.f32.mrf.mxu1 }
 0x565   :  { %v975_v59 = vadd.f32 %v974_v57, %v8138_v10 }
 0x566   :  { %v976_v58 = vpop.f32.mrf.mxu1 }
 0x567   :  { %v977_v14 = vadd.f32 %v976_v58, %v8144_v17 }
 0x570   :  { %v7342_v37 = vpop.eup %7341 }
 0x571   :  { %v821_v42 = vadd.f32 1.0, %v7342_v37 }
 0x573   :  { %7343 = vrcp.f32 %v821_v42 }
 0x580   :  { %v7344_v44 = vpop.eup %7343 }
 0x581   :  { %v894_v47 = vmul.f32 %v7344_v44, %v891_v43  ;;  %v897_v51 = vsub.f32 1.0, %v7344_v44  ;;  %v903_v53 = vmul.f32 %v7344_v44, %v8281_v11 }
 0x583   :  { %v895_v48 = vadd.f32 %v894_v47, %v740_v46 }
 0x585   :  { %7345 = vtanh.f32 %v895_v48 }
 0x592   :  { %v7346_v50 = vpop.eup %7345 }
 0x593   :  { %899 = vrot.lane.b32.xlu0 %v7346_v50, %s7920_s17 }
 0x605   :  { %v900_v52 = vpop.permute.xlu0 %899 }
 0x606   :  { %v902_v54 = vmul.f32 %v900_v52, %v897_v51 }
 0x608   :  { %v8338_v55 = vadd.f32 %v903_v53, %v902_v54 }
 0x60a   :  { %980 = vrot.lane.b32.xlu1 %v8338_v55, %s7920_s17 }
 0x67c   :  { %v8342_v56 = vpop.permute.xlu1 %980 }
 0x67d   :  { %6545 = vmatmul.mubr.msk.f32.vlgmr.msra.gmra.mxu0 %vm507_vm2, %v8342_v56  ;;  %6564 = vmatmul.mubr.msk.f32.vlgmr.msra.gmra.mxu1 %vm507_vm2, %v8342_v56 }
 0x67e   :  { %1174 = vmatpush1.msra.mxu0 %v8118_v2  ;;  %1209 = vmatprep.mubr.f32.mxu0 %v9924_v0 }
 0x67f   :  { %1175 = vmatprep.subr.mxu0 %v8120_v3  ;;  %6567 = vmatpush3.msra.mxu1 %v8153_v25 }
 0x680   :  { %1176 = vmatpush1.msra.mxu0 %v8123_v4  ;;  %6568 = vmatprep.subr.mxu1 %v9924_v0 }
 0x681   :  { %6585 = vmatprep.subr.mxu0 %v9924_v0  ;;  %6569 = vmatpush3.msra.mxu1 %v8159_v27 }
 0x682   :  { %6570 = vmatprep.subr.mxu1 %v9924_v0  ;;  %6582 = vmatprep.mubr.msk.f32.mxu1 %vm7921_vm1, %v9924_v0 }
 0x683   :  { %6571 = vmatpush3.msra.mxu1 %v8169_v30  ;;  %5967 = vmatmul.mubr.msk.f32.vlgmr.msra.gmra.mxu0 %vm340_vm0, %v294_v20 }
 0x684   :  { %6572 = vmatprep.subr.mxu1 %v9924_v0  ;;  %6586 = vmatpush3.msra.mxu0 %v8155_v26 }
 0x685   :  { %6573 = vmatpush3.msra.mxu1 %v8177_v32  ;;  %6601 = vmatprep.mubr.msk.f32.mxu0 %vm7921_vm1, %v9924_v0 }
 0x686   :  { %6574 = vmatprep.subr.mxu1 %v9924_v0  ;;  %6587 = vmatprep.subr.mxu0 %v9924_v0 }
 0x687   :  { %6575 = vmatpush3.msra.mxu1 %v8185_v34  ;;  %6588 = vmatpush3.msra.mxu0 %v8161_v28 }
 0x688   :  { %6576 = vmatprep.subr.mxu1 %v9924_v0  ;;  %6589 = vmatprep.subr.mxu0 %v9924_v0 }
 0x689   :  { %6577 = vmatpush3.msra.mxu1 %v8191_v35  ;;  %6590 = vmatpush3.msra.mxu0 %v8165_v29 }
 0x68a   :  { %6578 = vmatprep.subr.mxu1 %v9924_v0  ;;  %6591 = vmatprep.subr.mxu0 %v9924_v0 }
 0x68b   :  { %6579 = vmatpush3.msra.mxu1 %v8199_v38  ;;  %6592 = vmatpush3.msra.mxu0 %v8173_v31 }
 0x68c   :  { %6580 = vmatprep.subr.mxu1 %v9924_v0  ;;  %6593 = vmatprep.subr.mxu0 %v9924_v0 }
 0x68d   :  { %6581 = vmatpush3.msra.mxu1 %v8207_v40  ;;  %6594 = vmatpush3.msra.mxu0 %v8181_v33 }
 0x68e   :  { %1410 = vmatprep.subr.mxu1 %v8116_v1  ;;  %6595 = vmatprep.subr.mxu0 %v9924_v0 }
 0x68f   :  { %6596 = vmatpush3.msra.mxu0 %v8193_v36 }
 0x690   :  { %6597 = vmatprep.subr.mxu0 %v9924_v0 }
 0x691   :  { %6598 = vmatpush3.msra.mxu0 %v8201_v39 }
 0x692   :  { %6599 = vmatprep.subr.mxu0 %v9924_v0 }
 0x693   :  { %6600 = vmatpush3.msra.mxu0 %v8211_v41 }
 0x694   :  { %6604 = vmatprep.subr.mxu0 %v9924_v0 }
 0x73d   :  { %v1050_v60 = vpop.f32.mrf.mxu0  ;;  %v1127_v61 = vpop.f32.mrf.mxu1 }
 0x73e   :  { %v1054_v62 = vadd.f32 %v1050_v60, %v975_v59  ;;  %v1128_v11 = vadd.f32 %v8146_v18, %v1127_v61 }
 0x73f   :  { %v6546_v63 = vpop.f32.mrf.mxu0  ;;  %v6565_v5 = vpop.f32.mrf.mxu1 }
 0x740   :  { %v5965_v6 = vmul.f32 -1.442695, %v1054_v62  ;;  %v296_v62 = vld [vmem:[#allocation2 + $0xa] sm:$0x3] }
 0x742   :  { %7347 = vpow2.f32 %v5965_v6 }
 0x743   :  { %v1211_v44 = vpop.f32.mrf.mxu0 }
 0x744   :  { %v1212_v47 = vadd.f32 %v1211_v44, %v8138_v10 }
 0x745   :  { %v1213_v46 = vpop.f32.mrf.mxu0 }
 0x746   :  { %v1214_v59 = vadd.f32 %v1213_v46, %v8144_v17 }
 0x74f   :  { %v7348_v7 = vpop.eup %7347 }
 0x750   :  { %v1058_v9 = vadd.f32 1.0, %v7348_v7 }
 0x752   :  { %7349 = vrcp.f32 %v1058_v9 }
 0x75f   :  { %v7350_v13 = vpop.eup %7349 }
 0x760   :  { %v1131_v15 = vmul.f32 %v7350_v13, %v1128_v11  ;;  %v1134_v22 = vsub.f32 1.0, %v7350_v13  ;;  %v1140_v24 = vmul.f32 %v7350_v13, %v8338_v55 }
 0x762   :  { %v1132_v19 = vadd.f32 %v1131_v15, %v977_v14 }
 0x764   :  { %7351 = vtanh.f32 %v1132_v19 }
 0x771   :  { %v7352_v21 = vpop.eup %7351 }
 0x772   :  { %1136 = vrot.lane.b32.xlu0 %v7352_v21, %s7920_s17 }
 0x7e4   :  { %v1137_v23 = vpop.permute.xlu0 %1136 }
 0x7e5   :  { %v1139_v37 = vmul.f32 %v1137_v23, %v1134_v22 }
 0x7e7   :  { %v8395_v42 = vadd.f32 %v1140_v24, %v1139_v37 }
 0x7e9   :  { %1217 = vrot.lane.b32.xlu1 %v8395_v42, %s7920_s17 }
 0x85b   :  { %v8399_v43 = vpop.permute.xlu1 %1217 }
 0x85c   :  { %6583 = vmatmul.mubr.msk.f32.vlgmr.msra.gmra.mxu1 %vm507_vm2, %v8399_v43  ;;  %6602 = vmatmul.mubr.msk.f32.vlgmr.msra.gmra.mxu0 %vm507_vm2, %v8399_v43 }
 0x85d   :  { %1411 = vmatpush1.msra.mxu1 %v8118_v2  ;;  %1446 = vmatprep.mubr.f32.mxu1 %v9924_v0 }
 0x85e   :  { %1412 = vmatprep.subr.mxu1 %v8120_v3  ;;  %6605 = vmatpush3.msra.mxu0 %v8153_v25 }
 0x85f   :  { %1413 = vmatpush1.msra.mxu1 %v8123_v4  ;;  %6606 = vmatprep.subr.mxu0 %v9924_v0 }
 0x860   :  { %6623 = vmatprep.subr.mxu1 %v9924_v0  ;;  %6607 = vmatpush3.msra.mxu0 %v8159_v27 }
 0x861   :  { %6608 = vmatprep.subr.mxu0 %v9924_v0  ;;  %6620 = vmatprep.mubr.msk.f32.mxu0 %vm7921_vm1, %v9924_v0 }
 0x862   :  { %6609 = vmatpush3.msra.mxu0 %v8169_v30  ;;  %5971 = vmatmul.mubr.msk.f32.vlgmr.msra.gmra.mxu1 %vm340_vm0, %v296_v62 }
 0x863   :  { %6610 = vmatprep.subr.mxu0 %v9924_v0  ;;  %6624 = vmatpush3.msra.mxu1 %v8155_v26 }
 0x864   :  { %6611 = vmatpush3.msra.mxu0 %v8177_v32  ;;  %6639 = vmatprep.mubr.msk.f32.mxu1 %vm7921_vm1, %v9924_v0 }
 0x865   :  { %6612 = vmatprep.subr.mxu0 %v9924_v0  ;;  %6625 = vmatprep.subr.mxu1 %v9924_v0 }
 0x866   :  { %6613 = vmatpush3.msra.mxu0 %v8185_v34  ;;  %6626 = vmatpush3.msra.mxu1 %v8161_v28 }
 0x867   :  { %6614 = vmatprep.subr.mxu0 %v9924_v0  ;;  %6627 = vmatprep.subr.mxu1 %v9924_v0 }
 0x868   :  { %6615 = vmatpush3.msra.mxu0 %v8191_v35  ;;  %6628 = vmatpush3.msra.mxu1 %v8165_v29 }
 0x869   :  { %6616 = vmatprep.subr.mxu0 %v9924_v0  ;;  %6629 = vmatprep.subr.mxu1 %v9924_v0 }
 0x86a   :  { %6617 = vmatpush3.msra.mxu0 %v8199_v38  ;;  %6630 = vmatpush3.msra.mxu1 %v8173_v31 }
 0x86b   :  { %6618 = vmatprep.subr.mxu0 %v9924_v0  ;;  %6631 = vmatprep.subr.mxu1 %v9924_v0 }
 0x86c   :  { %6619 = vmatpush3.msra.mxu0 %v8207_v40  ;;  %6632 = vmatpush3.msra.mxu1 %v8181_v33 }
 0x86d   :  { %1647 = vmatprep.subr.mxu0 %v8116_v1  ;;  %6633 = vmatprep.subr.mxu1 %v9924_v0 }
 0x86e   :  { %6634 = vmatpush3.msra.mxu1 %v8193_v36 }
 0x86f   :  { %6635 = vmatprep.subr.mxu1 %v9924_v0 }
 0x870   :  { %6636 = vmatpush3.msra.mxu1 %v8201_v39 }
 0x871   :  { %6637 = vmatprep.subr.mxu1 %v9924_v0 }
 0x872   :  { %6638 = vmatpush3.msra.mxu1 %v8211_v41 }
 0x873   :  { %6642 = vmatprep.subr.mxu1 %v9924_v0 }
 0x91c   :  { %v1287_v48 = vpop.f32.mrf.mxu1  ;;  %v1364_v49 = vpop.f32.mrf.mxu0 }
 0x91d   :  { %v1291_v50 = vadd.f32 %v1287_v48, %v1212_v47  ;;  %v1365_v57 = vadd.f32 %v8146_v18, %v1364_v49 }
 0x91e   :  { %v6584_v51 = vpop.f32.mrf.mxu1  ;;  %v6603_v52 = vpop.f32.mrf.mxu0 }
 0x91f   :  { %v5969_v53 = vmul.f32 -1.442695, %v1291_v50  ;;  %v298_v50 = vld [vmem:[#allocation2 + $0xc] sm:$0x3] }
 0x921   :  { %7353 = vpow2.f32 %v5969_v53 }
 0x922   :  { %v1448_v14 = vpop.f32.mrf.mxu1 }
 0x923   :  { %v1449_v19 = vadd.f32 %v1448_v14, %v8138_v10  ;;  %v8615_v14 = vld [vmem:[%s9946_s3 + $0x48] sm:$0xff] }
 0x924   :  { %v1450_v15 = vpop.f32.mrf.mxu1 }
 0x925   :  { %v1451_v48 = vadd.f32 %v1450_v15, %v8144_v17  ;;  %v8622_v15 = vld [vmem:[%s9946_s3 + $0x40] sm:$0xff] }
 0x92e   :  { %v7354_v54 = vpop.eup %7353 }
 0x92f   :  { %v1295_v55 = vadd.f32 1.0, %v7354_v54 }
 0x931   :  { %7355 = vrcp.f32 %v1295_v55 }
 0x93e   :  { %v7356_v58 = vpop.eup %7355 }
 0x93f   :  { %v1368_v60 = vmul.f32 %v7356_v58, %v1365_v57  ;;  %v1371_v5 = vsub.f32 1.0, %v7356_v58  ;;  %v1377_v7 = vmul.f32 %v7356_v58, %v8395_v42 }
 0x941   :  { %v1369_v61 = vadd.f32 %v1368_v60, %v1214_v59 }
 0x943   :  { %7357 = vtanh.f32 %v1369_v61 }
 0x950   :  { %v7358_v63 = vpop.eup %7357 }
 0x951   :  { %1373 = vrot.lane.b32.xlu0 %v7358_v63, %s7920_s17 }
 0x9c3   :  { %v1374_v6 = vpop.permute.xlu0 %1373 }
 0x9c4   :  { %v1376_v9 = vmul.f32 %v1374_v6, %v1371_v5  ;;  %v300_v5 = vld [vmem:[#allocation2 + $0xe] sm:$0x3]  ;;  %v8547_v6 = vld [vmem:[%s9946_s3 + $0x78] sm:$0xff] }
 0x9c6   :  { %v8452_v11 = vadd.f32 %v1377_v7, %v1376_v9  ;;  %v8594_v7 = vld [vmem:[%s9946_s3 + $0x60] sm:$0xff]  ;;  %v8601_v9 = vld [vmem:[%s9946_s3 + $0x58] sm:$0xff] }
 0x9c8   :  { %1454 = vrot.lane.b32.xlu1 %v8452_v11, %s7920_s17 }
 0xa3a   :  { %v8456_v13 = vpop.permute.xlu1 %1454 }
 0xa3b   :  { %6621 = vmatmul.mubr.msk.f32.vlgmr.msra.gmra.mxu0 %vm507_vm2, %v8456_v13  ;;  %6640 = vmatmul.mubr.msk.f32.vlgmr.msra.gmra.mxu1 %vm507_vm2, %v8456_v13 }
 0xa3c   :  { %1648 = vmatpush1.msra.mxu0 %v8118_v2  ;;  %1683 = vmatprep.mubr.f32.mxu0 %v9924_v0 }
 0xa3d   :  { %1649 = vmatprep.subr.mxu0 %v8120_v3  ;;  %6643 = vmatpush3.msra.mxu1 %v8153_v25 }
 0xa3e   :  { %1650 = vmatpush1.msra.mxu0 %v8123_v4  ;;  %6644 = vmatprep.subr.mxu1 %v9924_v0 }
 0xa3f   :  { %6661 = vmatprep.subr.mxu0 %v9924_v0  ;;  %6645 = vmatpush3.msra.mxu1 %v8159_v27 }
 0xa40   :  { %6646 = vmatprep.subr.mxu1 %v9924_v0  ;;  %6658 = vmatprep.mubr.msk.f32.mxu1 %vm7921_vm1, %v9924_v0 }
 0xa41   :  { %6647 = vmatpush3.msra.mxu1 %v8169_v30  ;;  %5975 = vmatmul.mubr.msk.f32.vlgmr.msra.gmra.mxu0 %vm340_vm0, %v298_v50 }
 0xa42   :  { %6648 = vmatprep.subr.mxu1 %v9924_v0  ;;  %6662 = vmatpush3.msra.mxu0 %v8155_v26 }
 0xa43   :  { %6649 = vmatpush3.msra.mxu1 %v8177_v32  ;;  %6677 = vmatprep.mubr.msk.f32.mxu0 %vm7921_vm1, %v9924_v0 }
 0xa44   :  { %6650 = vmatprep.subr.mxu1 %v9924_v0  ;;  %6663 = vmatprep.subr.mxu0 %v9924_v0 }
 0xa45   :  { %6651 = vmatpush3.msra.mxu1 %v8185_v34  ;;  %6664 = vmatpush3.msra.mxu0 %v8161_v28 }
 0xa46   :  { %6652 = vmatprep.subr.mxu1 %v9924_v0  ;;  %6665 = vmatprep.subr.mxu0 %v9924_v0 }
 0xa47   :  { %6653 = vmatpush3.msra.mxu1 %v8191_v35  ;;  %6666 = vmatpush3.msra.mxu0 %v8165_v29 }
 0xa48   :  { %6654 = vmatprep.subr.mxu1 %v9924_v0  ;;  %6667 = vmatprep.subr.mxu0 %v9924_v0 }
 0xa49   :  { %6655 = vmatpush3.msra.mxu1 %v8199_v38  ;;  %6668 = vmatpush3.msra.mxu0 %v8173_v31 }
 0xa4a   :  { %6656 = vmatprep.subr.mxu1 %v9924_v0  ;;  %6669 = vmatprep.subr.mxu0 %v9924_v0 }
 0xa4b   :  { %6657 = vmatpush3.msra.mxu1 %v8207_v40  ;;  %6670 = vmatpush3.msra.mxu0 %v8181_v33 }
 0xa4c   :  { %1884 = vmatprep.subr.mxu1 %v8116_v1  ;;  %6671 = vmatprep.subr.mxu0 %v9924_v0 }
 0xa4d   :  { %6672 = vmatpush3.msra.mxu0 %v8193_v36 }
 0xa4e   :  { %6673 = vmatprep.subr.mxu0 %v9924_v0 }
 0xa4f   :  { %6674 = vmatpush3.msra.mxu0 %v8201_v39 }
 0xa50   :  { %6675 = vmatprep.subr.mxu0 %v9924_v0 }
 0xa51   :  { %6676 = vmatpush3.msra.mxu0 %v8211_v41 }
 0xa52   :  { %6680 = vmatprep.subr.mxu0 %v9924_v0 }
 0xafb   :  { %v1524_v20 = vpop.f32.mrf.mxu0  ;;  %v1601_v21 = vpop.f32.mrf.mxu1 }
 0xafc   :  { %v1528_v22 = vadd.f32 %v1524_v20, %v1449_v19  ;;  %v1602_v46 = vadd.f32 %v8146_v18, %v1601_v21  ;;  %v8629_v19 = vld [vmem:[%s9946_s3 + $0x38] sm:$0xff]  ;;  %v8636_v20 = vld [vmem:[%s9946_s3 + $0x30] sm:$0xff]  ;;  %v8643_v21 = vld [vmem:[%s9946_s3 + $0x28] sm:$0xff] }
 0xafd   :  { %v6622_v23 = vpop.f32.mrf.mxu0  ;;  %v6641_v24 = vpop.f32.mrf.mxu1 }
 0xafe   :  { %v5973_v37 = vmul.f32 -1.442695, %v1528_v22  ;;  %v8650_v22 = vld [vmem:[%s9946_s3 + $0x20] sm:$0xff]  ;;  %v8657_v23 = vld [vmem:[%s9946_s3 + $0x18] sm:$0xff]  ;;  %v8664_v24 = vld [vmem:[%s9946_s3 + $0x10] sm:$0xff] }
 0xb00   :  { %7359 = vpow2.f32 %v5973_v37  ;;  %v8671_v37 = vld [vmem:[%s9946_s3 + $0x8] sm:$0xff] }
 0xb0d   :  { %v7360_v42 = vpop.eup %7359 }
 0xb0e   :  { %v1532_v44 = vadd.f32 1.0, %v7360_v42  ;;  %v8678_v42 = vld [vmem:[%s9946_s3] sm:$0xff] }
 0xb10   :  { %7361 = vrcp.f32 %v1532_v44 }
 0xb1d   :  { %v7362_v47 = vpop.eup %7361 }
 0xb1e   :  { %v1605_v1 = vmul.f32 %v7362_v47, %v1602_v46  ;;  %v1608_v52 = vsub.f32 1.0, %v7362_v47  ;;  %v1614_v54 = vmul.f32 %v7362_v47, %v8452_v11  ;;  %v8608_v11 = vld [vmem:[%s9946_s3 + $0x50] sm:$0xff] }
 0xb20   :  { %v1606_v49 = vadd.f32 %v1605_v1, %v1451_v48 }
 0xb22   :  { %7363 = vtanh.f32 %v1606_v49 }
 0xb2f   :  { %v7364_v51 = vpop.eup %7363 }
 0xb30   :  { %1610 = vrot.lane.b32.xlu0 %v7364_v51, %s7920_s17  ;;  %v2122_v51 = vld [vmem:[#allocation16] sm:$0x3] }
 0xba2   :  { %v1611_v53 = vpop.permute.xlu0 %1610 }
 0xba3   :  { %v1613_v55 = vmul.f32 %v1611_v53, %v1608_v52  ;;  %v8702_v52 = vrot.slane %v2122_v51, %v8135_v8 }
 0xba5   :  { %v8509_v57 = vadd.f32 %v1614_v54, %v1613_v55 }
 0xba7   :  { %1691 = vrot.lane.b32.xlu1 %v8509_v57, %s7920_s17 }
 0xc19   :  { %v8513_v58 = vpop.permute.xlu1 %1691 }
 0xc1a   :  { %6659 = vmatmul.mubr.msk.f32.vlgmr.msra.gmra.mxu1 %vm507_vm2, %v8513_v58  ;;  %6678 = vmatmul.mubr.msk.f32.vlgmr.msra.gmra.mxu0 %vm507_vm2, %v8513_v58 }
 0xc1b   :  { %1885 = vmatpush1.msra.mxu1 %v8118_v2  ;;  %1920 = vmatprep.mubr.f32.mxu1 %v9924_v0  ;;  %v1685_v2 = vpop.f32.mrf.mxu0 }
 0xc1c   :  { %1886 = vmatprep.subr.mxu1 %v8120_v3  ;;  %6681 = vmatpush3.msra.mxu0 %v8153_v25 }
 0xc1d   :  { %1887 = vmatpush1.msra.mxu1 %v8123_v4  ;;  %6682 = vmatprep.subr.mxu0 %v9924_v0  ;;  %v1687_v3 = vpop.f32.mrf.mxu0  ;;  %v1686_v4 = vadd.f32 %v1685_v2, %v8138_v10 }
 0xc1e   :  { %6699 = vmatprep.subr.mxu1 %v9924_v0  ;;  %6683 = vmatpush3.msra.mxu0 %v8159_v27  ;;  %v1688_v62 = vadd.f32 %v1687_v3, %v8144_v17 }
 0xc1f   :  { %6684 = vmatprep.subr.mxu0 %v9924_v0  ;;  %6696 = vmatprep.mubr.msk.f32.mxu0 %vm7921_vm1, %v9924_v0 }
 0xc20   :  { %6685 = vmatpush3.msra.mxu0 %v8169_v30  ;;  %5979 = vmatmul.mubr.msk.f32.vlgmr.msra.gmra.mxu1 %vm340_vm0, %v300_v5  ;;  %v8725_v5 = vld [vmem:[#allocation14 + $0x30] sm:$0xff] }
 0xc21   :  { %6686 = vmatprep.subr.mxu0 %v9924_v0  ;;  %6700 = vmatpush3.msra.mxu1 %v8155_v26 }
 0xc22   :  { %6687 = vmatpush3.msra.mxu0 %v8177_v32  ;;  %6715 = vmatprep.mubr.msk.f32.mxu1 %vm7921_vm1, %v9924_v0 }
 0xc23   :  { %6688 = vmatprep.subr.mxu0 %v9924_v0  ;;  %6701 = vmatprep.subr.mxu1 %v9924_v0 }
 0xc24   :  { %6689 = vmatpush3.msra.mxu0 %v8185_v34  ;;  %6702 = vmatpush3.msra.mxu1 %v8161_v28 }
 0xc25   :  { %6690 = vmatprep.subr.mxu0 %v9924_v0  ;;  %6703 = vmatprep.subr.mxu1 %v9924_v0 }
 0xc26   :  { %6691 = vmatpush3.msra.mxu0 %v8191_v35  ;;  %6704 = vmatpush3.msra.mxu1 %v8165_v29 }
 0xc27   :  { %6692 = vmatprep.subr.mxu0 %v9924_v0  ;;  %6705 = vmatprep.subr.mxu1 %v9924_v0 }
 0xc28   :  { %6693 = vmatpush3.msra.mxu0 %v8199_v38  ;;  %6706 = vmatpush3.msra.mxu1 %v8173_v31 }
 0xc29   :  { %6694 = vmatprep.subr.mxu0 %v9924_v0  ;;  %6707 = vmatprep.subr.mxu1 %v9924_v0 }
 0xc2a   :  { %6695 = vmatpush3.msra.mxu0 %v8207_v40  ;;  %6708 = vmatpush3.msra.mxu1 %v8181_v33 }
 0xc2b   :  { %2157 = vmatprep.subr.mxu0 %v8547_v6  ;;  %6709 = vmatprep.subr.mxu1 %v9924_v0 }
 0xc2c   :  { %6710 = vmatpush3.msra.mxu1 %v8193_v36  ;;  %v8578_v36 = vld [vmem:[%s9946_s3 + $0x70] sm:$0xff] }
 0xc2d   :  { %6711 = vmatprep.subr.mxu1 %v9924_v0 }
 0xc2e   :  { %6712 = vmatpush3.msra.mxu1 %v8201_v39 }
 0xc2f   :  { %6713 = vmatprep.subr.mxu1 %v9924_v0 }
 0xc30   :  { %6714 = vmatpush3.msra.mxu1 %v8211_v41  ;;  %v8585_v41 = vld [vmem:[%s9946_s3 + $0x68] sm:$0xff] }
 0xc31   :  { %2243 = vmatprep.subr.mxu1 %v8547_v6 }
 0xcda   :  { %v1761_v25 = vpop.f32.mrf.mxu1  ;;  %v1838_v27 = vpop.f32.mrf.mxu0 }
 0xcdb   :  { %v1765_v30 = vadd.f32 %v1761_v25, %v1686_v4  ;;  %v1839_v38 = vadd.f32 %v8146_v18, %v1838_v27 }
 0xcdc   :  { %v6660_v32 = vpop.f32.mrf.mxu1  ;;  %v6679_v34 = vpop.f32.mrf.mxu0 }
 0xcdd   :  { %v5977_v59 = vmul.f32 -1.442695, %v1765_v30  ;;  %v8711_v32 = vrot.slane %v2122_v51, %v8141_v16  ;;  %v8713_v34 = vld [vmem:[#allocation17] ss:$0 sm:$0xff] }
 0xcdf   :  { %7365 = vpow2.f32 %v5977_v59 }
 0xce0   :  { %v1922_v44 = vpop.f32.mrf.mxu1 }
 0xce1   :  { %v1923_v47 = vadd.f32 %v1922_v44, %v8138_v10  ;;  %v7473_v10 = vld [vmem:[#allocation11] ss:$0 sm:$0xff] }
 0xce2   :  { %v8698_v46 = vpop.f32.mrf.mxu1  ;;  %v8747_v44 = vld [vmem:[#allocation14 + $0x18] sm:$0xff] }
 0xcec   :  { %v7366_v35 = vpop.eup %7365 }
 0xced   :  { %v1769_v60 = vadd.f32 1.0, %v7366_v35 }
 0xcef   :  { %7367 = vrcp.f32 %v1769_v60 }
 0xcfc   :  { %v7368_v61 = vpop.eup %7367 }
 0xcfd   :  { %v1842_v40 = vmul.f32 %v7368_v61, %v1839_v38  ;;  %v1845_v26 = vsub.f32 1.0, %v7368_v61  ;;  %v1851_v29 = vmul.f32 %v7368_v61, %v8509_v57 }
 0xcff   :  { %v1843_v63 = vadd.f32 %v1842_v40, %v1688_v62  ;;  %v8717_v62 = vld [vmem:[#allocation13 + $0x38] sm:$0xff] }
 0xd00   :  { %v8719_v40 = vld [vmem:[#allocation14 + $0x38] sm:$0xff] }
 0xd01   :  { %7369 = vtanh.f32 %v1843_v63  ;;  %v8721_v63 = vld [vmem:[#allocation13 + $0x30] sm:$0xff] }
 0xd0e   :  { %v7370_v18 = vpop.eup %7369 }
 0xd0f   :  { %1847 = vrot.lane.b32.xlu0 %v7370_v18, %s7920_s17  ;;  %v8729_v18 = vld [vmem:[#allocation13 + $0x28] sm:$0xff] }
 0xd81   :  { %v1848_v28 = vpop.permute.xlu0 %1847 }
 0xd82   :  { %v1850_v31 = vmul.f32 %v1848_v28, %v1845_v26  ;;  %v8731_v26 = vld [vmem:[#allocation14 + $0x28] sm:$0xff]  ;;  %v8737_v28 = vld [vmem:[#allocation13 + $0x20] sm:$0xff] }
 0xd84   :  { %v8571_v33 = vadd.f32 %v1851_v29, %v1850_v31  ;;  %v8739_v29 = vld [vmem:[#allocation14 + $0x20] sm:$0xff]  ;;  %v8745_v31 = vld [vmem:[#allocation13 + $0x18] sm:$0xff] }
 0xd86   :  { %1928 = vrot.lane.b32.xlu1 %v8571_v33, %s7920_s17 }
 0xdf8   :  { %v8580_v39 = vpop.permute.xlu1 %1928 }
 0xdf9   :  { %6697 = vmatmul.mubr.msk.f32.vlgmr.msra.gmra.mxu0 %vm507_vm2, %v8580_v39  ;;  %6716 = vmatmul.mubr.msk.f32.vlgmr.msra.gmra.mxu1 %vm507_vm2, %v8580_v39 }
 0xdfa   :  { %2158 = vmatpush1.msra.mxu0 %v8578_v36  ;;  %2244 = vmatpush1.msra.mxu1 %v8578_v36 }
 0xdfb   :  { %2159 = vmatprep.subr.mxu0 %v8585_v41  ;;  %2245 = vmatprep.subr.mxu1 %v8585_v41 }
 0xdfc   :  { %2160 = vmatpush1.msra.mxu0 %v8594_v7  ;;  %2246 = vmatpush1.msra.mxu1 %v8594_v7 }
 0xdfd   :  { %2161 = vmatprep.subr.mxu0 %v8601_v9  ;;  %2247 = vmatprep.subr.mxu1 %v8601_v9 }
 0xdfe   :  { %2162 = vmatpush1.msra.mxu0 %v8608_v11  ;;  %2248 = vmatpush1.msra.mxu1 %v8608_v11 }
 0xdff   :  { %2163 = vmatprep.subr.mxu0 %v8615_v14  ;;  %2249 = vmatprep.subr.mxu1 %v8615_v14 }
 0xe00   :  { %2164 = vmatpush1.msra.mxu0 %v8622_v15  ;;  %2250 = vmatpush1.msra.mxu1 %v8622_v15 }
 0xe01   :  { %2165 = vmatprep.subr.mxu0 %v8629_v19  ;;  %2251 = vmatprep.subr.mxu1 %v8629_v19 }
 0xe02   :  { %2166 = vmatpush1.msra.mxu0 %v8636_v20  ;;  %2252 = vmatpush1.msra.mxu1 %v8636_v20 }
 0xe03   :  { %2167 = vmatprep.subr.mxu0 %v8643_v21  ;;  %2253 = vmatprep.subr.mxu1 %v8643_v21 }
 0xe04   :  { %2168 = vmatpush1.msra.mxu0 %v8650_v22  ;;  %2254 = vmatpush1.msra.mxu1 %v8650_v22 }
 0xe05   :  { %2169 = vmatprep.subr.mxu0 %v8657_v23  ;;  %2255 = vmatprep.subr.mxu1 %v8657_v23 }
 0xe06   :  { %2170 = vmatpush1.msra.mxu0 %v8664_v24  ;;  %2256 = vmatpush1.msra.mxu1 %v8664_v24 }
 0xe07   :  { %2171 = vmatprep.subr.mxu0 %v8671_v37  ;;  %2257 = vmatprep.subr.mxu1 %v8671_v37 }
 0xe08   :  { %2172 = vmatpush1.msra.mxu0 %v8678_v42  ;;  %2205 = vmatprep.mubr.f32.mxu0 %v9924_v0 }
 0xe09   :  { %2258 = vmatpush1.msra.mxu1 %v8678_v42  ;;  %2291 = vmatprep.mubr.f32.mxu1 %v9924_v0 }
 0xe0a   :  { %5984 = vmatmul.mubr.msk.f32.vlgmr.msra.gmra.mxu0 %vm507_vm2, %v8228_v45  ;;  %5986 = vmatmul.mubr.msk.f32.vlgmr.msra.gmra.mxu1 %vm507_vm2, %v8285_v12 }
 0xe0b   :  { %6718 = vmatprep.subr.mxu0 %v9924_v0  ;;  %6737 = vmatprep.subr.mxu1 %v9924_v0 }
 0xe0c   :  { %6734 = vmatprep.mubr.msk.f32.mxu0 %vm7921_vm1, %v9924_v0  ;;  %6753 = vmatprep.mubr.msk.f32.mxu1 %vm7921_vm1, %v9924_v0 }
 0xe0d   :  { %6719 = vmatpush3.msra.mxu0 %v8717_v62  ;;  %6738 = vmatpush3.msra.mxu1 %v8719_v40 }
 0xe0e   :  { %6720 = vmatprep.subr.mxu0 %v9924_v0  ;;  %6739 = vmatprep.subr.mxu1 %v9924_v0 }
 0xe0f   :  { %6721 = vmatpush3.msra.mxu0 %v8721_v63  ;;  %6740 = vmatpush3.msra.mxu1 %v8725_v5 }
 0xe10   :  { %6722 = vmatprep.subr.mxu0 %v9924_v0  ;;  %6741 = vmatprep.subr.mxu1 %v9924_v0 }
 0xe11   :  { %6723 = vmatpush3.msra.mxu0 %v8729_v18  ;;  %6742 = vmatpush3.msra.mxu1 %v8731_v26 }
 0xe12   :  { %6724 = vmatprep.subr.mxu0 %v9924_v0  ;;  %6743 = vmatprep.subr.mxu1 %v9924_v0 }
 0xe13   :  { %6725 = vmatpush3.msra.mxu0 %v8737_v28  ;;  %6744 = vmatpush3.msra.mxu1 %v8739_v29 }
 0xe14   :  { %6726 = vmatprep.subr.mxu0 %v9924_v0  ;;  %6745 = vmatprep.subr.mxu1 %v9924_v0 }
 0xe15   :  { %6727 = vmatpush3.msra.mxu0 %v8745_v31  ;;  %6746 = vmatpush3.msra.mxu1 %v8747_v44 }
 0xe16   :  { %6728 = vmatprep.subr.mxu0 %v9924_v0  ;;  %6747 = vmatprep.subr.mxu1 %v9924_v0 }
 0xeb9   :  { %v1998_v48 = vpop.f32.mrf.mxu0  ;;  %v2075_v45 = vpop.f32.mrf.mxu1 }
 0xeba   :  { %v2002_v1 = vadd.f32 %v1998_v48, %v1923_v47  ;;  %v2076_v3 = vadd.f32 %v7473_v10, %v2075_v45  ;;  %v8753_v47 = vld [vmem:[#allocation13 + $0x10] sm:$0xff] }
 0xebb   :  { %v6698_v49 = vpop.f32.mrf.mxu0  ;;  %v6717_v12 = vpop.f32.mrf.mxu1  ;;  %v8757_v48 = vld [vmem:[#allocation14 + $0x10] sm:$0xff]  ;;  %6729 = vmatpush3.msra.mxu0 %v8753_v47 }
 0xebc   :  { %v5981_v50 = vmul.f32 -1.442695, %v2002_v1  ;;  %v8761_v1 = vld [vmem:[#allocation13 + $0x8] sm:$0xff]  ;;  %6730 = vmatprep.subr.mxu0 %v9924_v0  ;;  %6748 = vmatpush3.msra.mxu1 %v8757_v48  ;;  %v8769_v12 = vld [vmem:[#allocation13] sm:$0xff] }
 0xebd   :  { %v8765_v49 = vld [vmem:[#allocation14 + $0x8] sm:$0xff]  ;;  %6731 = vmatpush3.msra.mxu0 %v8761_v1  ;;  %6749 = vmatprep.subr.mxu1 %v9924_v0 }
 0xebe   :  { %7371 = vpow2.f32 %v5981_v50  ;;  %v8773_v50 = vld [vmem:[#allocation14] sm:$0xff]  ;;  %6732 = vmatprep.subr.mxu0 %v9924_v0  ;;  %6750 = vmatpush3.msra.mxu1 %v8765_v49 }
 0xebf   :  { %6733 = vmatpush3.msra.mxu0 %v8769_v12  ;;  %6751 = vmatprep.subr.mxu1 %v9924_v0 }
 0xec0   :  { %6752 = vmatpush3.msra.mxu1 %v8773_v50  ;;  %2477 = vmatprep.subr.mxu0 %v8547_v6 }
 0xec1   :  { %6756 = vmatprep.subr.mxu1 %v9924_v0 }
 0xeca   :  { %v2207_v53 = vpop.f32.mrf.mxu0 }
 0xecb   :  { %v7372_v54 = vpop.eup %7371  ;;  %v2208_v55 = vadd.f32 %v2207_v53, %v8702_v52 }
 0xecc   :  { %v2006_v57 = vadd.f32 1.0, %v7372_v54  ;;  %v2209_v59 = vpop.f32.mrf.mxu0 }
 0xecd   :  { %v5985_v2 = vmul.f32 -1.442695, %v2208_v55  ;;  %v2210_v60 = vadd.f32 %v2209_v59, %v8711_v32 }
 0xece   :  { %7373 = vrcp.f32 %v2006_v57 }
 0xecf   :  { %7375 = vpow2.f32 %v5985_v2 }
 0xedb   :  { %v8705_v4 = vpop.eup %7373 }
 0xedc   :  { %v7376_v25 = vpop.eup %7375  ;;  %v8708_v27 = vmul.f32 %v8705_v4, %v2076_v3 }
 0xedd   :  { %v2215_v30 = vadd.f32 1.0, %v7376_v25 }
 0xedf   :  { %7377 = vrcp.f32 %v2215_v30 }
 0xeec   :  { %v7378_v35 = vpop.eup %7377 }
 0xeed   :  { %v2218_v38 = vmul.f32 %v7378_v35, %v8713_v34  ;;  %v2221_v51 = vsub.f32 1.0, %v7378_v35 }
 0xeef   :  { %v2219_v61 = vadd.f32 %v2218_v38, %v2210_v60 }
 0xef1   :  { %7379 = vtanh.f32 %v2219_v61 }
 0xefe   :  { %v7380_v45 = vpop.eup %7379 }
 0xeff   :  { %2223 = vrot.lane.b32.xlu0 %v7380_v45, %s7920_s17 }
 0xf71   :  { %v2224_v53 = vpop.permute.xlu0 %2223 }
 0xf72   :  { %v8782_v54 = vmul.f32 %v2224_v53, %v2221_v51 }
 0xf74   :  { %2299 = vrot.lane.b32.xlu1 %v8782_v54, %s7920_s17 }
 0xfe6   :  { %v8786_v55 = vpop.permute.xlu1 %2299 }
 0xfe7   :  { %6735 = vmatmul.mubr.msk.f32.vlgmr.msra.gmra.mxu0 %vm507_vm2, %v8786_v55  ;;  %6754 = vmatmul.mubr.msk.f32.vlgmr.msra.gmra.mxu1 %vm507_vm2, %v8786_v55 }
 0xfe8   :  { %2478 = vmatpush1.msra.mxu0 %v8578_v36  ;;  %2525 = vmatprep.mubr.f32.mxu0 %v9924_v0 }
 0xfe9   :  { %2479 = vmatprep.subr.mxu0 %v8585_v41  ;;  %6757 = vmatpush3.msra.mxu1 %v8717_v62 }
 0xfea   :  { %2480 = vmatpush1.msra.mxu0 %v8594_v7  ;;  %6758 = vmatprep.subr.mxu1 %v9924_v0 }
 0xfeb   :  { %2481 = vmatprep.subr.mxu0 %v8601_v9  ;;  %6759 = vmatpush3.msra.mxu1 %v8721_v63 }
 0xfec   :  { %2482 = vmatpush1.msra.mxu0 %v8608_v11  ;;  %6760 = vmatprep.subr.mxu1 %v9924_v0 }
 0xfed   :  { %2483 = vmatprep.subr.mxu0 %v8615_v14  ;;  %6761 = vmatpush3.msra.mxu1 %v8729_v18 }
 0xfee   :  { %2484 = vmatpush1.msra.mxu0 %v8622_v15  ;;  %6762 = vmatprep.subr.mxu1 %v9924_v0 }
 0xfef   :  { %2485 = vmatprep.subr.mxu0 %v8629_v19  ;;  %6763 = vmatpush3.msra.mxu1 %v8737_v28 }
 0xff0   :  { %2486 = vmatpush1.msra.mxu0 %v8636_v20  ;;  %6764 = vmatprep.subr.mxu1 %v9924_v0 }
 0xff1   :  { %2487 = vmatprep.subr.mxu0 %v8643_v21  ;;  %6765 = vmatpush3.msra.mxu1 %v8745_v31 }
 0xff2   :  { %2488 = vmatpush1.msra.mxu0 %v8650_v22  ;;  %6766 = vmatprep.subr.mxu1 %v9924_v0 }
 0xff3   :  { %2489 = vmatprep.subr.mxu0 %v8657_v23  ;;  %6767 = vmatpush3.msra.mxu1 %v8753_v47 }
 0xff4   :  { %2490 = vmatpush1.msra.mxu0 %v8664_v24  ;;  %6768 = vmatprep.subr.mxu1 %v9924_v0 }
 0xff5   :  { %2491 = vmatprep.subr.mxu0 %v8671_v37  ;;  %6769 = vmatpush3.msra.mxu1 %v8761_v1 }
 0xff6   :  { %2492 = vmatpush1.msra.mxu0 %v8678_v42  ;;  %6770 = vmatprep.subr.mxu1 %v9924_v0 }
 0xff7   :  { %5990 = vmatmul.mubr.msk.f32.vlgmr.msra.gmra.mxu0 %vm507_vm2, %v8342_v56  ;;  %6775 = vmatprep.subr.mxu0 %v9924_v0  ;;  %v2293_v56 = vpop.f32.mrf.mxu1 }
 0xff8   :  { %6776 = vmatpush3.msra.mxu0 %v8719_v40  ;;  %6771 = vmatpush3.msra.mxu1 %v8769_v12  ;;  %v2294_v2 = vadd.f32 %v2293_v56, %v8702_v52 }
 0xff9   :  { %6777 = vmatprep.subr.mxu0 %v9924_v0  ;;  %6772 = vmatprep.mubr.msk.f32.mxu1 %vm7921_vm1, %v9924_v0  ;;  %v2295_v57 = vpop.f32.mrf.mxu1 }
 0xffa   :  { %6778 = vmatpush3.msra.mxu0 %v8725_v5  ;;  %6791 = vmatprep.mubr.msk.f32.mxu0 %vm7921_vm1, %v9924_v0  ;;  %v2296_v51 = vadd.f32 %v2295_v57, %v8711_v32 }
 0xffb   :  { %6779 = vmatprep.subr.mxu0 %v9924_v0  ;;  %2711 = vmatprep.subr.mxu1 %v8547_v6 }
 0xffc   :  { %6780 = vmatpush3.msra.mxu0 %v8731_v26 }
 0xffd   :  { %6781 = vmatprep.subr.mxu0 %v9924_v0 }
 0xffe   :  { %6782 = vmatpush3.msra.mxu0 %v8739_v29 }
 0xfff   :  { %6783 = vmatprep.subr.mxu0 %v9924_v0 }
0x1000   :  { %6784 = vmatpush3.msra.mxu0 %v8747_v44 }
0x1001   :  { %6785 = vmatprep.subr.mxu0 %v9924_v0 }
0x1002   :  { %6786 = vmatpush3.msra.mxu0 %v8757_v48 }
0x1003   :  { %6787 = vmatprep.subr.mxu0 %v9924_v0 }
0x1004   :  { %6788 = vmatpush3.msra.mxu0 %v8765_v49 }
0x1005   :  { %6789 = vmatprep.subr.mxu0 %v9924_v0 }
0x1006   :  { %6790 = vmatpush3.msra.mxu0 %v8773_v50 }
0x1007   :  { %6794 = vmatprep.subr.mxu0 %v9924_v0 }
0x10a7   :  { %v2369_v10 = vpop.f32.mrf.mxu0  ;;  %v2446_v3 = vpop.f32.mrf.mxu1 }
0x10a8   :  { %v2373_v25 = vadd.f32 %v2369_v10, %v2294_v2  ;;  %v2447_v61 = vadd.f32 %v8713_v34, %v2446_v3 }
0x10a9   :  { %v6736_v30 = vpop.f32.mrf.mxu0  ;;  %v6755_v59 = vpop.f32.mrf.mxu1 }
0x10aa   :  { %v5988_v35 = vmul.f32 -1.442695, %v2373_v25 }
0x10ac   :  { %7381 = vpow2.f32 %v5988_v35 }
0x10b9   :  { %v7382_v60 = vpop.eup %7381 }
0x10ba   :  { %v2377_v38 = vadd.f32 1.0, %v7382_v60 }
0x10bc   :  { %7383 = vrcp.f32 %v2377_v38 }
0x10c9   :  { %v7384_v45 = vpop.eup %7383 }
0x10ca   :  { %v2450_v53 = vmul.f32 %v7384_v45, %v2447_v61  ;;  %v2453_v56 = vsub.f32 1.0, %v7384_v45  ;;  %v2459_v10 = vmul.f32 %v7384_v45, %v8782_v54 }
0x10cc   :  { %v2451_v0 = vadd.f32 %v2450_v53, %v2296_v51 }
0x10ce   :  { %7385 = vtanh.f32 %v2451_v0  ;;  %v9947_v0 = vmov 0.0  }
0x10db   :  { %v7386_v16 = vpop.eup %7385 }
0x10dc   :  { %2455 = vrot.lane.b32.xlu0 %v7386_v16, %s7920_s17  ;;  %v2527_v16 = vpop.f32.mrf.mxu0 }
0x10dd   :  { %v2528_v54 = vadd.f32 %v2527_v16, %v8702_v52 }
0x114e   :  { %v2456_v2 = vpop.permute.xlu0 %2455 }
0x114f   :  { %v2458_v25 = vmul.f32 %v2456_v2, %v2453_v56 }
0x1151   :  { %v8852_v30 = vadd.f32 %v2459_v10, %v2458_v25 }
0x1153   :  { %2533 = vrot.lane.b32.xlu1 %v8852_v30, %s7920_s17 }
0x11c5   :  { %v8856_v3 = vpop.permute.xlu1 %2533 }
0x11c6   :  { %6773 = vmatmul.mubr.msk.f32.vlgmr.msra.gmra.mxu1 %vm507_vm2, %v8856_v3  ;;  %6792 = vmatmul.mubr.msk.f32.vlgmr.msra.gmra.mxu0 %vm507_vm2, %v8856_v3 }
0x11c7   :  { %2712 = vmatpush1.msra.mxu1 %v8578_v36  ;;  %2759 = vmatprep.mubr.f32.mxu1 %v9947_v0 }
0x11c8   :  { %2713 = vmatprep.subr.mxu1 %v8585_v41  ;;  %6795 = vmatpush3.msra.mxu0 %v8717_v62 }
0x11c9   :  { %2714 = vmatpush1.msra.mxu1 %v8594_v7  ;;  %6796 = vmatprep.subr.mxu0 %v9947_v0 }
0x11ca   :  { %2715 = vmatprep.subr.mxu1 %v8601_v9  ;;  %6797 = vmatpush3.msra.mxu0 %v8721_v63 }
0x11cb   :  { %2716 = vmatpush1.msra.mxu1 %v8608_v11  ;;  %6798 = vmatprep.subr.mxu0 %v9947_v0 }
0x11cc   :  { %2717 = vmatprep.subr.mxu1 %v8615_v14  ;;  %6799 = vmatpush3.msra.mxu0 %v8729_v18 }
0x11cd   :  { %2718 = vmatpush1.msra.mxu1 %v8622_v15  ;;  %6800 = vmatprep.subr.mxu0 %v9947_v0 }
0x11ce   :  { %2719 = vmatprep.subr.mxu1 %v8629_v19  ;;  %6801 = vmatpush3.msra.mxu0 %v8737_v28 }
0x11cf   :  { %2720 = vmatpush1.msra.mxu1 %v8636_v20  ;;  %6802 = vmatprep.subr.mxu0 %v9947_v0 }
0x11d0   :  { %2721 = vmatprep.subr.mxu1 %v8643_v21  ;;  %6803 = vmatpush3.msra.mxu0 %v8745_v31 }
0x11d1   :  { %2722 = vmatpush1.msra.mxu1 %v8650_v22  ;;  %6804 = vmatprep.subr.mxu0 %v9947_v0 }
0x11d2   :  { %2723 = vmatprep.subr.mxu1 %v8657_v23  ;;  %6805 = vmatpush3.msra.mxu0 %v8753_v47 }
0x11d3   :  { %2724 = vmatpush1.msra.mxu1 %v8664_v24  ;;  %6806 = vmatprep.subr.mxu0 %v9947_v0 }
0x11d4   :  { %2725 = vmatprep.subr.mxu1 %v8671_v37  ;;  %6807 = vmatpush3.msra.mxu0 %v8761_v1 }
0x11d5   :  { %2726 = vmatpush1.msra.mxu1 %v8678_v42  ;;  %6808 = vmatprep.subr.mxu0 %v9947_v0 }
0x11d6   :  { %5994 = vmatmul.mubr.msk.f32.vlgmr.msra.gmra.mxu1 %vm507_vm2, %v8399_v43  ;;  %6813 = vmatprep.subr.mxu1 %v9947_v0  ;;  %v2529_v43 = vpop.f32.mrf.mxu0 }
0x11d7   :  { %6814 = vmatpush3.msra.mxu1 %v8719_v40  ;;  %6809 = vmatpush3.msra.mxu0 %v8769_v12  ;;  %v2530_v2 = vadd.f32 %v2529_v43, %v8711_v32 }
0x11d8   :  { %6815 = vmatprep.subr.mxu1 %v9947_v0  ;;  %6810 = vmatprep.mubr.msk.f32.mxu0 %vm7921_vm1, %v9947_v0 }
0x11d9   :  { %6816 = vmatpush3.msra.mxu1 %v8725_v5  ;;  %6829 = vmatprep.mubr.msk.f32.mxu1 %vm7921_vm1, %v9947_v0 }
0x11da   :  { %6817 = vmatprep.subr.mxu1 %v9947_v0  ;;  %2945 = vmatprep.subr.mxu0 %v8547_v6 }
0x11db   :  { %6818 = vmatpush3.msra.mxu1 %v8731_v26 }
0x11dc   :  { %6819 = vmatprep.subr.mxu1 %v9947_v0 }
0x11dd   :  { %6820 = vmatpush3.msra.mxu1 %v8739_v29 }
0x11de   :  { %6821 = vmatprep.subr.mxu1 %v9947_v0 }
0x11df   :  { %6822 = vmatpush3.msra.mxu1 %v8747_v44 }
0x11e0   :  { %6823 = vmatprep.subr.mxu1 %v9947_v0 }
0x11e1   :  { %6824 = vmatpush3.msra.mxu1 %v8757_v48 }
0x11e2   :  { %6825 = vmatprep.subr.mxu1 %v9947_v0 }
0x11e3   :  { %6826 = vmatpush3.msra.mxu1 %v8765_v49 }
0x11e4   :  { %6827 = vmatprep.subr.mxu1 %v9947_v0 }
0x11e5   :  { %6828 = vmatpush3.msra.mxu1 %v8773_v50 }
0x11e6   :  { %6832 = vmatprep.subr.mxu1 %v9947_v0 }
0x1286   :  { %v2603_v57 = vpop.f32.mrf.mxu1  ;;  %v2680_v59 = vpop.f32.mrf.mxu0 }
0x1287   :  { %v2607_v35 = vadd.f32 %v2603_v57, %v2528_v54  ;;  %v2681_v53 = vadd.f32 %v8713_v34, %v2680_v59 }
0x1288   :  { %v6774_v60 = vpop.f32.mrf.mxu1  ;;  %v6793_v38 = vpop.f32.mrf.mxu0 }
0x1289   :  { %v5992_v61 = vmul.f32 -1.442695, %v2607_v35 }
0x128b   :  { %7387 = vpow2.f32 %v5992_v61 }
0x1298   :  { %v7388_v45 = vpop.eup %7387 }
0x1299   :  { %v2611_v51 = vadd.f32 1.0, %v7388_v45 }
0x129b   :  { %7389 = vrcp.f32 %v2611_v51 }
0x12a8   :  { %v7390_v56 = vpop.eup %7389 }
0x12a9   :  { %v2684_v10 = vmul.f32 %v7390_v56, %v2681_v53  ;;  %v2687_v16 = vsub.f32 1.0, %v7390_v56  ;;  %v2693_v57 = vmul.f32 %v7390_v56, %v8852_v30 }
0x12ab   :  { %v2685_v25 = vadd.f32 %v2684_v10, %v2530_v2 }
0x12ad   :  { %7391 = vtanh.f32 %v2685_v25 }
0x12ba   :  { %v7392_v8 = vpop.eup %7391 }
0x12bb   :  { %2689 = vrot.lane.b32.xlu0 %v7392_v8, %s7920_s17  ;;  %v2761_v8 = vpop.f32.mrf.mxu1 }
0x12bc   :  { %v2762_v30 = vadd.f32 %v2761_v8, %v8702_v52 }
0x132d   :  { %v2690_v54 = vpop.permute.xlu0 %2689 }
0x132e   :  { %v2692_v35 = vmul.f32 %v2690_v54, %v2687_v16 }
0x1330   :  { %v8922_v60 = vadd.f32 %v2693_v57, %v2692_v35 }
0x1332   :  { %2767 = vrot.lane.b32.xlu1 %v8922_v60, %s7920_s17 }
0x13a4   :  { %v8926_v59 = vpop.permute.xlu1 %2767 }
0x13a5   :  { %6811 = vmatmul.mubr.msk.f32.vlgmr.msra.gmra.mxu0 %vm507_vm2, %v8926_v59  ;;  %6830 = vmatmul.mubr.msk.f32.vlgmr.msra.gmra.mxu1 %vm507_vm2, %v8926_v59 }
0x13a6   :  { %2946 = vmatpush1.msra.mxu0 %v8578_v36  ;;  %2993 = vmatprep.mubr.f32.mxu0 %v9947_v0 }
0x13a7   :  { %2947 = vmatprep.subr.mxu0 %v8585_v41  ;;  %6833 = vmatpush3.msra.mxu1 %v8717_v62 }
0x13a8   :  { %2948 = vmatpush1.msra.mxu0 %v8594_v7  ;;  %6834 = vmatprep.subr.mxu1 %v9947_v0 }
0x13a9   :  { %2949 = vmatprep.subr.mxu0 %v8601_v9  ;;  %6835 = vmatpush3.msra.mxu1 %v8721_v63 }
0x13aa   :  { %2950 = vmatpush1.msra.mxu0 %v8608_v11  ;;  %6836 = vmatprep.subr.mxu1 %v9947_v0 }
0x13ab   :  { %2951 = vmatprep.subr.mxu0 %v8615_v14  ;;  %6837 = vmatpush3.msra.mxu1 %v8729_v18 }
0x13ac   :  { %2952 = vmatpush1.msra.mxu0 %v8622_v15  ;;  %6838 = vmatprep.subr.mxu1 %v9947_v0 }
0x13ad   :  { %2953 = vmatprep.subr.mxu0 %v8629_v19  ;;  %6839 = vmatpush3.msra.mxu1 %v8737_v28 }
0x13ae   :  { %2954 = vmatpush1.msra.mxu0 %v8636_v20  ;;  %6840 = vmatprep.subr.mxu1 %v9947_v0 }
0x13af   :  { %2955 = vmatprep.subr.mxu0 %v8643_v21  ;;  %6841 = vmatpush3.msra.mxu1 %v8745_v31 }
0x13b0   :  { %2956 = vmatpush1.msra.mxu0 %v8650_v22  ;;  %6842 = vmatprep.subr.mxu1 %v9947_v0 }
0x13b1   :  { %2957 = vmatprep.subr.mxu0 %v8657_v23  ;;  %6843 = vmatpush3.msra.mxu1 %v8753_v47 }
0x13b2   :  { %2958 = vmatpush1.msra.mxu0 %v8664_v24  ;;  %6844 = vmatprep.subr.mxu1 %v9947_v0 }
0x13b3   :  { %2959 = vmatprep.subr.mxu0 %v8671_v37  ;;  %6845 = vmatpush3.msra.mxu1 %v8761_v1 }
0x13b4   :  { %2960 = vmatpush1.msra.mxu0 %v8678_v42  ;;  %6846 = vmatprep.subr.mxu1 %v9947_v0 }
0x13b5   :  { %5998 = vmatmul.mubr.msk.f32.vlgmr.msra.gmra.mxu0 %vm507_vm2, %v8456_v13  ;;  %6851 = vmatprep.subr.mxu0 %v9947_v0  ;;  %v2763_v13 = vpop.f32.mrf.mxu1 }
0x13b6   :  { %6852 = vmatpush3.msra.mxu0 %v8719_v40  ;;  %6847 = vmatpush3.msra.mxu1 %v8769_v12  ;;  %v2764_v16 = vadd.f32 %v2763_v13, %v8711_v32 }
0x13b7   :  { %6853 = vmatprep.subr.mxu0 %v9947_v0  ;;  %6848 = vmatprep.mubr.msk.f32.mxu1 %vm7921_vm1, %v9947_v0 }
0x13b8   :  { %6854 = vmatpush3.msra.mxu0 %v8725_v5  ;;  %6867 = vmatprep.mubr.msk.f32.mxu0 %vm7921_vm1, %v9947_v0 }
0x13b9   :  { %6855 = vmatprep.subr.mxu0 %v9947_v0  ;;  %3179 = vmatprep.subr.mxu1 %v8547_v6 }
0x13ba   :  { %6856 = vmatpush3.msra.mxu0 %v8731_v26 }
0x13bb   :  { %6857 = vmatprep.subr.mxu0 %v9947_v0 }
0x13bc   :  { %6858 = vmatpush3.msra.mxu0 %v8739_v29 }
0x13bd   :  { %6859 = vmatprep.subr.mxu0 %v9947_v0 }
0x13be   :  { %6860 = vmatpush3.msra.mxu0 %v8747_v44 }
0x13bf   :  { %6861 = vmatprep.subr.mxu0 %v9947_v0 }
0x13c0   :  { %6862 = vmatpush3.msra.mxu0 %v8757_v48 }
0x13c1   :  { %6863 = vmatprep.subr.mxu0 %v9947_v0 }
0x13c2   :  { %6864 = vmatpush3.msra.mxu0 %v8765_v49 }
0x13c3   :  { %6865 = vmatprep.subr.mxu0 %v9947_v0 }
0x13c4   :  { %6866 = vmatpush3.msra.mxu0 %v8773_v50 }
0x13c5   :  { %6870 = vmatprep.subr.mxu0 %v9947_v0 }
0x1465   :  { %v2837_v43 = vpop.f32.mrf.mxu0  ;;  %v2914_v38 = vpop.f32.mrf.mxu1 }
0x1466   :  { %v2841_v61 = vadd.f32 %v2837_v43, %v2762_v30  ;;  %v2915_v10 = vadd.f32 %v8713_v34, %v2914_v38 }
0x1467   :  { %v6812_v45 = vpop.f32.mrf.mxu0  ;;  %v6831_v51 = vpop.f32.mrf.mxu1 }
0x1468   :  { %v5996_v53 = vmul.f32 -1.442695, %v2841_v61 }
0x146a   :  { %7393 = vpow2.f32 %v5996_v53 }
0x1477   :  { %v7394_v56 = vpop.eup %7393 }
0x1478   :  { %v2845_v2 = vadd.f32 1.0, %v7394_v56 }
0x147a   :  { %7395 = vrcp.f32 %v2845_v2 }
0x1487   :  { %v7396_v25 = vpop.eup %7395 }
0x1488   :  { %v2918_v54 = vmul.f32 %v7396_v25, %v2915_v10  ;;  %v2921_v8 = vsub.f32 1.0, %v7396_v25  ;;  %v2927_v43 = vmul.f32 %v7396_v25, %v8922_v60 }
0x148a   :  { %v2919_v57 = vadd.f32 %v2918_v54, %v2764_v16 }
0x148c   :  { %7397 = vtanh.f32 %v2919_v57 }
0x1499   :  { %v7398_v35 = vpop.eup %7397 }
0x149a   :  { %2923 = vrot.lane.b32.xlu0 %v7398_v35, %s7920_s17 }
0x150c   :  { %v2924_v30 = vpop.permute.xlu0 %2923 }
0x150d   :  { %v2926_v61 = vmul.f32 %v2924_v30, %v2921_v8 }
0x150f   :  { %v8992_v45 = vadd.f32 %v2927_v43, %v2926_v61 }
0x1511   :  { %3001 = vrot.lane.b32.xlu1 %v8992_v45, %s7920_s17 }
0x1583   :  { %v8996_v38 = vpop.permute.xlu1 %3001 }
0x1584   :  { %6849 = vmatmul.mubr.msk.f32.vlgmr.msra.gmra.mxu1 %vm507_vm2, %v8996_v38  ;;  %6868 = vmatmul.mubr.msk.f32.vlgmr.msra.gmra.mxu0 %vm507_vm2, %v8996_v38 }
0x1585   :  { %3180 = vmatpush1.msra.mxu1 %v8578_v36  ;;  %3227 = vmatprep.mubr.f32.mxu1 %v9947_v0 }
0x1586   :  { %3181 = vmatprep.subr.mxu1 %v8585_v41  ;;  %6871 = vmatpush3.msra.mxu0 %v8717_v62 }
0x1587   :  { %3182 = vmatpush1.msra.mxu1 %v8594_v7  ;;  %6872 = vmatprep.subr.mxu0 %v9947_v0 }
0x1588   :  { %3183 = vmatprep.subr.mxu1 %v8601_v9  ;;  %6873 = vmatpush3.msra.mxu0 %v8721_v63 }
0x1589   :  { %3184 = vmatpush1.msra.mxu1 %v8608_v11  ;;  %6874 = vmatprep.subr.mxu0 %v9947_v0 }
0x158a   :  { %3185 = vmatprep.subr.mxu1 %v8615_v14  ;;  %6875 = vmatpush3.msra.mxu0 %v8729_v18 }
0x158b   :  { %3186 = vmatpush1.msra.mxu1 %v8622_v15  ;;  %6876 = vmatprep.subr.mxu0 %v9947_v0 }
0x158c   :  { %3187 = vmatprep.subr.mxu1 %v8629_v19  ;;  %6877 = vmatpush3.msra.mxu0 %v8737_v28 }
0x158d   :  { %3188 = vmatpush1.msra.mxu1 %v8636_v20  ;;  %6878 = vmatprep.subr.mxu0 %v9947_v0 }
0x158e   :  { %3189 = vmatprep.subr.mxu1 %v8643_v21  ;;  %6879 = vmatpush3.msra.mxu0 %v8745_v31 }
0x158f   :  { %3190 = vmatpush1.msra.mxu1 %v8650_v22  ;;  %6880 = vmatprep.subr.mxu0 %v9947_v0 }
0x1590   :  { %3191 = vmatprep.subr.mxu1 %v8657_v23  ;;  %6881 = vmatpush3.msra.mxu0 %v8753_v47 }
0x1591   :  { %3192 = vmatpush1.msra.mxu1 %v8664_v24  ;;  %6882 = vmatprep.subr.mxu0 %v9947_v0 }
0x1592   :  { %3193 = vmatprep.subr.mxu1 %v8671_v37  ;;  %6883 = vmatpush3.msra.mxu0 %v8761_v1 }
0x1593   :  { %3194 = vmatpush1.msra.mxu1 %v8678_v42  ;;  %6884 = vmatprep.subr.mxu0 %v9947_v0 }
0x1594   :  { %6002 = vmatmul.mubr.msk.f32.vlgmr.msra.gmra.mxu1 %vm507_vm2, %v8513_v58  ;;  %6889 = vmatprep.subr.mxu1 %v9947_v0  ;;  %v2995_v58 = vpop.f32.mrf.mxu0 }
0x1595   :  { %6890 = vmatpush3.msra.mxu1 %v8719_v40  ;;  %6885 = vmatpush3.msra.mxu0 %v8769_v12  ;;  %v2996_v60 = vadd.f32 %v2995_v58, %v8702_v52 }
0x1596   :  { %6891 = vmatprep.subr.mxu1 %v9947_v0  ;;  %6886 = vmatprep.mubr.msk.f32.mxu0 %vm7921_vm1, %v9947_v0 }
0x1597   :  { %6892 = vmatpush3.msra.mxu1 %v8725_v5  ;;  %6905 = vmatprep.mubr.msk.f32.mxu1 %vm7921_vm1, %v9947_v0 }
0x1598   :  { %6893 = vmatprep.subr.mxu1 %v9947_v0  ;;  %3413 = vmatprep.subr.mxu0 %v8547_v6  ;;  %v2997_v6 = vpop.f32.mrf.mxu0 }
0x1599   :  { %6894 = vmatpush3.msra.mxu1 %v8731_v26  ;;  %v2998_v35 = vadd.f32 %v2997_v6, %v8711_v32  ;;  %v7477_v6 = vld [vmem:[%s9946_s3 + $0x60] sm:$0xff] }
0x159a   :  { %6895 = vmatprep.subr.mxu1 %v9947_v0 }
0x159b   :  { %6896 = vmatpush3.msra.mxu1 %v8739_v29 }
0x159c   :  { %6897 = vmatprep.subr.mxu1 %v9947_v0 }
0x159d   :  { %6898 = vmatpush3.msra.mxu1 %v8747_v44 }
0x159e   :  { %6899 = vmatprep.subr.mxu1 %v9947_v0 }
0x159f   :  { %6900 = vmatpush3.msra.mxu1 %v8757_v48 }
0x15a0   :  { %6901 = vmatprep.subr.mxu1 %v9947_v0 }
0x15a1   :  { %6902 = vmatpush3.msra.mxu1 %v8765_v49 }
0x15a2   :  { %6903 = vmatprep.subr.mxu1 %v9947_v0 }
0x15a3   :  { %6904 = vmatpush3.msra.mxu1 %v8773_v50 }
0x15a4   :  { %6908 = vmatprep.subr.mxu1 %v9947_v0 }
0x1644   :  { %v3071_v13 = vpop.f32.mrf.mxu1  ;;  %v3148_v51 = vpop.f32.mrf.mxu0 }
0x1645   :  { %v3075_v53 = vadd.f32 %v3071_v13, %v2996_v60  ;;  %v3149_v54 = vadd.f32 %v8713_v34, %v3148_v51 }
0x1646   :  { %v6850_v56 = vpop.f32.mrf.mxu1  ;;  %v6869_v2 = vpop.f32.mrf.mxu0 }
0x1647   :  { %v6000_v10 = vmul.f32 -1.442695, %v3075_v53  ;;  %v7479_v56 = vld [vmem:[%s9946_s3 + $0x50] sm:$0xff]  ;;  %v7481_v2 = vld [vmem:[%s9946_s3 + $0x40] sm:$0xff] }
0x1649   :  { %7399 = vpow2.f32 %v6000_v10  ;;  %v7483_v10 = vld [vmem:[%s9946_s3 + $0x30] sm:$0xff] }
0x1656   :  { %v7400_v25 = vpop.eup %7399 }
0x1657   :  { %v3079_v16 = vadd.f32 1.0, %v7400_v25  ;;  %v7485_v25 = vld [vmem:[%s9946_s3 + $0x20] sm:$0xff] }
0x1659   :  { %7401 = vrcp.f32 %v3079_v16  ;;  %v7488_v16 = vld [vmem:[%s9946_s3 + $0x8] sm:$0xff] }
0x1666   :  { %v7402_v57 = vpop.eup %7401 }
0x1667   :  { %v3152_v8 = vmul.f32 %v7402_v57, %v3149_v54  ;;  %v3155_v61 = vsub.f32 1.0, %v7402_v57  ;;  %v3161_v60 = vmul.f32 %v7402_v57, %v8992_v45  ;;  %v7476_v45 = vld [vmem:[%s9946_s3 + $0x68] sm:$0xff] }
0x1669   :  { %v3153_v30 = vadd.f32 %v3152_v8, %v2998_v35 }
0x166b   :  { %7403 = vtanh.f32 %v3153_v30 }
0x1678   :  { %v7404_v43 = vpop.eup %7403 }
0x1679   :  { %3157 = vrot.lane.b32.xlu0 %v7404_v43, %s7920_s17 }
0x16eb   :  { %v3158_v58 = vpop.permute.xlu0 %3157 }
0x16ec   :  { %v3160_v13 = vmul.f32 %v3158_v58, %v3155_v61 }
0x16ee   :  { %v9062_v53 = vadd.f32 %v3161_v60, %v3160_v13 }
0x16f0   :  { %3235 = vrot.lane.b32.xlu1 %v9062_v53, %s7920_s17 }
0x1762   :  { %v9066_v51 = vpop.permute.xlu1 %3235 }
0x1763   :  { %6887 = vmatmul.mubr.msk.f32.vlgmr.msra.gmra.mxu0 %vm507_vm2, %v9066_v51  ;;  %6906 = vmatmul.mubr.msk.f32.vlgmr.msra.gmra.mxu1 %vm507_vm2, %v9066_v51 }
0x1764   :  { %3414 = vmatpush1.msra.mxu0 %v8578_v36  ;;  %3461 = vmatprep.mubr.f32.mxu0 %v9947_v0  ;;  %v7474_v36 = vld [vmem:[%s9946_s3 + $0x78] sm:$0xff] }
0x1765   :  { %3415 = vmatprep.subr.mxu0 %v8585_v41  ;;  %6909 = vmatpush3.msra.mxu1 %v8717_v62 }
0x1766   :  { %3416 = vmatpush1.msra.mxu0 %v8594_v7  ;;  %6910 = vmatprep.subr.mxu1 %v9947_v0 }
0x1767   :  { %3417 = vmatprep.subr.mxu0 %v8601_v9  ;;  %6911 = vmatpush3.msra.mxu1 %v8721_v63 }
0x1768   :  { %3418 = vmatpush1.msra.mxu0 %v8608_v11  ;;  %6912 = vmatprep.subr.mxu1 %v9947_v0 }
0x1769   :  { %3419 = vmatprep.subr.mxu0 %v8615_v14  ;;  %6913 = vmatpush3.msra.mxu1 %v8729_v18 }
0x176a   :  { %3420 = vmatpush1.msra.mxu0 %v8622_v15  ;;  %6914 = vmatprep.subr.mxu1 %v9947_v0 }
0x176b   :  { %3421 = vmatprep.subr.mxu0 %v8629_v19  ;;  %6915 = vmatpush3.msra.mxu1 %v8737_v28 }
0x176c   :  { %3422 = vmatpush1.msra.mxu0 %v8636_v20  ;;  %6916 = vmatprep.subr.mxu1 %v9947_v0 }
0x176d   :  { %3423 = vmatprep.subr.mxu0 %v8643_v21  ;;  %6917 = vmatpush3.msra.mxu1 %v8745_v31 }
0x176e   :  { %3424 = vmatpush1.msra.mxu0 %v8650_v22  ;;  %6918 = vmatprep.subr.mxu1 %v9947_v0 }
0x176f   :  { %3425 = vmatprep.subr.mxu0 %v8657_v23  ;;  %6919 = vmatpush3.msra.mxu1 %v8753_v47 }
0x1770   :  { %3426 = vmatpush1.msra.mxu0 %v8664_v24  ;;  %6920 = vmatprep.subr.mxu1 %v9947_v0 }
0x1771   :  { %3427 = vmatprep.subr.mxu0 %v8671_v37  ;;  %6921 = vmatpush3.msra.mxu1 %v8761_v1 }
0x1772   :  { %3428 = vmatpush1.msra.mxu0 %v8678_v42  ;;  %6922 = vmatprep.subr.mxu1 %v9947_v0 }
0x1773   :  { %6006 = vmatmul.mubr.msk.f32.vlgmr.msra.gmra.mxu0 %vm507_vm2, %v8580_v39  ;;  %6927 = vmatprep.subr.mxu0 %v9947_v0  ;;  %v3229_v39 = vpop.f32.mrf.mxu1 }
0x1774   :  { %6928 = vmatpush3.msra.mxu0 %v8719_v40  ;;  %6923 = vmatpush3.msra.mxu1 %v8769_v12  ;;  %v3230_v7 = vadd.f32 %v3229_v39, %v8702_v52 }
0x1775   :  { %6929 = vmatprep.subr.mxu0 %v9947_v0  ;;  %6924 = vmatprep.mubr.msk.f32.mxu1 %vm7921_vm1, %v9947_v0  ;;  %v3231_v41 = vpop.f32.mrf.mxu1 }
0x1776   :  { %6930 = vmatpush3.msra.mxu0 %v8725_v5  ;;  %6943 = vmatprep.mubr.msk.f32.mxu0 %vm7921_vm1, %v9947_v0  ;;  %v3232_v37 = vadd.f32 %v3231_v41, %v8711_v32  ;;  %v1925_v41 = vadd.f32 %v8698_v46, %v8144_v17 }
0x1777   :  { %6931 = vmatprep.subr.mxu0 %v9947_v0  ;;  %3652 = vmatprep.subr.mxu1 %v7474_v36 }
0x1778   :  { %6932 = vmatpush3.msra.mxu0 %v8731_v26 }
0x1779   :  { %6933 = vmatprep.subr.mxu0 %v9947_v0 }
0x177a   :  { %6934 = vmatpush3.msra.mxu0 %v8739_v29 }
0x177b   :  { %6935 = vmatprep.subr.mxu0 %v9947_v0 }
0x177c   :  { %6936 = vmatpush3.msra.mxu0 %v8747_v44 }
0x177d   :  { %6937 = vmatprep.subr.mxu0 %v9947_v0 }
0x177e   :  { %6938 = vmatpush3.msra.mxu0 %v8757_v48 }
0x177f   :  { %6939 = vmatprep.subr.mxu0 %v9947_v0 }
0x1780   :  { %6940 = vmatpush3.msra.mxu0 %v8765_v49 }
0x1781   :  { %6941 = vmatprep.subr.mxu0 %v9947_v0 }
0x1782   :  { %6942 = vmatpush3.msra.mxu0 %v8773_v50  ;;  %v7475_v50 = vld [vmem:[%s9946_s3 + $0x70] sm:$0xff] }
0x1783   :  { %6946 = vmatprep.subr.mxu0 %v9947_v0 }
0x1823   :  { %v3305_v9 = vpop.f32.mrf.mxu0  ;;  %v3382_v11 = vpop.f32.mrf.mxu1 }
0x1824   :  { %v3309_v14 = vadd.f32 %v3305_v9, %v3230_v7  ;;  %v3383_v23 = vadd.f32 %v8713_v34, %v3382_v11 }
0x1825   :  { %v6888_v15 = vpop.f32.mrf.mxu0  ;;  %v6907_v19 = vpop.f32.mrf.mxu1 }
0x1826   :  { %v6004_v20 = vmul.f32 -1.442695, %v3309_v14  ;;  %v2080_v14 = vadd.f32 %v8708_v27, %v1925_v41  ;;  %v9216_v15 = vld [vmem:[#allocation19 + $0x78] sm:$0xff]  ;;  %v2082_v27 = vsub.f32 1.0, %v8705_v4 }
0x1828   :  { %7405 = vpow2.f32 %v6004_v20 }
0x1833   :  { %v3463_v54 = vpop.f32.mrf.mxu0 }
0x1834   :  { %v3464_v35 = vadd.f32 %v3463_v54, %v8702_v52  ;;  %v7497_v54 = vld [vmem:[#allocation14 + $0x8] sm:$0xff] }
0x1835   :  { %v7406_v21 = vpop.eup %7405  ;;  %v3465_v57 = vpop.f32.mrf.mxu0 }
0x1836   :  { %v3313_v22 = vadd.f32 1.0, %v7406_v21  ;;  %v3466_v7 = vadd.f32 %v3465_v57, %v8711_v32  ;;  %v7498_v57 = vld [vmem:[#allocation14] sm:$0xff] }
0x1838   :  { %7407 = vrcp.f32 %v3313_v22 }
0x1845   :  { %v7408_v24 = vpop.eup %7407 }
0x1846   :  { %v3386_v42 = vmul.f32 %v7408_v24, %v3383_v23  ;;  %v3389_v26 = vsub.f32 1.0, %v7408_v24  ;;  %v3395_v44 = vmul.f32 %v7408_v24, %v9062_v53  ;;  %v9209_v53 = vld [vmem:[#allocation17] ss:$0 sm:$0xff] }
0x1848   :  { %v3387_v40 = vadd.f32 %v3386_v42, %v3232_v37  ;;  %v2088_v37 = vmul.f32 %v8705_v4, %v8571_v33  ;;  %v9241_v33 = vld [vmem:[#allocation19 + $0x58] sm:$0xff]  ;;  %v9245_v4 = vld [vmem:[#allocation19 + $0x50] sm:$0xff] }
0x184a   :  { %7409 = vtanh.f32 %v3387_v40 }
0x1857   :  { %v7410_v5 = vpop.eup %7409 }
0x1858   :  { %3391 = vrot.lane.b32.xlu0 %v7410_v5, %s7920_s17  ;;  %v9230_v5 = vld [vmem:[#allocation19 + $0x70] sm:$0xff] }
0x18ca   :  { %v3392_v29 = vpop.permute.xlu0 %3391 }
0x18cb   :  { %v3394_v48 = vmul.f32 %v3392_v29, %v3389_v26  ;;  %v9234_v29 = vld [vmem:[#allocation19 + $0x68] sm:$0xff] }
0x18cd   :  { %v9134_v49 = vadd.f32 %v3395_v44, %v3394_v48  ;;  %v9238_v44 = vld [vmem:[#allocation19 + $0x60] sm:$0xff] }
0x18cf   :  { %3469 = vrot.lane.b32.xlu1 %v9134_v49, %s7920_s17 }
0x1941   :  { %v9138_v34 = vpop.permute.xlu1 %3469 }
0x1942   :  { %6925 = vmatmul.mubr.msk.f32.vlgmr.msra.gmra.mxu1 %vm507_vm2, %v9138_v34  ;;  %6944 = vmatmul.mubr.msk.f32.vlgmr.msra.gmra.mxu0 %vm507_vm2, %v9138_v34 }
0x1943   :  { %6947 = vmatpush3.msra.mxu0 %v8717_v62  ;;  %3653 = vmatpush1.msra.mxu1 %v7475_v50  ;;  %v7478_v62 = vld [vmem:[%s9946_s3 + $0x58] sm:$0xff] }
0x1944   :  { %6948 = vmatprep.subr.mxu0 %v9947_v0  ;;  %3654 = vmatprep.subr.mxu1 %v7476_v45  ;;  %v9252_v50 = vld [vmem:[#allocation19 + $0x40] sm:$0xff]  ;;  %v7491_v45 = vld [vmem:[#allocation14 + $0x38] sm:$0xff] }
0x1945   :  { %6949 = vmatpush3.msra.mxu0 %v8721_v63  ;;  %3655 = vmatpush1.msra.mxu1 %v7477_v6  ;;  %v7480_v63 = vld [vmem:[%s9946_s3 + $0x48] sm:$0xff]  ;;  %v9255_v6 = vld [vmem:[#allocation19 + $0x38] sm:$0xff] }
0x1946   :  { %6950 = vmatprep.subr.mxu0 %v9947_v0  ;;  %3656 = vmatprep.subr.mxu1 %v7478_v62  ;;  %v9259_v62 = vld [vmem:[#allocation19 + $0x30] sm:$0xff] }
0x1947   :  { %6951 = vmatpush3.msra.mxu0 %v8729_v18  ;;  %3657 = vmatpush1.msra.mxu1 %v7479_v56  ;;  %v7482_v18 = vld [vmem:[%s9946_s3 + $0x38] sm:$0xff]  ;;  %v7492_v56 = vld [vmem:[#allocation14 + $0x30] sm:$0xff] }
0x1948   :  { %6952 = vmatprep.subr.mxu0 %v9947_v0  ;;  %3658 = vmatprep.subr.mxu1 %v7480_v63  ;;  %v9262_v63 = vld [vmem:[#allocation19 + $0x28] sm:$0xff] }
0x1949   :  { %6953 = vmatpush3.msra.mxu0 %v8737_v28  ;;  %3659 = vmatpush1.msra.mxu1 %v7481_v2  ;;  %v7484_v28 = vld [vmem:[%s9946_s3 + $0x28] sm:$0xff]  ;;  %v9266_v2 = vld [vmem:[#allocation19 + $0x20] sm:$0xff] }
0x194a   :  { %6954 = vmatprep.subr.mxu0 %v9947_v0  ;;  %3660 = vmatprep.subr.mxu1 %v7482_v18  ;;  %v7493_v18 = vld [vmem:[#allocation14 + $0x28] sm:$0xff] }
0x194b   :  { %6955 = vmatpush3.msra.mxu0 %v8745_v31  ;;  %3661 = vmatpush1.msra.mxu1 %v7483_v10  ;;  %v7486_v31 = vld [vmem:[%s9946_s3 + $0x18] sm:$0xff]  ;;  %v9269_v10 = vld [vmem:[#allocation19 + $0x18] sm:$0xff] }
0x194c   :  { %6956 = vmatprep.subr.mxu0 %v9947_v0  ;;  %3662 = vmatprep.subr.mxu1 %v7484_v28  ;;  %v9273_v28 = vld [vmem:[#allocation19 + $0x10] sm:$0xff] }
0x194d   :  { %6957 = vmatpush3.msra.mxu0 %v8753_v47  ;;  %3663 = vmatpush1.msra.mxu1 %v7485_v25  ;;  %v7487_v47 = vld [vmem:[%s9946_s3 + $0x10] sm:$0xff] }
0x194e   :  { %6958 = vmatprep.subr.mxu0 %v9947_v0  ;;  %3664 = vmatprep.subr.mxu1 %v7486_v31  ;;  %v7494_v25 = vld [vmem:[#allocation14 + $0x20] sm:$0xff]  ;;  %v9276_v31 = vld [vmem:[#allocation19 + $0x8] sm:$0xff] }
0x194f   :  { %6959 = vmatpush3.msra.mxu0 %v8761_v1  ;;  %6962 = vmatprep.mubr.msk.f32.mxu0 %vm7921_vm1, %v9947_v0  ;;  %v7489_v1 = vld [vmem:[%s9946_s3] sm:$0xff] }
0x1950   :  { %6960 = vmatprep.subr.mxu0 %v9947_v0  ;;  %3665 = vmatpush1.msra.mxu1 %v7487_v47  ;;  %v9280_v47 = vld [vmem:[#allocation19] sm:$0xff] }
0x1951   :  { %6961 = vmatpush3.msra.mxu0 %v8769_v12  ;;  %3666 = vmatprep.subr.mxu1 %v7488_v16  ;;  %v7495_v16 = vld [vmem:[#allocation14 + $0x18] sm:$0xff] }
0x1952   :  { %3667 = vmatpush1.msra.mxu1 %v7489_v1  ;;  %3700 = vmatprep.mubr.f32.mxu1 %v9947_v0  ;;  %v7496_v1 = vld [vmem:[#allocation14 + $0x10] sm:$0xff] }
0x1953   :  { %6965 = vmatprep.subr.mxu1 %v9947_v0  ;;  %3937 = vmatprep.subr.mxu0 %v9216_v15 }
0x1a02   :  { %v3539_v8 = vpop.f32.mrf.mxu1  ;;  %v3616_v12 = vpop.f32.mrf.mxu0 }
0x1a03   :  { %v3543_v30 = vadd.f32 %v3539_v8, %v3464_v35  ;;  %v3617_v36 = vadd.f32 %v9209_v53, %v3616_v12 }
0x1a04   :  { %v6926_v43 = vpop.f32.mrf.mxu1  ;;  %v6945_v61 = vpop.f32.mrf.mxu0 }
0x1a05   :  { %v6008_v58 = vmul.f32 -1.442695, %v3543_v30  ;;  %v3902_v61 = vld [vmem:[#allocation22] sm:$0x3] }
0x1a07   :  { %7411 = vpow2.f32 %v6008_v58  ;;  %v9948_v58 = vld [vmem:[#allocation40_spill] sm:$0xff] }
0x1a14   :  { %v7412_v60 = vpop.eup %7411 }
0x1a15   :  { %v3547_v13 = vadd.f32 1.0, %v7412_v60  ;;  %v9321_v60 = vrot.slane %v3902_v61, %v9948_v58  ;;  %v9423_v58 = vld [vmem:[#allocation20] sm:$0xff] }
0x1a17   :  { %7413 = vrcp.f32 %v3547_v13 }
0x1a24   :  { %v7414_v39 = vpop.eup %7413 }
0x1a25   :  { %v3620_v9 = vmul.f32 %v7414_v39, %v3617_v36  ;;  %v3623_v21 = vsub.f32 1.0, %v7414_v39  ;;  %v3629_v46 = vmul.f32 %v7414_v39, %v9134_v49  ;;  %v9248_v49 = vld [vmem:[#allocation19 + $0x48] sm:$0xff] }
0x1a27   :  { %v3621_v11 = vadd.f32 %v3620_v9, %v3466_v7 }
0x1a29   :  { %7415 = vtanh.f32 %v3621_v11 }
0x1a2a   :  { %7417 = vtanh.f32 %v2080_v14 }
0x1a36   :  { %v7416_v19 = vpop.eup %7415 }
0x1a37   :  { %3625 = vrot.lane.b32.xlu0 %v7416_v19, %s7920_s17  ;;  %v7418_v20 = vpop.eup %7417 }
0x1a3b   :  { %2084 = vrot.lane.b32.xlu0 %v7418_v20, %s7920_s17 }
0x1aa9   :  { %v3626_v17 = vpop.permute.xlu0 %3625 }
0x1aaa   :  { %v3628_v22 = vmul.f32 %v3626_v17, %v3623_v21 }
0x1aac   :  { %v9222_v23 = vadd.f32 %v3629_v46, %v3628_v22  ;;  %v9949_v22 = vld [vmem:[#allocation41_spill] sm:$0xff] }
0x1aad   :  { %v2085_v24 = vpop.permute.xlu0 %2084 }
0x1aae   :  { %v2087_v42 = vmul.f32 %v2085_v24, %v2082_v27  ;;  %3708 = vrot.lane.b32.xlu1 %v9222_v23, %s7920_s17  ;;  %v9332_v27 = vrot.slane %v3902_v61, %v9949_v22  ;;  %v9334_v24 = vld [vmem:[#allocation23] ss:$0 sm:$0xff]  ;;  %v9414_v61 = vld [vmem:[%s9910_s12] sm:$0xff] }
0x1ab0   :  { %v2089_v40 = vadd.f32 %v2088_v37, %v2087_v42 }
0x1ab2   :  { %3632 = vrot.lane.b32.xlu0 %v2089_v40, %s7920_s17 }
0x1b20   :  { %v9232_v26 = vpop.permute.xlu1 %3708 }
0x1b21   :  { %6963 = vmatmul.mubr.msk.f32.vlgmr.msra.gmra.mxu0 %vm507_vm2, %v9232_v26 }
0x1b22   :  { %3938 = vmatpush1.msra.mxu0 %v9230_v5  ;;  %3985 = vmatprep.mubr.f32.mxu0 %v9947_v0 }
0x1b23   :  { %3939 = vmatprep.subr.mxu0 %v9234_v29 }
0x1b24   :  { %3940 = vmatpush1.msra.mxu0 %v9238_v44  ;;  %v3633_v48 = vpop.permute.xlu0 %3632 }
0x1b25   :  { %3941 = vmatprep.subr.mxu0 %v9241_v33  ;;  %6010 = vmatmul.mubr.msk.f32.vlgmr.msra.gmra.mxu1 %vm507_vm2, %v3633_v48 }
0x1b26   :  { %6966 = vmatpush3.msra.mxu1 %v7491_v45  ;;  %3942 = vmatpush1.msra.mxu0 %v9245_v4  ;;  %v9343_v45 = vld [vmem:[#allocation20 + $0x38] sm:$0xff] }
0x1b27   :  { %6967 = vmatprep.subr.mxu1 %v9947_v0  ;;  %3943 = vmatprep.subr.mxu0 %v9248_v49 }
0x1b28   :  { %6968 = vmatpush3.msra.mxu1 %v7492_v56  ;;  %3944 = vmatpush1.msra.mxu0 %v9252_v50  ;;  %v9348_v56 = vld [vmem:[%s9910_s12 + $0x30] sm:$0xff] }
0x1b29   :  { %6969 = vmatprep.subr.mxu1 %v9947_v0  ;;  %3945 = vmatprep.subr.mxu0 %v9255_v6 }
0x1b2a   :  { %6970 = vmatpush3.msra.mxu1 %v7493_v18  ;;  %3946 = vmatpush1.msra.mxu0 %v9259_v62  ;;  %v9352_v18 = vld [vmem:[#allocation20 + $0x30] sm:$0xff] }
0x1b2b   :  { %6971 = vmatprep.subr.mxu1 %v9947_v0  ;;  %3947 = vmatprep.subr.mxu0 %v9262_v63 }
0x1b2c   :  { %6972 = vmatpush3.msra.mxu1 %v7494_v25  ;;  %3948 = vmatpush1.msra.mxu0 %v9266_v2  ;;  %v9359_v25 = vld [vmem:[%s9910_s12 + $0x28] sm:$0xff] }
0x1b2d   :  { %6973 = vmatprep.subr.mxu1 %v9947_v0  ;;  %3949 = vmatprep.subr.mxu0 %v9269_v10 }
0x1b2e   :  { %6974 = vmatpush3.msra.mxu1 %v7495_v16  ;;  %3950 = vmatpush1.msra.mxu0 %v9273_v28  ;;  %v9361_v16 = vld [vmem:[#allocation20 + $0x28] sm:$0xff] }
0x1b2f   :  { %6975 = vmatprep.subr.mxu1 %v9947_v0  ;;  %3951 = vmatprep.subr.mxu0 %v9276_v31 }
0x1b30   :  { %6976 = vmatpush3.msra.mxu1 %v7496_v1  ;;  %3952 = vmatpush1.msra.mxu0 %v9280_v47  ;;  %v9370_v1 = vld [vmem:[%s9910_s12 + $0x20] sm:$0xff] }
0x1b31   :  { %6977 = vmatprep.subr.mxu1 %v9947_v0  ;;  %6015 = vmatmul.mubr.msk.f32.vlgmr.msra.gmra.mxu0 %vm507_vm2, %v8786_v55 }
0x1b32   :  { %6978 = vmatpush3.msra.mxu1 %v7497_v54  ;;  %6981 = vmatprep.mubr.msk.f32.mxu1 %vm7921_vm1, %v9947_v0  ;;  %v9372_v54 = vld [vmem:[#allocation20 + $0x20] sm:$0xff] }
0x1b33   :  { %6979 = vmatprep.subr.mxu1 %v9947_v0  ;;  %6984 = vmatprep.subr.mxu0 %v9947_v0 }
0x1b34   :  { %6980 = vmatpush3.msra.mxu1 %v7498_v57  ;;  %7000 = vmatprep.mubr.msk.f32.mxu0 %vm7921_vm1, %v9947_v0  ;;  %v9381_v57 = vld [vmem:[%s9910_s12 + $0x18] sm:$0xff] }
0x1b35   :  { %6982 = vmatmul.mubr.msk.f32.vlgmr.msra.gmra.mxu1 %vm507_vm2, %v9232_v26  ;;  %4023 = vmatprep.subr.mxu1 %v9216_v15 }
0x1b36   :  { %4024 = vmatpush1.msra.mxu1 %v9230_v5  ;;  %4071 = vmatprep.mubr.f32.mxu1 %v9947_v0 }
0x1b37   :  { %4025 = vmatprep.subr.mxu1 %v9234_v29 }
0x1b38   :  { %4026 = vmatpush1.msra.mxu1 %v9238_v44 }
0x1b39   :  { %4027 = vmatprep.subr.mxu1 %v9241_v33 }
0x1b3a   :  { %4028 = vmatpush1.msra.mxu1 %v9245_v4 }
0x1b3b   :  { %4029 = vmatprep.subr.mxu1 %v9248_v49 }
0x1b3c   :  { %4030 = vmatpush1.msra.mxu1 %v9252_v50 }
0x1b3d   :  { %4031 = vmatprep.subr.mxu1 %v9255_v6 }
0x1b3e   :  { %4032 = vmatpush1.msra.mxu1 %v9259_v62 }
0x1b3f   :  { %4033 = vmatprep.subr.mxu1 %v9262_v63 }
0x1b40   :  { %4034 = vmatpush1.msra.mxu1 %v9266_v2 }
0x1b41   :  { %4035 = vmatprep.subr.mxu1 %v9269_v10 }
0x1b42   :  { %4036 = vmatpush1.msra.mxu1 %v9273_v28 }
0x1b43   :  { %4037 = vmatprep.subr.mxu1 %v9276_v31 }
0x1b44   :  { %4038 = vmatpush1.msra.mxu1 %v9280_v47 }
0x1b45   :  { %6017 = vmatmul.mubr.msk.f32.vlgmr.msra.gmra.mxu1 %vm507_vm2, %v8856_v3  ;;  %7003 = vmatprep.subr.mxu1 %v9947_v0 }
0x1b46   :  { %7019 = vmatprep.mubr.msk.f32.mxu1 %vm7921_vm1, %v9947_v0  ;;  %7004 = vmatpush3.msra.mxu1 %v9343_v45 }
0x1b47   :  { %7005 = vmatprep.subr.mxu1 %v9947_v0 }
0x1b48   :  { %7006 = vmatpush3.msra.mxu1 %v9352_v18 }
0x1b49   :  { %7007 = vmatprep.subr.mxu1 %v9947_v0 }
0x1b4a   :  { %7008 = vmatpush3.msra.mxu1 %v9361_v16 }
0x1b4b   :  { %7009 = vmatprep.subr.mxu1 %v9947_v0 }
0x1b4c   :  { %7010 = vmatpush3.msra.mxu1 %v9372_v54 }
0x1b4d   :  { %7011 = vmatprep.subr.mxu1 %v9947_v0 }
0x1be1   :  { %v3778_v55 = vpop.f32.mrf.mxu0 }
0x1be3   :  { %v6964_v35 = vpop.f32.mrf.mxu0 }
0x1be4   :  { %v9392_v35 = vld [vmem:[%s9910_s12 + $0x10] sm:$0xff] }
0x1be5   :  { %v3702_v8 = vpop.f32.mrf.mxu1 }
0x1be6   :  { %v3703_v12 = vadd.f32 %v3702_v8, %v8702_v52  ;;  %v9396_v8 = vld [vmem:[#allocation20 + $0x10] sm:$0xff] }
0x1be7   :  { %v3704_v36 = vpop.f32.mrf.mxu1 }
0x1be8   :  { %v3782_v30 = vadd.f32 %v3778_v55, %v3703_v12  ;;  %v3705_v21 = vadd.f32 %v3704_v36, %v8711_v32  ;;  %v9341_v32 = vld [vmem:[%s9910_s12 + $0x38] sm:$0xff]  ;;  %v9383_v55 = vld [vmem:[#allocation20 + $0x18] sm:$0xff] }
0x1be9   :  { %6985 = vmatpush3.msra.mxu0 %v9341_v32  ;;  %7012 = vmatpush3.msra.mxu1 %v9383_v55 }
0x1bea   :  { %v6012_v43 = vmul.f32 -1.442695, %v3782_v30  ;;  %6986 = vmatprep.subr.mxu0 %v9947_v0  ;;  %7013 = vmatprep.subr.mxu1 %v9947_v0  ;;  %v9403_v30 = vld [vmem:[%s9910_s12 + $0x8] sm:$0xff] }
0x1beb   :  { %6987 = vmatpush3.msra.mxu0 %v9348_v56  ;;  %7014 = vmatpush3.msra.mxu1 %v9396_v8 }
0x1bec   :  { %7419 = vpow2.f32 %v6012_v43  ;;  %6988 = vmatprep.subr.mxu0 %v9947_v0  ;;  %v9407_v43 = vld [vmem:[#allocation20 + $0x8] sm:$0xff]  ;;  %7015 = vmatprep.subr.mxu1 %v9947_v0 }
0x1bed   :  { %6989 = vmatpush3.msra.mxu0 %v9359_v25  ;;  %7016 = vmatpush3.msra.mxu1 %v9407_v43 }
0x1bee   :  { %6990 = vmatprep.subr.mxu0 %v9947_v0  ;;  %7017 = vmatprep.subr.mxu1 %v9947_v0 }
0x1bef   :  { %6991 = vmatpush3.msra.mxu0 %v9370_v1  ;;  %7018 = vmatpush3.msra.mxu1 %v9423_v58 }
0x1bf0   :  { %6992 = vmatprep.subr.mxu0 %v9947_v0  ;;  %7022 = vmatprep.subr.mxu1 %v9947_v0 }
0x1bf1   :  { %v3987_v13 = vpop.f32.mrf.mxu0  ;;  %6993 = vmatpush3.msra.mxu0 %v9381_v57 }
0x1bf2   :  { %v3988_v3 = vadd.f32 %v3987_v13, %v9321_v60  ;;  %6994 = vmatprep.subr.mxu0 %v9947_v0 }
0x1bf3   :  { %v3989_v37 = vpop.f32.mrf.mxu0  ;;  %6995 = vmatpush3.msra.mxu0 %v9392_v35 }
0x1bf4   :  { %v6016_v39 = vmul.f32 -1.442695, %v3988_v3  ;;  %v3990_v40 = vadd.f32 %v3989_v37, %v9332_v27  ;;  %6996 = vmatprep.subr.mxu0 %v9947_v0 }
0x1bf5   :  { %v3855_v41 = vpop.f32.mrf.mxu1  ;;  %6997 = vmatpush3.msra.mxu0 %v9403_v30 }
0x1bf6   :  { %7421 = vpow2.f32 %v6016_v39  ;;  %v3856_v19 = vadd.f32 %v9209_v53, %v3855_v41  ;;  %6998 = vmatprep.subr.mxu0 %v9947_v0 }
0x1bf7   :  { %v6983_v7 = vpop.f32.mrf.mxu1  ;;  %6999 = vmatpush3.msra.mxu0 %v9414_v61 }
0x1bf8   :  { %4257 = vmatprep.subr.mxu0 %v9216_v15 }
0x1bf9   :  { %v7420_v9 = vpop.eup %7419 }
0x1bfa   :  { %v3786_v11 = vadd.f32 1.0, %v7420_v9 }
0x1bfc   :  { %7423 = vrcp.f32 %v3786_v11 }
0x1c03   :  { %v7422_v14 = vpop.eup %7421 }
0x1c04   :  { %v3995_v52 = vadd.f32 1.0, %v7422_v14 }
0x1c06   :  { %7425 = vrcp.f32 %v3995_v52 }
0x1c09   :  { %v9325_v20 = vpop.eup %7423 }
0x1c0a   :  { %v3859_v17 = vmul.f32 %v9325_v20, %v3856_v19 }
0x1c0c   :  { %v9329_v46 = vadd.f32 %v3859_v17, %v3705_v21 }
0x1c13   :  { %v7426_v42 = vpop.eup %7425 }
0x1c14   :  { %v3998_v48 = vmul.f32 %v7426_v42, %v9334_v24  ;;  %v4001_v13 = vsub.f32 1.0, %v7426_v42 }
0x1c16   :  { %v3999_v53 = vadd.f32 %v3998_v48, %v3990_v40 }
0x1c18   :  { %7427 = vtanh.f32 %v3999_v53 }
0x1c25   :  { %v7428_v12 = vpop.eup %7427 }
0x1c26   :  { %4003 = vrot.lane.b32.xlu1 %v7428_v12, %s7920_s17 }
0x1c98   :  { %v4004_v3 = vpop.permute.xlu1 %4003 }
0x1c99   :  { %v9427_v36 = vmul.f32 %v4004_v3, %v4001_v13 }
0x1c9b   :  { %4079 = vrot.lane.b32.xlu1 %v9427_v36, %s7920_s17 }
0x1d0d   :  { %v4080_v39 = vpop.permute.xlu1 %4079 }
0x1d0e   :  { %7001 = vmatmul.mubr.msk.f32.vlgmr.msra.gmra.mxu0 %vm507_vm2, %v4080_v39  ;;  %7020 = vmatmul.mubr.msk.f32.vlgmr.msra.gmra.mxu1 %vm507_vm2, %v4080_v39 }
0x1d0f   :  { %4258 = vmatpush1.msra.mxu0 %v9230_v5  ;;  %4305 = vmatprep.mubr.f32.mxu0 %v9947_v0 }
0x1d10   :  { %4259 = vmatprep.subr.mxu0 %v9234_v29  ;;  %7023 = vmatpush3.msra.mxu1 %v9341_v32 }
0x1d11   :  { %4260 = vmatpush1.msra.mxu0 %v9238_v44  ;;  %7024 = vmatprep.subr.mxu1 %v9947_v0 }
0x1d12   :  { %4261 = vmatprep.subr.mxu0 %v9241_v33  ;;  %7025 = vmatpush3.msra.mxu1 %v9348_v56 }
0x1d13   :  { %4262 = vmatpush1.msra.mxu0 %v9245_v4  ;;  %7026 = vmatprep.subr.mxu1 %v9947_v0 }
0x1d14   :  { %4263 = vmatprep.subr.mxu0 %v9248_v49  ;;  %7027 = vmatpush3.msra.mxu1 %v9359_v25 }
0x1d15   :  { %4264 = vmatpush1.msra.mxu0 %v9252_v50  ;;  %7028 = vmatprep.subr.mxu1 %v9947_v0 }
0x1d16   :  { %4265 = vmatprep.subr.mxu0 %v9255_v6  ;;  %7029 = vmatpush3.msra.mxu1 %v9370_v1 }
0x1d17   :  { %4266 = vmatpush1.msra.mxu0 %v9259_v62  ;;  %7030 = vmatprep.subr.mxu1 %v9947_v0 }
0x1d18   :  { %4267 = vmatprep.subr.mxu0 %v9262_v63  ;;  %7031 = vmatpush3.msra.mxu1 %v9381_v57 }
0x1d19   :  { %4268 = vmatpush1.msra.mxu0 %v9266_v2  ;;  %7032 = vmatprep.subr.mxu1 %v9947_v0 }
0x1d1a   :  { %4269 = vmatprep.subr.mxu0 %v9269_v10  ;;  %7033 = vmatpush3.msra.mxu1 %v9392_v35 }
0x1d1b   :  { %4270 = vmatpush1.msra.mxu0 %v9273_v28  ;;  %7034 = vmatprep.subr.mxu1 %v9947_v0 }
0x1d1c   :  { %4271 = vmatprep.subr.mxu0 %v9276_v31  ;;  %7035 = vmatpush3.msra.mxu1 %v9403_v30 }
0x1d1d   :  { %4272 = vmatpush1.msra.mxu0 %v9280_v47  ;;  %7036 = vmatprep.subr.mxu1 %v9947_v0 }
0x1d1e   :  { %6021 = vmatmul.mubr.msk.f32.vlgmr.msra.gmra.mxu0 %vm507_vm2, %v8926_v59  ;;  %7041 = vmatprep.subr.mxu0 %v9947_v0  ;;  %v4073_v59 = vpop.f32.mrf.mxu1 }
0x1d1f   :  { %7042 = vmatpush3.msra.mxu0 %v9343_v45  ;;  %7037 = vmatpush3.msra.mxu1 %v9414_v61  ;;  %v4074_v7 = vadd.f32 %v4073_v59, %v9321_v60 }
0x1d20   :  { %7043 = vmatprep.subr.mxu0 %v9947_v0  ;;  %7038 = vmatprep.mubr.msk.f32.mxu1 %vm7921_vm1, %v9947_v0  ;;  %v4075_v41 = vpop.f32.mrf.mxu1 }
0x1d21   :  { %7044 = vmatpush3.msra.mxu0 %v9352_v18  ;;  %7057 = vmatprep.mubr.msk.f32.mxu0 %vm7921_vm1, %v9947_v0  ;;  %v4076_v40 = vadd.f32 %v4075_v41, %v9332_v27 }
0x1d22   :  { %7045 = vmatprep.subr.mxu0 %v9947_v0  ;;  %4491 = vmatprep.subr.mxu1 %v9216_v15 }
0x1d23   :  { %7046 = vmatpush3.msra.mxu0 %v9361_v16 }
0x1d24   :  { %7047 = vmatprep.subr.mxu0 %v9947_v0 }
0x1d25   :  { %7048 = vmatpush3.msra.mxu0 %v9372_v54 }
0x1d26   :  { %7049 = vmatprep.subr.mxu0 %v9947_v0 }
0x1d27   :  { %7050 = vmatpush3.msra.mxu0 %v9383_v55 }
0x1d28   :  { %7051 = vmatprep.subr.mxu0 %v9947_v0 }
0x1d29   :  { %7052 = vmatpush3.msra.mxu0 %v9396_v8 }
0x1d2a   :  { %7053 = vmatprep.subr.mxu0 %v9947_v0 }
0x1d2b   :  { %7054 = vmatpush3.msra.mxu0 %v9407_v43 }
0x1d2c   :  { %7055 = vmatprep.subr.mxu0 %v9947_v0 }
0x1d2d   :  { %7056 = vmatpush3.msra.mxu0 %v9423_v58 }
0x1d2e   :  { %7060 = vmatprep.subr.mxu0 %v9947_v0 }
0x1dce   :  { %v4149_v9 = vpop.f32.mrf.mxu0  ;;  %v4226_v11 = vpop.f32.mrf.mxu1 }
0x1dcf   :  { %v4153_v14 = vadd.f32 %v4149_v9, %v4074_v7  ;;  %v4227_v37 = vadd.f32 %v9334_v24, %v4226_v11 }
0x1dd0   :  { %v7002_v52 = vpop.f32.mrf.mxu0  ;;  %v7021_v19 = vpop.f32.mrf.mxu1 }
0x1dd1   :  { %v6019_v21 = vmul.f32 -1.442695, %v4153_v14 }
0x1dd3   :  { %7429 = vpow2.f32 %v6019_v21 }
0x1de0   :  { %v7430_v17 = vpop.eup %7429 }
0x1de1   :  { %v4157_v22 = vadd.f32 1.0, %v7430_v17 }
0x1de3   :  { %7431 = vrcp.f32 %v4157_v22 }
0x1df0   :  { %v7432_v42 = vpop.eup %7431 }
0x1df1   :  { %v4230_v48 = vmul.f32 %v7432_v42, %v4227_v37  ;;  %v4233_v13 = vsub.f32 1.0, %v7432_v42  ;;  %v4239_v39 = vmul.f32 %v7432_v42, %v9427_v36 }
0x1df3   :  { %v4231_v53 = vadd.f32 %v4230_v48, %v4076_v40 }
0x1df5   :  { %7433 = vtanh.f32 %v4231_v53 }
0x1e02   :  { %v7434_v12 = vpop.eup %7433 }
0x1e03   :  { %4235 = vrot.lane.b32.xlu0 %v7434_v12, %s7920_s17 }
0x1e75   :  { %v4236_v3 = vpop.permute.xlu0 %4235 }
0x1e76   :  { %v4238_v59 = vmul.f32 %v4236_v3, %v4233_v13 }
0x1e78   :  { %v9493_v7 = vadd.f32 %v4239_v39, %v4238_v59 }
0x1e7a   :  { %4313 = vrot.lane.b32.xlu1 %v9493_v7, %s7920_s17 }
0x1eec   :  { %v4314_v9 = vpop.permute.xlu1 %4313 }
0x1eed   :  { %7039 = vmatmul.mubr.msk.f32.vlgmr.msra.gmra.mxu1 %vm507_vm2, %v4314_v9  ;;  %7058 = vmatmul.mubr.msk.f32.vlgmr.msra.gmra.mxu0 %vm507_vm2, %v4314_v9 }
0x1eee   :  { %4492 = vmatpush1.msra.mxu1 %v9230_v5  ;;  %4539 = vmatprep.mubr.f32.mxu1 %v9947_v0 }
0x1eef   :  { %4493 = vmatprep.subr.mxu1 %v9234_v29  ;;  %7061 = vmatpush3.msra.mxu0 %v9341_v32 }
0x1ef0   :  { %4494 = vmatpush1.msra.mxu1 %v9238_v44  ;;  %7062 = vmatprep.subr.mxu0 %v9947_v0 }
0x1ef1   :  { %4495 = vmatprep.subr.mxu1 %v9241_v33  ;;  %7063 = vmatpush3.msra.mxu0 %v9348_v56 }
0x1ef2   :  { %4496 = vmatpush1.msra.mxu1 %v9245_v4  ;;  %7064 = vmatprep.subr.mxu0 %v9947_v0 }
0x1ef3   :  { %4497 = vmatprep.subr.mxu1 %v9248_v49  ;;  %7065 = vmatpush3.msra.mxu0 %v9359_v25 }
0x1ef4   :  { %4498 = vmatpush1.msra.mxu1 %v9252_v50  ;;  %7066 = vmatprep.subr.mxu0 %v9947_v0 }
0x1ef5   :  { %4499 = vmatprep.subr.mxu1 %v9255_v6  ;;  %7067 = vmatpush3.msra.mxu0 %v9370_v1 }
0x1ef6   :  { %4500 = vmatpush1.msra.mxu1 %v9259_v62  ;;  %7068 = vmatprep.subr.mxu0 %v9947_v0 }
0x1ef7   :  { %4501 = vmatprep.subr.mxu1 %v9262_v63  ;;  %7069 = vmatpush3.msra.mxu0 %v9381_v57 }
0x1ef8   :  { %4502 = vmatpush1.msra.mxu1 %v9266_v2  ;;  %7070 = vmatprep.subr.mxu0 %v9947_v0 }
0x1ef9   :  { %4503 = vmatprep.subr.mxu1 %v9269_v10  ;;  %7071 = vmatpush3.msra.mxu0 %v9392_v35 }
0x1efa   :  { %4504 = vmatpush1.msra.mxu1 %v9273_v28  ;;  %7072 = vmatprep.subr.mxu0 %v9947_v0 }
0x1efb   :  { %4505 = vmatprep.subr.mxu1 %v9276_v31  ;;  %7073 = vmatpush3.msra.mxu0 %v9403_v30 }
0x1efc   :  { %4506 = vmatpush1.msra.mxu1 %v9280_v47  ;;  %7074 = vmatprep.subr.mxu0 %v9947_v0 }
0x1efd   :  { %6025 = vmatmul.mubr.msk.f32.vlgmr.msra.gmra.mxu1 %vm507_vm2, %v8996_v38  ;;  %7079 = vmatprep.subr.mxu1 %v9947_v0  ;;  %v4307_v38 = vpop.f32.mrf.mxu0 }
0x1efe   :  { %7080 = vmatpush3.msra.mxu1 %v9343_v45  ;;  %7075 = vmatpush3.msra.mxu0 %v9414_v61  ;;  %v4308_v41 = vadd.f32 %v4307_v38, %v9321_v60 }
0x1eff   :  { %7081 = vmatprep.subr.mxu1 %v9947_v0  ;;  %7076 = vmatprep.mubr.msk.f32.mxu0 %vm7921_vm1, %v9947_v0  ;;  %v4309_v36 = vpop.f32.mrf.mxu0 }
0x1f00   :  { %7082 = vmatpush3.msra.mxu1 %v9352_v18  ;;  %7095 = vmatprep.mubr.msk.f32.mxu1 %vm7921_vm1, %v9947_v0  ;;  %v4310_v48 = vadd.f32 %v4309_v36, %v9332_v27 }
0x1f01   :  { %7083 = vmatprep.subr.mxu1 %v9947_v0  ;;  %4725 = vmatprep.subr.mxu0 %v9216_v15 }
0x1f02   :  { %7084 = vmatpush3.msra.mxu1 %v9361_v16 }
0x1f03   :  { %7085 = vmatprep.subr.mxu1 %v9947_v0 }
0x1f04   :  { %7086 = vmatpush3.msra.mxu1 %v9372_v54 }
0x1f05   :  { %7087 = vmatprep.subr.mxu1 %v9947_v0 }
0x1f06   :  { %7088 = vmatpush3.msra.mxu1 %v9383_v55 }
0x1f07   :  { %7089 = vmatprep.subr.mxu1 %v9947_v0 }
0x1f08   :  { %7090 = vmatpush3.msra.mxu1 %v9396_v8 }
0x1f09   :  { %7091 = vmatprep.subr.mxu1 %v9947_v0 }
0x1f0a   :  { %7092 = vmatpush3.msra.mxu1 %v9407_v43 }
0x1f0b   :  { %7093 = vmatprep.subr.mxu1 %v9947_v0 }
0x1f0c   :  { %7094 = vmatpush3.msra.mxu1 %v9423_v58 }
0x1f0d   :  { %7098 = vmatprep.subr.mxu1 %v9947_v0 }
0x1fad   :  { %v4383_v11 = vpop.f32.mrf.mxu1  ;;  %v4460_v14 = vpop.f32.mrf.mxu0 }
0x1fae   :  { %v4387_v52 = vadd.f32 %v4383_v11, %v4308_v41  ;;  %v4461_v42 = vadd.f32 %v9334_v24, %v4460_v14 }
0x1faf   :  { %v7040_v19 = vpop.f32.mrf.mxu1  ;;  %v7059_v21 = vpop.f32.mrf.mxu0 }
0x1fb0   :  { %v6023_v17 = vmul.f32 -1.442695, %v4387_v52 }
0x1fb2   :  { %7435 = vpow2.f32 %v6023_v17 }
0x1fbf   :  { %v7436_v22 = vpop.eup %7435 }
0x1fc0   :  { %v4391_v37 = vadd.f32 1.0, %v7436_v22 }
0x1fc2   :  { %7437 = vrcp.f32 %v4391_v37 }
0x1fcf   :  { %v7438_v40 = vpop.eup %7437 }
0x1fd0   :  { %v4464_v53 = vmul.f32 %v7438_v40, %v4461_v42  ;;  %v4467_v3 = vsub.f32 1.0, %v7438_v40  ;;  %v4473_v59 = vmul.f32 %v7438_v40, %v9493_v7 }
0x1fd2   :  { %v4465_v12 = vadd.f32 %v4464_v53, %v4310_v48 }
0x1fd4   :  { %7439 = vtanh.f32 %v4465_v12 }
0x1fe1   :  { %v7440_v13 = vpop.eup %7439 }
0x1fe2   :  { %4469 = vrot.lane.b32.xlu0 %v7440_v13, %s7920_s17 }
0x2054   :  { %v4470_v39 = vpop.permute.xlu0 %4469 }
0x2055   :  { %v4472_v9 = vmul.f32 %v4470_v39, %v4467_v3 }
0x2057   :  { %v9559_v38 = vadd.f32 %v4473_v59, %v4472_v9 }
0x2059   :  { %4547 = vrot.lane.b32.xlu1 %v9559_v38, %s7920_s17 }
0x20cb   :  { %v4548_v41 = vpop.permute.xlu1 %4547 }
0x20cc   :  { %7077 = vmatmul.mubr.msk.f32.vlgmr.msra.gmra.mxu0 %vm507_vm2, %v4548_v41  ;;  %7096 = vmatmul.mubr.msk.f32.vlgmr.msra.gmra.mxu1 %vm507_vm2, %v4548_v41 }
0x20cd   :  { %4726 = vmatpush1.msra.mxu0 %v9230_v5  ;;  %4773 = vmatprep.mubr.f32.mxu0 %v9947_v0 }
0x20ce   :  { %4727 = vmatprep.subr.mxu0 %v9234_v29  ;;  %7099 = vmatpush3.msra.mxu1 %v9341_v32 }
0x20cf   :  { %4728 = vmatpush1.msra.mxu0 %v9238_v44  ;;  %7100 = vmatprep.subr.mxu1 %v9947_v0 }
0x20d0   :  { %4729 = vmatprep.subr.mxu0 %v9241_v33  ;;  %7101 = vmatpush3.msra.mxu1 %v9348_v56 }
0x20d1   :  { %4730 = vmatpush1.msra.mxu0 %v9245_v4  ;;  %7102 = vmatprep.subr.mxu1 %v9947_v0 }
0x20d2   :  { %4731 = vmatprep.subr.mxu0 %v9248_v49  ;;  %7103 = vmatpush3.msra.mxu1 %v9359_v25 }
0x20d3   :  { %4732 = vmatpush1.msra.mxu0 %v9252_v50  ;;  %7104 = vmatprep.subr.mxu1 %v9947_v0 }
0x20d4   :  { %4733 = vmatprep.subr.mxu0 %v9255_v6  ;;  %7105 = vmatpush3.msra.mxu1 %v9370_v1 }
0x20d5   :  { %4734 = vmatpush1.msra.mxu0 %v9259_v62  ;;  %7106 = vmatprep.subr.mxu1 %v9947_v0 }
0x20d6   :  { %4735 = vmatprep.subr.mxu0 %v9262_v63  ;;  %7107 = vmatpush3.msra.mxu1 %v9381_v57 }
0x20d7   :  { %4736 = vmatpush1.msra.mxu0 %v9266_v2  ;;  %7108 = vmatprep.subr.mxu1 %v9947_v0 }
0x20d8   :  { %4737 = vmatprep.subr.mxu0 %v9269_v10  ;;  %7109 = vmatpush3.msra.mxu1 %v9392_v35 }
0x20d9   :  { %4738 = vmatpush1.msra.mxu0 %v9273_v28  ;;  %7110 = vmatprep.subr.mxu1 %v9947_v0 }
0x20da   :  { %4739 = vmatprep.subr.mxu0 %v9276_v31  ;;  %7111 = vmatpush3.msra.mxu1 %v9403_v30 }
0x20db   :  { %4740 = vmatpush1.msra.mxu0 %v9280_v47  ;;  %7112 = vmatprep.subr.mxu1 %v9947_v0 }
0x20dc   :  { %6029 = vmatmul.mubr.msk.f32.vlgmr.msra.gmra.mxu0 %vm507_vm2, %v9066_v51  ;;  %7117 = vmatprep.subr.mxu0 %v9947_v0  ;;  %v4541_v51 = vpop.f32.mrf.mxu1 }
0x20dd   :  { %7118 = vmatpush3.msra.mxu0 %v9343_v45  ;;  %7113 = vmatpush3.msra.mxu1 %v9414_v61  ;;  %v4542_v36 = vadd.f32 %v4541_v51, %v9321_v60 }
0x20de   :  { %7119 = vmatprep.subr.mxu0 %v9947_v0  ;;  %7114 = vmatprep.mubr.msk.f32.mxu1 %vm7921_vm1, %v9947_v0  ;;  %v4543_v7 = vpop.f32.mrf.mxu1 }
0x20df   :  { %7120 = vmatpush3.msra.mxu0 %v9352_v18  ;;  %7133 = vmatprep.mubr.msk.f32.mxu0 %vm7921_vm1, %v9947_v0  ;;  %v4544_v48 = vadd.f32 %v4543_v7, %v9332_v27 }
0x20e0   :  { %7121 = vmatprep.subr.mxu0 %v9947_v0  ;;  %4959 = vmatprep.subr.mxu1 %v9216_v15 }
0x20e1   :  { %7122 = vmatpush3.msra.mxu0 %v9361_v16 }
0x20e2   :  { %7123 = vmatprep.subr.mxu0 %v9947_v0 }
0x20e3   :  { %7124 = vmatpush3.msra.mxu0 %v9372_v54 }
0x20e4   :  { %7125 = vmatprep.subr.mxu0 %v9947_v0 }
0x20e5   :  { %7126 = vmatpush3.msra.mxu0 %v9383_v55 }
0x20e6   :  { %7127 = vmatprep.subr.mxu0 %v9947_v0 }
0x20e7   :  { %7128 = vmatpush3.msra.mxu0 %v9396_v8 }
0x20e8   :  { %7129 = vmatprep.subr.mxu0 %v9947_v0 }
0x20e9   :  { %7130 = vmatpush3.msra.mxu0 %v9407_v43 }
0x20ea   :  { %7131 = vmatprep.subr.mxu0 %v9947_v0 }
0x20eb   :  { %7132 = vmatpush3.msra.mxu0 %v9423_v58 }
0x20ec   :  { %7136 = vmatprep.subr.mxu0 %v9947_v0 }
0x218c   :  { %v4617_v11 = vpop.f32.mrf.mxu0  ;;  %v4694_v14 = vpop.f32.mrf.mxu1 }
0x218d   :  { %v4621_v52 = vadd.f32 %v4617_v11, %v4542_v36  ;;  %v4695_v42 = vadd.f32 %v9334_v24, %v4694_v14 }
0x218e   :  { %v7078_v19 = vpop.f32.mrf.mxu0  ;;  %v7097_v21 = vpop.f32.mrf.mxu1 }
0x218f   :  { %v6027_v17 = vmul.f32 -1.442695, %v4621_v52 }
0x2191   :  { %7441 = vpow2.f32 %v6027_v17 }
0x219e   :  { %v7442_v22 = vpop.eup %7441 }
0x219f   :  { %v4625_v37 = vadd.f32 1.0, %v7442_v22 }
0x21a1   :  { %7443 = vrcp.f32 %v4625_v37 }
0x21ae   :  { %v7444_v40 = vpop.eup %7443 }
0x21af   :  { %v4698_v53 = vmul.f32 %v7444_v40, %v4695_v42  ;;  %v4701_v3 = vsub.f32 1.0, %v7444_v40  ;;  %v4707_v59 = vmul.f32 %v7444_v40, %v9559_v38 }
0x21b1   :  { %v4699_v12 = vadd.f32 %v4698_v53, %v4544_v48 }
0x21b3   :  { %7445 = vtanh.f32 %v4699_v12 }
0x21c0   :  { %v7446_v13 = vpop.eup %7445 }
0x21c1   :  { %4703 = vrot.lane.b32.xlu0 %v7446_v13, %s7920_s17 }
0x2233   :  { %v4704_v39 = vpop.permute.xlu0 %4703 }
0x2234   :  { %v4706_v9 = vmul.f32 %v4704_v39, %v4701_v3 }
0x2236   :  { %v9625_v41 = vadd.f32 %v4707_v59, %v4706_v9 }
0x2238   :  { %4781 = vrot.lane.b32.xlu1 %v9625_v41, %s7920_s17 }
0x22aa   :  { %v4782_v51 = vpop.permute.xlu1 %4781 }
0x22ab   :  { %7115 = vmatmul.mubr.msk.f32.vlgmr.msra.gmra.mxu1 %vm507_vm2, %v4782_v51  ;;  %7134 = vmatmul.mubr.msk.f32.vlgmr.msra.gmra.mxu0 %vm507_vm2, %v4782_v51 }
0x22ac   :  { %4960 = vmatpush1.msra.mxu1 %v9230_v5  ;;  %5007 = vmatprep.mubr.f32.mxu1 %v9947_v0 }
0x22ad   :  { %4961 = vmatprep.subr.mxu1 %v9234_v29  ;;  %7137 = vmatpush3.msra.mxu0 %v9341_v32 }
0x22ae   :  { %4962 = vmatpush1.msra.mxu1 %v9238_v44  ;;  %7138 = vmatprep.subr.mxu0 %v9947_v0 }
0x22af   :  { %4963 = vmatprep.subr.mxu1 %v9241_v33  ;;  %7139 = vmatpush3.msra.mxu0 %v9348_v56 }
0x22b0   :  { %4964 = vmatpush1.msra.mxu1 %v9245_v4  ;;  %7140 = vmatprep.subr.mxu0 %v9947_v0 }
0x22b1   :  { %4965 = vmatprep.subr.mxu1 %v9248_v49  ;;  %7141 = vmatpush3.msra.mxu0 %v9359_v25 }
0x22b2   :  { %4966 = vmatpush1.msra.mxu1 %v9252_v50  ;;  %7142 = vmatprep.subr.mxu0 %v9947_v0 }
0x22b3   :  { %4967 = vmatprep.subr.mxu1 %v9255_v6  ;;  %7143 = vmatpush3.msra.mxu0 %v9370_v1 }
0x22b4   :  { %4968 = vmatpush1.msra.mxu1 %v9259_v62  ;;  %7144 = vmatprep.subr.mxu0 %v9947_v0 }
0x22b5   :  { %4969 = vmatprep.subr.mxu1 %v9262_v63  ;;  %7145 = vmatpush3.msra.mxu0 %v9381_v57 }
0x22b6   :  { %4970 = vmatpush1.msra.mxu1 %v9266_v2  ;;  %7146 = vmatprep.subr.mxu0 %v9947_v0 }
0x22b7   :  { %4971 = vmatprep.subr.mxu1 %v9269_v10  ;;  %7147 = vmatpush3.msra.mxu0 %v9392_v35 }
0x22b8   :  { %4972 = vmatpush1.msra.mxu1 %v9273_v28  ;;  %7148 = vmatprep.subr.mxu0 %v9947_v0 }
0x22b9   :  { %4973 = vmatprep.subr.mxu1 %v9276_v31  ;;  %7149 = vmatpush3.msra.mxu0 %v9403_v30 }
0x22ba   :  { %4974 = vmatpush1.msra.mxu1 %v9280_v47  ;;  %7150 = vmatprep.subr.mxu0 %v9947_v0 }
0x22bb   :  { %6033 = vmatmul.mubr.msk.f32.vlgmr.msra.gmra.mxu1 %vm507_vm2, %v9138_v34  ;;  %7155 = vmatprep.subr.mxu1 %v9947_v0  ;;  %v4775_v34 = vpop.f32.mrf.mxu0 }
0x22bc   :  { %7156 = vmatpush3.msra.mxu1 %v9343_v45  ;;  %7151 = vmatpush3.msra.mxu0 %v9414_v61  ;;  %v4776_v38 = vadd.f32 %v4775_v34, %v9321_v60 }
0x22bd   :  { %7157 = vmatprep.subr.mxu1 %v9947_v0  ;;  %7152 = vmatprep.mubr.msk.f32.mxu0 %vm7921_vm1, %v9947_v0 }
0x22be   :  { %7158 = vmatpush3.msra.mxu1 %v9352_v18  ;;  %7171 = vmatprep.mubr.msk.f32.mxu1 %vm7921_vm1, %v9947_v0 }
0x22bf   :  { %7159 = vmatprep.subr.mxu1 %v9947_v0  ;;  %5193 = vmatprep.subr.mxu0 %v9216_v15  ;;  %v4777_v15 = vpop.f32.mrf.mxu0 }
0x22c0   :  { %7160 = vmatpush3.msra.mxu1 %v9361_v16  ;;  %v4778_v42 = vadd.f32 %v4777_v15, %v9332_v27 }
0x22c1   :  { %7161 = vmatprep.subr.mxu1 %v9947_v0 }
0x22c2   :  { %7162 = vmatpush3.msra.mxu1 %v9372_v54 }
0x22c3   :  { %7163 = vmatprep.subr.mxu1 %v9947_v0 }
0x22c4   :  { %7164 = vmatpush3.msra.mxu1 %v9383_v55 }
0x22c5   :  { %7165 = vmatprep.subr.mxu1 %v9947_v0 }
0x22c6   :  { %7166 = vmatpush3.msra.mxu1 %v9396_v8 }
0x22c7   :  { %7167 = vmatprep.subr.mxu1 %v9947_v0 }
0x22c8   :  { %7168 = vmatpush3.msra.mxu1 %v9407_v43 }
0x22c9   :  { %7169 = vmatprep.subr.mxu1 %v9947_v0 }
0x22ca   :  { %7170 = vmatpush3.msra.mxu1 %v9423_v58 }
0x22cb   :  { %7174 = vmatprep.subr.mxu1 %v9947_v0 }
0x236b   :  { %v4851_v7 = vpop.f32.mrf.mxu1  ;;  %v4928_v36 = vpop.f32.mrf.mxu0 }
0x236c   :  { %v4855_v11 = vadd.f32 %v4851_v7, %v4776_v38  ;;  %v4929_v22 = vadd.f32 %v9334_v24, %v4928_v36 }
0x236d   :  { %v7116_v14 = vpop.f32.mrf.mxu1  ;;  %v7135_v52 = vpop.f32.mrf.mxu0 }
0x236e   :  { %v6031_v19 = vmul.f32 -1.442695, %v4855_v11  ;;  %v3862_v11 = vsub.f32 1.0, %v9325_v20  ;;  %v3868_v52 = vmul.f32 %v9325_v20, %v9222_v23  ;;  %v7502_v23 = vld [vmem:[#allocation19 + $0x60] sm:$0xff]  ;;  %v7503_v20 = vld [vmem:[#allocation19 + $0x58] sm:$0xff] }
0x2370   :  { %7447 = vpow2.f32 %v6031_v19 }
0x237d   :  { %v7448_v21 = vpop.eup %7447 }
0x237e   :  { %v4859_v17 = vadd.f32 1.0, %v7448_v21 }
0x2380   :  { %7449 = vrcp.f32 %v4859_v17  ;;  %v7500_v17 = vld [vmem:[#allocation19 + $0x70] sm:$0xff] }
0x238d   :  { %v7450_v37 = vpop.eup %7449 }
0x238e   :  { %v4932_v40 = vmul.f32 %v7450_v37, %v4929_v22  ;;  %v4935_v12 = vsub.f32 1.0, %v7450_v37  ;;  %v4941_v3 = vmul.f32 %v7450_v37, %v9625_v41  ;;  %v7501_v22 = vld [vmem:[#allocation19 + $0x68] sm:$0xff]  ;;  %v7504_v37 = vld [vmem:[#allocation19 + $0x50] sm:$0xff] }
0x2390   :  { %v4933_v48 = vadd.f32 %v4932_v40, %v4778_v42  ;;  %v7505_v42 = vld [vmem:[#allocation19 + $0x48] sm:$0xff]  ;;  %v7506_v40 = vld [vmem:[#allocation19 + $0x40] sm:$0xff] }
0x2392   :  { %7451 = vtanh.f32 %v4933_v48  ;;  %v7508_v48 = vld [vmem:[#allocation19 + $0x30] sm:$0xff] }
0x239f   :  { %v7452_v53 = vpop.eup %7451 }
0x23a0   :  { %4937 = vrot.lane.b32.xlu0 %v7452_v53, %s7920_s17  ;;  %v7510_v53 = vld [vmem:[#allocation19 + $0x20] sm:$0xff] }
0x2412   :  { %v4938_v13 = vpop.permute.xlu0 %4937 }
0x2413   :  { %v4940_v39 = vmul.f32 %v4938_v13, %v4935_v12  ;;  %v7512_v12 = vld [vmem:[#allocation19 + $0x10] sm:$0xff] }
0x2415   :  { %v9691_v59 = vadd.f32 %v4941_v3, %v4940_v39  ;;  %v7514_v3 = vld [vmem:[#allocation19] sm:$0xff] }
0x2417   :  { %5015 = vrot.lane.b32.xlu1 %v9691_v59, %s7920_s17 }
0x2489   :  { %v5016_v9 = vpop.permute.xlu1 %5015 }
0x248a   :  { %7153 = vmatmul.mubr.msk.f32.vlgmr.msra.gmra.mxu0 %vm507_vm2, %v5016_v9  ;;  %7172 = vmatmul.mubr.msk.f32.vlgmr.msra.gmra.mxu1 %vm507_vm2, %v5016_v9 }
0x248b   :  { %5194 = vmatpush1.msra.mxu0 %v9230_v5  ;;  %5241 = vmatprep.mubr.f32.mxu0 %v9947_v0  ;;  %v7499_v5 = vld [vmem:[#allocation19 + $0x78] sm:$0xff] }
0x248c   :  { %5195 = vmatprep.subr.mxu0 %v9234_v29  ;;  %7175 = vmatpush3.msra.mxu1 %v9341_v32 }
0x248d   :  { %5196 = vmatpush1.msra.mxu0 %v9238_v44  ;;  %7176 = vmatprep.subr.mxu1 %v9947_v0 }
0x248e   :  { %5197 = vmatprep.subr.mxu0 %v9241_v33  ;;  %7177 = vmatpush3.msra.mxu1 %v9348_v56 }
0x248f   :  { %5198 = vmatpush1.msra.mxu0 %v9245_v4  ;;  %7178 = vmatprep.subr.mxu1 %v9947_v0 }
0x2490   :  { %5199 = vmatprep.subr.mxu0 %v9248_v49  ;;  %7179 = vmatpush3.msra.mxu1 %v9359_v25 }
0x2491   :  { %5200 = vmatpush1.msra.mxu0 %v9252_v50  ;;  %7180 = vmatprep.subr.mxu1 %v9947_v0 }
0x2492   :  { %5201 = vmatprep.subr.mxu0 %v9255_v6  ;;  %7181 = vmatpush3.msra.mxu1 %v9370_v1 }
0x2493   :  { %5202 = vmatpush1.msra.mxu0 %v9259_v62  ;;  %7182 = vmatprep.subr.mxu1 %v9947_v0 }
0x2494   :  { %5203 = vmatprep.subr.mxu0 %v9262_v63  ;;  %7183 = vmatpush3.msra.mxu1 %v9381_v57 }
0x2495   :  { %5204 = vmatpush1.msra.mxu0 %v9266_v2  ;;  %7184 = vmatprep.subr.mxu1 %v9947_v0 }
0x2496   :  { %5205 = vmatprep.subr.mxu0 %v9269_v10  ;;  %7185 = vmatpush3.msra.mxu1 %v9392_v35 }
0x2497   :  { %5206 = vmatpush1.msra.mxu0 %v9273_v28  ;;  %7186 = vmatprep.subr.mxu1 %v9947_v0 }
0x2498   :  { %5207 = vmatprep.subr.mxu0 %v9276_v31  ;;  %7187 = vmatpush3.msra.mxu1 %v9403_v30 }
0x2499   :  { %5208 = vmatpush1.msra.mxu0 %v9280_v47  ;;  %7188 = vmatprep.subr.mxu1 %v9947_v0 }
0x249a   :  { %6037 = vmatmul.mubr.msk.f32.vlgmr.msra.gmra.mxu0 %vm507_vm2, %v9232_v26  ;;  %7193 = vmatprep.subr.mxu0 %v9947_v0  ;;  %v5009_v26 = vpop.f32.mrf.mxu1 }
0x249b   :  { %7194 = vmatpush3.msra.mxu0 %v9343_v45  ;;  %7189 = vmatpush3.msra.mxu1 %v9414_v61  ;;  %v5010_v44 = vadd.f32 %v5009_v26, %v9321_v60 }
0x249c   :  { %7195 = vmatprep.subr.mxu0 %v9947_v0  ;;  %7190 = vmatprep.mubr.msk.f32.mxu1 %vm7921_vm1, %v9947_v0  ;;  %v5011_v29 = vpop.f32.mrf.mxu1 }
0x249d   :  { %7196 = vmatpush3.msra.mxu0 %v9352_v18  ;;  %7209 = vmatprep.mubr.msk.f32.mxu0 %vm7921_vm1, %v9947_v0  ;;  %v5012_v31 = vadd.f32 %v5011_v29, %v9332_v27 }
0x249e   :  { %7197 = vmatprep.subr.mxu0 %v9947_v0  ;;  %5432 = vmatprep.subr.mxu1 %v7499_v5 }
0x249f   :  { %7198 = vmatpush3.msra.mxu0 %v9361_v16 }
0x24a0   :  { %7199 = vmatprep.subr.mxu0 %v9947_v0 }
0x24a1   :  { %7200 = vmatpush3.msra.mxu0 %v9372_v54 }
0x24a2   :  { %7201 = vmatprep.subr.mxu0 %v9947_v0 }
0x24a3   :  { %7202 = vmatpush3.msra.mxu0 %v9383_v55 }
0x24a4   :  { %7203 = vmatprep.subr.mxu0 %v9947_v0 }
0x24a5   :  { %7204 = vmatpush3.msra.mxu0 %v9396_v8 }
0x24a6   :  { %7205 = vmatprep.subr.mxu0 %v9947_v0 }
0x24a7   :  { %7206 = vmatpush3.msra.mxu0 %v9407_v43 }
0x24a8   :  { %7207 = vmatprep.subr.mxu0 %v9947_v0 }
0x24a9   :  { %7208 = vmatpush3.msra.mxu0 %v9423_v58 }
0x24aa   :  { %7212 = vmatprep.subr.mxu0 %v9947_v0 }
0x254a   :  { %v5085_v33 = vpop.f32.mrf.mxu0  ;;  %v5162_v4 = vpop.f32.mrf.mxu1 }
0x254b   :  { %v5089_v49 = vadd.f32 %v5085_v33, %v5010_v44  ;;  %v5163_v10 = vadd.f32 %v9334_v24, %v5162_v4 }
0x254c   :  { %v7154_v50 = vpop.f32.mrf.mxu0  ;;  %v7173_v6 = vpop.f32.mrf.mxu1 }
0x254d   :  { %v6035_v62 = vmul.f32 -1.442695, %v5089_v49 }
0x254f   :  { %7453 = vpow2.f32 %v6035_v62 }
0x255c   :  { %v7454_v63 = vpop.eup %7453 }
0x255d   :  { %v5093_v2 = vadd.f32 1.0, %v7454_v63 }
0x255f   :  { %7455 = vrcp.f32 %v5093_v2 }
0x256c   :  { %v7456_v28 = vpop.eup %7455 }
0x256d   :  { %v5166_v47 = vmul.f32 %v7456_v28, %v5163_v10  ;;  %v5169_v15 = vsub.f32 1.0, %v7456_v28  ;;  %v5175_v7 = vmul.f32 %v7456_v28, %v9691_v59 }
0x256f   :  { %v5167_v41 = vadd.f32 %v5166_v47, %v5012_v31 }
0x2571   :  { %7457 = vtanh.f32 %v5167_v41 }
0x2572   :  { %7459 = vtanh.f32 %v9329_v46 }
0x257e   :  { %v7458_v51 = vpop.eup %7457 }
0x257f   :  { %5171 = vrot.lane.b32.xlu0 %v7458_v51, %s7920_s17  ;;  %v7460_v34 = vpop.eup %7459 }
0x2583   :  { %3864 = vrot.lane.b32.xlu0 %v7460_v34, %s7920_s17 }
0x25f1   :  { %v5172_v38 = vpop.permute.xlu0 %5171 }
0x25f2   :  { %v5174_v36 = vmul.f32 %v5172_v38, %v5169_v15 }
0x25f4   :  { %v9758_v24 = vadd.f32 %v5175_v7, %v5174_v36 }
0x25f5   :  { %v3865_v14 = vpop.permute.xlu0 %3864 }
0x25f6   :  { %v3867_v46 = vmul.f32 %v3865_v14, %v3862_v11  ;;  %5249 = vrot.lane.b32.xlu1 %v9758_v24, %s7920_s17  ;;  %v5656_v14 = vld [vmem:[%s9914_s16 + $0x30] sm:$0xff] }
0x25f8   :  { %v3869_v19 = vadd.f32 %v3868_v52, %v3867_v46  ;;  %v5655_v52 = vld [vmem:[%s9914_s16 + $0x28] sm:$0xff]  ;;  %v5653_v46 = vld [vmem:[%s9914_s16 + $0x18] sm:$0xff] }
0x25fa   :  { %5412 = vrot.lane.b32.xlu0 %v3869_v19, %s7920_s17 }
0x2668   :  { %v5250_v21 = vpop.permute.xlu1 %5249 }
0x2669   :  { %7191 = vmatmul.mubr.msk.f32.vlgmr.msra.gmra.mxu1 %vm507_vm2, %v5250_v21  ;;  %7210 = vmatmul.mubr.msk.f32.vlgmr.msra.gmra.mxu0 %vm507_vm2, %v5250_v21  ;;  %v5652_v21 = vld [vmem:[%s9914_s16 + $0x10] sm:$0xff] }
0x266a   :  { %5433 = vmatpush1.msra.mxu1 %v7500_v17  ;;  %5480 = vmatprep.mubr.f32.mxu1 %v9947_v0  ;;  %v5651_v17 = vld [vmem:[%s9914_s16 + $0x8] sm:$0xff] }
0x266b   :  { %5434 = vmatprep.subr.mxu1 %v7501_v22  ;;  %7213 = vmatpush3.msra.mxu0 %v9341_v32  ;;  %v7507_v32 = vld [vmem:[#allocation19 + $0x38] sm:$0xff]  ;;  %v5650_v22 = vld [vmem:[%s9914_s16] sm:$0xff] }
0x266c   :  { %5435 = vmatpush1.msra.mxu1 %v7502_v23  ;;  %7214 = vmatprep.subr.mxu0 %v9947_v0  ;;  %v5413_v13 = vpop.permute.xlu0 %5412  ;;  %v5744_v23 = vld [vmem:[#allocation26 + $0x18] sm:$0xff] }
0x266d   :  { %5436 = vmatprep.subr.mxu1 %v7503_v20  ;;  %7215 = vmatpush3.msra.mxu0 %v9348_v56  ;;  %v7509_v56 = vld [vmem:[#allocation19 + $0x28] sm:$0xff] }
0x266e   :  { %5437 = vmatpush1.msra.mxu1 %v7504_v37  ;;  %7216 = vmatprep.subr.mxu0 %v9947_v0 }
0x266f   :  { %5438 = vmatprep.subr.mxu1 %v7505_v42  ;;  %7217 = vmatpush3.msra.mxu0 %v9359_v25  ;;  %v7511_v25 = vld [vmem:[#allocation19 + $0x18] sm:$0xff] }
0x2670   :  { %5439 = vmatpush1.msra.mxu1 %v7506_v40  ;;  %7218 = vmatprep.subr.mxu0 %v9947_v0 }
0x2671   :  { %5440 = vmatprep.subr.mxu1 %v7507_v32  ;;  %7219 = vmatpush3.msra.mxu0 %v9370_v1  ;;  %v7513_v1 = vld [vmem:[#allocation19 + $0x8] sm:$0xff] }
0x2672   :  { %5441 = vmatpush1.msra.mxu1 %v7508_v48  ;;  %7220 = vmatprep.subr.mxu0 %v9947_v0 }
0x2673   :  { %5442 = vmatprep.subr.mxu1 %v7509_v56  ;;  %7221 = vmatpush3.msra.mxu0 %v9381_v57  ;;  %v5743_v56 = vld [vmem:[#allocation26 + $0x10] sm:$0xff] }
0x2674   :  { %5443 = vmatpush1.msra.mxu1 %v7510_v53  ;;  %7222 = vmatprep.subr.mxu0 %v9947_v0  ;;  %v5742_v53 = vld [vmem:[#allocation26 + $0x8] sm:$0xff] }
0x2675   :  { %5444 = vmatprep.subr.mxu1 %v7511_v25  ;;  %7223 = vmatpush3.msra.mxu0 %v9392_v35  ;;  %v5741_v25 = vld [vmem:[#allocation26] sm:$0xff] }
0x2676   :  { %5445 = vmatpush1.msra.mxu1 %v7512_v12  ;;  %7224 = vmatprep.subr.mxu0 %v9947_v0  ;;  %v6045_v12 = vld [vmem:[#allocation25] ss:$0 sm:$0xff] }
0x2677   :  { %5446 = vmatprep.subr.mxu1 %v7513_v1  ;;  %7225 = vmatpush3.msra.mxu0 %v9403_v30 }
0x2678   :  { %5447 = vmatpush1.msra.mxu1 %v7514_v3  ;;  %7226 = vmatprep.subr.mxu0 %v9947_v0 }
0x2679   :  { %6041 = vmatmul.mubr.msk.f32.vlgmr.msra.gmra.mxu1 %vm507_vm2, %v5413_v13  ;;  %7231 = vmatprep.subr.mxu1 %v9947_v0 }
0x267a   :  { %7232 = vmatpush3.msra.mxu1 %v9343_v45  ;;  %7227 = vmatpush3.msra.mxu0 %v9414_v61  ;;  %v5243_v45 = vpop.f32.mrf.mxu0 }
0x267b   :  { %7233 = vmatprep.subr.mxu1 %v9947_v0  ;;  %7228 = vmatprep.mubr.msk.f32.mxu0 %vm7921_vm1, %v9947_v0 }
0x267c   :  { %7234 = vmatpush3.msra.mxu1 %v9352_v18  ;;  %7247 = vmatprep.mubr.msk.f32.mxu1 %vm7921_vm1, %v9947_v0  ;;  %v5245_v18 = vpop.f32.mrf.mxu0 }
0x267d   :  { %7235 = vmatprep.subr.mxu1 %v9947_v0  ;;  %7250 = vmatprep.subr.mxu0 %v9947_v0 }
0x267e   :  { %7236 = vmatpush3.msra.mxu1 %v9361_v16  ;;  %v5244_v16 = vadd.f32 %v5243_v45, %v9321_v60 }
0x267f   :  { %7237 = vmatprep.subr.mxu1 %v9947_v0 }
0x2680   :  { %7238 = vmatpush3.msra.mxu1 %v9372_v54 }
0x2681   :  { %7239 = vmatprep.subr.mxu1 %v9947_v0 }
0x2682   :  { %7240 = vmatpush3.msra.mxu1 %v9383_v55 }
0x2683   :  { %7241 = vmatprep.subr.mxu1 %v9947_v0 }
0x2684   :  { %7242 = vmatpush3.msra.mxu1 %v9396_v8 }
0x2685   :  { %7243 = vmatprep.subr.mxu1 %v9947_v0 }
0x2686   :  { %7244 = vmatpush3.msra.mxu1 %v9407_v43  ;;  %v7515_v43 = vld [vmem:[#allocation23] ss:$0 sm:$0xff] }
0x2687   :  { %7245 = vmatprep.subr.mxu1 %v9947_v0 }
0x2688   :  { %7246 = vmatpush3.msra.mxu1 %v9423_v58  ;;  %v5246_v58 = vadd.f32 %v5245_v18, %v9332_v27  ;;  %v5834_v18 = vld [vmem:[%s9918_s20 + $0x38] sm:$0xff] }
0x2689   :  { %7269 = vmatprep.subr.mxu1 %v9947_v0 }
0x2729   :  { %v5319_v54 = vpop.f32.mrf.mxu1  ;;  %v5396_v57 = vpop.f32.mrf.mxu0 }
0x272a   :  { %v5323_v55 = vadd.f32 %v5319_v54, %v5244_v16  ;;  %v5397_v59 = vadd.f32 %v7515_v43, %v5396_v57  ;;  %v5833_v16 = vld [vmem:[%s9918_s20 + $0x30] sm:$0xff]  ;;  %v5832_v54 = vld [vmem:[%s9918_s20 + $0x28] sm:$0xff]  ;;  %v5831_v57 = vld [vmem:[%s9918_s20 + $0x20] sm:$0xff] }
0x272b   :  { %v7192_v35 = vpop.f32.mrf.mxu1  ;;  %v7211_v30 = vpop.f32.mrf.mxu0 }
0x272c   :  { %v6039_v8 = vmul.f32 -1.442695, %v5323_v55  ;;  %v5830_v55 = vld [vmem:[%s9918_s20 + $0x18] sm:$0xff]  ;;  %v5829_v35 = vld [vmem:[%s9918_s20 + $0x10] sm:$0xff]  ;;  %v5828_v30 = vld [vmem:[%s9918_s20 + $0x8] sm:$0xff] }
0x272e   :  { %7461 = vpow2.f32 %v6039_v8  ;;  %v5827_v8 = vld [vmem:[%s9918_s20] sm:$0xff]  ;;  %s7923_s20 = smov [#allocation29]  }
0x272f   :  { %s5935_s27 = sshll.u32 %s7923_s20, 4  ;;  %s5936_s27 = int_to_ptr.vmem [resolvable:$true] %s5935_s27 }
0x2730   :  { %s7856_s28 = scalar_lea.vmem %s5936_s27, 32  ;;  %p7861_p2 = scmp.lt.s32.totalorder %s5936_s27, %s5936_s27 }
0x2731   :  { %p7857_p1 = scmp.ne.s32.totalorder %s5936_s27, %s7856_s28  ;;  %p7862_p3 = scmp.lt.s32.totalorder %s7856_s28, %s7856_s28 }
0x2733   :  { %p7863_p4 = por %p7862_p3, %p7861_p2 }
0x2735   :  { %p7864_p5 = pnand %p7863_p4, %p7857_p1 }
0x2739   :  { %v5482_v62 = vpop.f32.mrf.mxu1 }
0x273a   :  { %v5483_v2 = vadd.f32 %v5482_v62, %v9321_v60  ;;  %v5657_v60 = vld [vmem:[%s9914_s16 + $0x38] sm:$0xff] }
0x273b   :  { %v7462_v61 = vpop.eup %7461  ;;  %v5484_v63 = vpop.f32.mrf.mxu1 }
0x273c   :  { %v5327_v39 = vadd.f32 1.0, %v7462_v61  ;;  %v5485_v36 = vadd.f32 %v5484_v63, %v9332_v27  ;;  %v5654_v27 = vld [vmem:[%s9914_s16 + $0x20] sm:$0xff]  ;;  %v6047_v61 = vld [vmem:[#allocation28] ss:$0 sm:$0xff] }
0x273e   :  { %7463 = vrcp.f32 %v5327_v39 }
0x274b   :  { %v7464_v9 = vpop.eup %7463 }
0x274c   :  { %v5400_v5 = vmul.f32 %v7464_v9, %v5397_v59  ;;  %v5403_v44 = vsub.f32 1.0, %v7464_v9  ;;  %v5409_v4 = vmul.f32 %v7464_v9, %v9758_v24 }
0x274e   :  { %v5401_v26 = vadd.f32 %v5400_v5, %v5246_v58  ;;  %v7922_v58 = vmov 8   ;;  %v6049_v5 = vld [vmem:[%s9919_s21] ss:$0 sm:$0xff] }
0x274f   :  { %7327 = vset.pattern.permute.xlu1 %v7922_v58  ;;  %7328 = vset.pattern.permute.xlu0 %v7922_v58 }
0x2750   :  { %7465 = vtanh.f32 %v5401_v26 }
0x275d   :  { %v7466_v29 = vpop.eup %7465 }
0x275e   :  { %5405 = vrot.lane.b32.xlu1 %v7466_v29, %s7920_s17 }
0x27d0   :  { %v5406_v33 = vpop.permute.xlu1 %5405 }
0x27d1   :  { %v5408_v49 = vmul.f32 %v5406_v33, %v5403_v44 }
0x27d3   :  { %v5410_v50 = vadd.f32 %v5409_v4, %v5408_v49 }
0x27d5   :  { %5488 = vrot.lane.b32.xlu1 %v5410_v50, %s7920_s17 }
0x2847   :  { %v5489_v6 = vpop.permute.xlu1 %5488 }
0x2848   :  { %7229 = vmatmul.mubr.msk.f32.vlgmr.msra.gmra.mxu0 %vm507_vm2, %v5489_v6  ;;  %7248 = vmatmul.mubr.msk.f32.vlgmr.msra.gmra.mxu1 %vm507_vm2, %v5489_v6 }
0x2849   :  { %7266 = vmatprep.mubr.msk.f32.mxu0 %vm7921_vm1, %v9947_v0  ;;  %7277 = vmatprep.mubr.msk.f32.mxu1 %vm7921_vm1, %v9947_v0 }
0x284a   :  { %7251 = vmatpush3.msra.mxu0 %v5657_v60  ;;  %7270 = vmatpush3.msra.mxu1 %v5744_v23 }
0x284b   :  { %7252 = vmatprep.subr.mxu0 %v9947_v0  ;;  %7271 = vmatprep.subr.mxu1 %v9947_v0 }
0x284c   :  { %7253 = vmatpush3.msra.mxu0 %v5656_v14  ;;  %7272 = vmatpush3.msra.mxu1 %v5743_v56 }
0x284d   :  { %7254 = vmatprep.subr.mxu0 %v9947_v0  ;;  %7273 = vmatprep.subr.mxu1 %v9947_v0 }
0x284e   :  { %7255 = vmatpush3.msra.mxu0 %v5655_v52  ;;  %7274 = vmatpush3.msra.mxu1 %v5742_v53 }
0x284f   :  { %7256 = vmatprep.subr.mxu0 %v9947_v0  ;;  %7275 = vmatprep.subr.mxu1 %v9947_v0 }
0x2850   :  { %7257 = vmatpush3.msra.mxu0 %v5654_v27  ;;  %7276 = vmatpush3.msra.mxu1 %v5741_v25 }
0x2851   :  { %7258 = vmatprep.subr.mxu0 %v9947_v0  ;;  %7280 = vmatprep.subr.mxu1 %v9947_v0 }
0x2852   :  { %7259 = vmatpush3.msra.mxu0 %v5653_v46 }
0x2853   :  { %7260 = vmatprep.subr.mxu0 %v9947_v0 }
0x2854   :  { %7261 = vmatpush3.msra.mxu0 %v5652_v21 }
0x2855   :  { %7262 = vmatprep.subr.mxu0 %v9947_v0 }
0x2856   :  { %7263 = vmatpush3.msra.mxu0 %v5651_v17 }
0x2857   :  { %7264 = vmatprep.subr.mxu0 %v9947_v0 }
0x2858   :  { %7265 = vmatpush3.msra.mxu0 %v5650_v22 }
0x2908   :  { %v5558_v10 = vpop.f32.mrf.mxu0  ;;  %v5635_v28 = vpop.f32.mrf.mxu1 }
0x2909   :  { %v5562_v31 = vadd.f32 %v5558_v10, %v5483_v2  ;;  %v5636_v38 = vadd.f32 %v7515_v43, %v5635_v28 }
0x290a   :  { %v7230_v47 = vpop.f32.mrf.mxu0  ;;  %v7249_v41 = vpop.f32.mrf.mxu1 }
0x290b   :  { %v6043_v51 = vmul.f32 -1.442695, %v5562_v31 }
0x290d   :  { %7467 = vpow2.f32 %v6043_v51 }
0x291a   :  { %v7468_v34 = vpop.eup %7467 }
0x291b   :  { %v5566_v15 = vadd.f32 1.0, %v7468_v34 }
0x291d   :  { %7469 = vrcp.f32 %v5566_v15 }
0x292a   :  { %v7470_v7 = vpop.eup %7469 }
0x292b   :  { %v5639_v24 = vmul.f32 %v7470_v7, %v5636_v38  ;;  %v5642_v20 = vsub.f32 1.0, %v7470_v7  ;;  %v5648_v42 = vmul.f32 %v7470_v7, %v5410_v50 }
0x292d   :  { %v5640_v11 = vadd.f32 %v5639_v24, %v5485_v36 }
0x292f   :  { %7471 = vtanh.f32 %v5640_v11 }
0x293c   :  { %v7472_v19 = vpop.eup %7471 }
0x293d   :  { %5644 = vrot.lane.b32.xlu0 %v7472_v19, %s7920_s17 }
0x29af   :  { %v5645_v37 = vpop.permute.xlu0 %5644 }
0x29b0   :  { %v5647_v40 = vmul.f32 %v5645_v37, %v5642_v20 }
0x29b2   :  { %v5649_v32 = vadd.f32 %v5648_v42, %v5647_v40 }
0x29b4   :  { %5666 = vrot.lane.b32.xlu1 %v5649_v32, %s7920_s17 }
0x2a26   :  { %v5667_v48 = vpop.permute.xlu1 %5666 }
0x2a27   :  { %7267 = vmatmul.mubr.msk.f32.vlgmr.msra.gmra.mxu0 %vm507_vm2, %v5667_v48 }
0x2ae7   :  { %v5736_v1 = vpop.f32.mrf.mxu0 }
0x2ae8   :  { %v5737_v13 = vadd.f32 %v6045_v12, %v5736_v1 }
0x2ae9   :  { %v7268_v3 = vpop.f32.mrf.mxu0 }
0x2aea   :  { %v5740_v45 = vmax.f32 %v5737_v13, 0.0 }
0x2aec   :  { %7278 = vmatmul.mubr.msk.f32.vlgmr.msra.gmra.mxu1 %vm5752_vm3, %v5740_v45 }
0x2aed   :  { %7281 = vmatpush3.msra.mxu1 %v5834_v18  ;;  %7296 = vmatprep.mubr.msk.f32.mxu1 %vm7921_vm1, %v9947_v0 }
0x2aee   :  { %7282 = vmatprep.subr.mxu1 %v9947_v0 }
0x2aef   :  { %7283 = vmatpush3.msra.mxu1 %v5833_v16 }
0x2af0   :  { %7284 = vmatprep.subr.mxu1 %v9947_v0 }
0x2af1   :  { %7285 = vmatpush3.msra.mxu1 %v5832_v54 }
0x2af2   :  { %7286 = vmatprep.subr.mxu1 %v9947_v0 }
0x2af3   :  { %7287 = vmatpush3.msra.mxu1 %v5831_v57 }
0x2af4   :  { %7288 = vmatprep.subr.mxu1 %v9947_v0 }
0x2af5   :  { %7289 = vmatpush3.msra.mxu1 %v5830_v55 }
0x2af6   :  { %7290 = vmatprep.subr.mxu1 %v9947_v0 }
0x2af7   :  { %7291 = vmatpush3.msra.mxu1 %v5829_v35 }
0x2af8   :  { %7292 = vmatprep.subr.mxu1 %v9947_v0 }
0x2af9   :  { %7293 = vmatpush3.msra.mxu1 %v5828_v30 }
0x2afa   :  { %7294 = vmatprep.subr.mxu1 %v9947_v0 }
0x2afb   :  { %7295 = vmatpush3.msra.mxu1 %v5827_v8 }
0x2bac   :  { %v5822_v39 = vpop.f32.mrf.mxu1 }
0x2bad   :  { %v5823_v43 = vadd.f32 %v6047_v61, %v5822_v39 }
0x2bae   :  { %v7279_v59 = vpop.f32.mrf.mxu1 }
0x2baf   :  { %v5826_v9 = vmax.f32 %v5823_v43, 0.0 }
0x2bb1   :  { %7297 = vmatmul.mubr.msk.f32.vlgmr.msra.gmra.mxu1 %vm507_vm2, %v5826_v9 }
0x2c71   :  { %v5911_v26 = vpop.f32.mrf.mxu1 }
0x2c72   :  { %v5912_v29 = vadd.f32 %v6049_v5, %v5911_v26 }
0x2c73   :  { %v7298_v44 = vpop.f32.mrf.mxu1 }
0x2c74   :  { %5917 = vperm.xlu1 %7327, %v5912_v29   ;;  %v5922_v0 = vsel %vm5921_vm4, %v5912_v29, 0.0 }
0x2c75   :  { %5923 = vadd.xlane.f32.xlu0 %v5922_v0 }
0x2cef   :  { %v5918_v33 = vpop.permute.xlu1 %5917 }
0x2cf0   :  { %v5920_v49 = vadd.f32 %v5918_v33, %v5912_v29 }
0x2cfe   :  { %v5924_v4 = vpop.xlane.xlu0 %5923 }
0x2cff   :  { %v5926_v50 = vmul.f32 0.125, %v5924_v4 }
0x2d01   :  { %v5927_v6 = vsub.f32 %v5920_v49, %v5926_v50 }
0x2d03   :  { %5928 = vst.msk [vmem:[#allocation29] sm:$0x3] %vm5921_vm4, %v5927_v6 }
0x2d04   :  { %7867 = shalt.err (!%p7864_p5)
}
0x2d05   :  { %s9950_s4 = sld [smem:[#allocation49_spill]] }
0x2d0b   :  { %5938 = dma.vmem_to_hbm [thread:$0]  %s5936_s27, 32, %s9950_s4, [#allocation4]  }
0x2d0c   :  { %7894 = dma.done.wait [#allocation4], 32  }
0x2d0d   :  { %7895 = vsyncadd [#allocation4], 4294967264 }
0x2d0e   :  { %5942 = vsyncpa [#allocation3], 1 }
0x2d0f   :  { %5943 = vsyncpa [#allocation6], 1 }
0x2d10   :  { %5944 = vsyncpa [#allocation9], 1 }
0x2d11   :  { %5945 = vsyncpa [#allocation12], 1 }
0x2d12   :  { %5946 = vsyncpa [#allocation15], 1 }
0x2d13   :  { %5947 = vsyncpa [#allocation18], 1 }
0x2d14   :  { %5948 = vsyncpa [#allocation21], 1 }
0x2d15   :  { %5949 = vsyncpa [#allocation24], 1 }
0x2d16   :  { %5950 = vsyncpa [#allocation27], 1 }
0x2d17   :  { %5951 = vsyncpa [#allocation4], 1 }

</bundles_post_ra>
